<compile_context>
chip_gen: v7x
topology: tpu7x:2x2x1
jax: 0.10.0
libtpu: 0.0.40
codegen_flags: <defaults>
</compile_context>

<pallas_src>
import jax
import jax.numpy as jnp
from jax.experimental import pallas as pl
from jax.experimental.pallas import tpu as pltpu

UPSCALE = 4
HID = 64


def _srnet_mlp_kernel(p_ref,
                      w1, b1, w2, b2, w3, b3, w4, b4, w5, b5, w6, b6,
                      o_ref):
    # p_ref: (4, TM) f32 patch tile; o_ref: (upscale**2, TM) bf16.
    x = p_ref[...]                                   # (4, TM) f32
    w1f = w1[...]                                    # (64, 4) f32

    # conv1 (2x2 receptive field, K=4): VPU broadcast-FMA chain, avoids a
    # wasted K=4 MXU pass.  Stays in f32 (v5e has no bf16 VPU).
    h = (w1f[:, 0:1] * x[0:1, :]
         + w1f[:, 1:2] * x[1:2, :]
         + w1f[:, 2:3] * x[2:3, :]
         + w1f[:, 3:4] * x[3:4, :]) + b1[...]        # (64, TM) f32

    # conv2..conv5: ReLU (f32) -> bf16 operand -> 64x64 MXU matmul, f32 accum.
    h = jnp.dot(w2[...], jnp.maximum(h, 0.0).astype(jnp.bfloat16),
                preferred_element_type=jnp.float32) + b2[...]
    h = jnp.dot(w3[...], jnp.maximum(h, 0.0).astype(jnp.bfloat16),
                preferred_element_type=jnp.float32) + b3[...]
    h = jnp.dot(w4[...], jnp.maximum(h, 0.0).astype(jnp.bfloat16),
                preferred_element_type=jnp.float32) + b4[...]
    h = jnp.dot(w5[...], jnp.maximum(h, 0.0).astype(jnp.bfloat16),
                preferred_element_type=jnp.float32) + b5[...]
    # conv6: 16-wide head; ReLU on its input, no ReLU on the output.
    out = jnp.dot(w6[...], jnp.maximum(h, 0.0).astype(jnp.bfloat16),
                  preferred_element_type=jnp.float32) + b6[...]
    o_ref[...] = out.astype(o_ref.dtype)             # bf16 store: halves output HBM traffic


def init_params(key, upscale=UPSCALE):
    """kaiming_normal(fan_in) weights, zero biases, in (out_features, in_features)."""
    dims_in = [4, HID, HID, HID, HID, HID]
    dims_out = [HID, HID, HID, HID, HID, upscale * upscale]
    keys = jax.random.split(key, len(dims_in))
    params = []
    for k, fi, fo in zip(keys, dims_in, dims_out):
        std = (2.0 / fi) ** 0.5  # kaiming_normal, fan_in, gain sqrt(2)
        w = std * jax.random.normal(k, (fo, fi), dtype=jnp.float32)
        b = jnp.zeros((fo, 1), dtype=jnp.float32)
        params.append((w, b))
    return params


def _extract_patches(x):
    """x: (B, C, H, W) -> (4, B*C*(H-1)*(W-1)) with pixel index row-major over (b*c, h, w).

    Feature order matches the flattened torch conv1 weight (kh, kw):
    [(h,w), (h,w+1), (h+1,w), (h+1,w+1)].
    """
    B, C, H, W = x.shape
    Ho, Wo = H - 1, W - 1
    xf = x.reshape(B * C, H, W).astype(jnp.float32)
    p00 = xf[:, :Ho, :Wo]
    p01 = xf[:, :Ho, 1:]
    p10 = xf[:, 1:, :Wo]
    p11 = xf[:, 1:, 1:]
    return jnp.stack([p00, p01, p10, p11], axis=0).reshape(4, -1)


def _pixel_shuffle(cols, B, C, Ho, Wo, upscale):
    """cols: (upscale**2, B*C*Ho*Wo), channel k = i*upscale + j -> offset (i, j)."""
    r = upscale
    o = cols.reshape(r, r, B * C, Ho, Wo)     # (i, j, bc, h, w)
    o = o.transpose(2, 3, 0, 4, 1)            # (bc, h, i, w, j)
    return o.reshape(B, C, r * Ho, r * Wo)


def _cdiv(a, b):
    return (a + b - 1) // b


def _round_up(v, m):
    return ((v + m - 1) // m) * m


def srnet_forward(x, params, upscale=UPSCALE, tile_m=8192):
    B, C, H, W = x.shape
    Ho, Wo = H - 1, W - 1
    r2 = upscale * upscale

    patches = _extract_patches(x)                    # (4, N) f32
    N = patches.shape[1]

    # Tile selection (perf feedback):
    #  * large lane-dense tiles (default 8192) amortize per-grid-step overhead;
    #  * ALWAYS an even number of grid steps so the "parallel" axis splits
    #    evenly over v7x's 2 TensorCores (tile_m is shrunk, never grown, so the
    #    padded tail stays < one tile of wasted work).
    tm_cap = max(256, (tile_m // 128) * 128)
    steps = 2 * max(1, _cdiv(N, 2 * tm_cap))
    tm = max(128, _round_up(_cdiv(N, steps), 128))
    Np = steps * tm
    patches = jnp.pad(patches, ((0, 0), (0, Np - N)))

    (w1, b1), (w2, b2), (w3, b3), (w4, b4), (w5, b5), (w6, b6) = params
    # bf16 MXU operands for the 64-wide layers; layer 1 stays f32 (VPU path).
    w2b, w3b, w4b, w5b, w6b = (w.astype(jnp.bfloat16)
                               for w in (w2, w3, w4, w5, w6))

    flat_args = [patches, w1, b1, w2b, b2, w3b, b3, w4b, b4, w5b, b5, w6b, b6]
    in_specs = [pl.BlockSpec((4, tm), lambda i: (0, i))]
    for a in flat_args[1:]:
        # Constant index_map: weights/biases stay resident in VMEM across grid steps.
        in_specs.append(pl.BlockSpec(a.shape, lambda i: (0, 0)))

    out = pl.pallas_call(
        _srnet_mlp_kernel,
        out_shape=jax.ShapeDtypeStruct((r2, Np), jnp.bfloat16),
        grid=(steps,),
        in_specs=in_specs,
        out_specs=pl.BlockSpec((r2, tm), lambda i: (0, i)),
        compiler_params=pltpu.CompilerParams(dimension_semantics=("parallel",)),
    )(*flat_args)

    y = _pixel_shuffle(out[:, :N], B, C, Ho, Wo, upscale)
    return y.astype(jnp.float32)


def _reference_forward(x, params, upscale=UPSCALE):
    """Pure-JAX f32 reference of the PyTorch forward (precision=HIGHEST dots)."""
    B, C, H, W = x.shape
    Ho, Wo = H - 1, W - 1
    xp = _extract_patches(x)                          # (4, N)
    (w1, b1), (w2, b2), (w3, b3), (w4, b4), (w5, b5), (w6, b6) = params

    h = jnp.dot(w1, xp, precision=jax.lax.Precision.HIGHEST) + b1

    def layer(w, b, h):
        return jnp.dot(w, jnp.maximum(h, 0.0),
                       precision=jax.lax.Precision.HIGHEST) + b

    h = layer(w2, b2, h)
    h = layer(w3, b3, h)
    h = layer(w4, b4, h)
    h = layer(w5, b5, h)
    h = layer(w6, b6, h)                              # (16, N), no final ReLU
    return _pixel_shuffle(h, B, C, Ho, Wo, upscale)


if __name__ == "__main__":
    key = jax.random.PRNGKey(0)
    kx, kp = jax.random.split(key)

    # Small shapes consistent with the module's forward: NCHW input.
    B, C, H, W = 2, 4, 16, 16
    x = jax.random.normal(kx, (B, C, H, W), dtype=jnp.float32)
    params = init_params(kp)

    y = srnet_forward(x, params)
    y = jax.block_until_ready(y)
    assert y.shape == (B, C, UPSCALE * (H - 1), UPSCALE * (W - 1)), y.shape

    y_ref = jax.block_until_ready(_reference_forward(x, params))
    # Tolerance sized for 5 chained bf16-operand MXU matmuls (f32 accumulation)
    # plus a bf16 output store, compared against a pure-f32 reference.
    assert jnp.allclose(y, y_ref, atol=1e-1, rtol=2e-2), \
        float(jnp.max(jnp.abs(y - y_ref)))

    print("KERNEL_OK")
</pallas_src>

<mosaic_0001>
module attributes {stable_mosaic.version = 11 : i64} {
  func.func @_srnet_mlp_kernel(%arg0: i32, %arg1: memref<4x1024xf32, #tpu.memory_space<vmem>>, %arg2: memref<64x4xf32, #tpu.memory_space<vmem>>, %arg3: memref<64x1xf32, #tpu.memory_space<vmem>>, %arg4: memref<64x64xbf16, #tpu.memory_space<vmem>>, %arg5: memref<64x1xf32, #tpu.memory_space<vmem>>, %arg6: memref<64x64xbf16, #tpu.memory_space<vmem>>, %arg7: memref<64x1xf32, #tpu.memory_space<vmem>>, %arg8: memref<64x64xbf16, #tpu.memory_space<vmem>>, %arg9: memref<64x1xf32, #tpu.memory_space<vmem>>, %arg10: memref<64x64xbf16, #tpu.memory_space<vmem>>, %arg11: memref<64x1xf32, #tpu.memory_space<vmem>>, %arg12: memref<16x64xbf16, #tpu.memory_space<vmem>>, %arg13: memref<16x1xf32, #tpu.memory_space<vmem>>, %arg14: memref<16x1024xbf16, #tpu.memory_space<vmem>>) attributes {dimension_semantics = [#tpu.dimension_semantics<parallel>], iteration_bounds = array<i64: 2>, scalar_prefetch = 0 : i64, scratch_operands = 0 : i64, tpu.core_type = #tpu.core_type<tc>, window_params = [{transform_indices = @transform_0, window_bounds = array<i64: 4, 1024>}, {pipeline_mode = #tpu.pipeline_mode<synchronous>, transform_indices = @transform_1, window_bounds = array<i64: 64, 4>}, {pipeline_mode = #tpu.pipeline_mode<synchronous>, transform_indices = @transform_2, window_bounds = array<i64: 64, 1>}, {pipeline_mode = #tpu.pipeline_mode<synchronous>, transform_indices = @transform_3, window_bounds = array<i64: 64, 64>}, {pipeline_mode = #tpu.pipeline_mode<synchronous>, transform_indices = @transform_4, window_bounds = array<i64: 64, 1>}, {pipeline_mode = #tpu.pipeline_mode<synchronous>, transform_indices = @transform_5, window_bounds = array<i64: 64, 64>}, {pipeline_mode = #tpu.pipeline_mode<synchronous>, transform_indices = @transform_6, window_bounds = array<i64: 64, 1>}, {pipeline_mode = #tpu.pipeline_mode<synchronous>, transform_indices = @transform_7, window_bounds = array<i64: 64, 64>}, {pipeline_mode = #tpu.pipeline_mode<synchronous>, transform_indices = @transform_8, window_bounds = array<i64: 64, 1>}, {pipeline_mode = #tpu.pipeline_mode<synchronous>, transform_indices = @transform_9, window_bounds = array<i64: 64, 64>}, {pipeline_mode = #tpu.pipeline_mode<synchronous>, transform_indices = @transform_10, window_bounds = array<i64: 64, 1>}, {pipeline_mode = #tpu.pipeline_mode<synchronous>, transform_indices = @transform_11, window_bounds = array<i64: 16, 64>}, {pipeline_mode = #tpu.pipeline_mode<synchronous>, transform_indices = @transform_12, window_bounds = array<i64: 16, 1>}, {transform_indices = @transform_13, window_bounds = array<i64: 16, 1024>}]} {
    %c0 = arith.constant 0 : index
    %c0_0 = arith.constant 0 : index
    %0 = vector.load %arg1[%c0, %c0_0] : memref<4x1024xf32, #tpu.memory_space<vmem>>, vector<4x1024xf32>
    %c0_1 = arith.constant 0 : index
    %c0_2 = arith.constant 0 : index
    %1 = vector.load %arg2[%c0_1, %c0_2] : memref<64x4xf32, #tpu.memory_space<vmem>>, vector<64x4xf32>
    %2 = vector.extract_strided_slice %1 {offsets = [0, 0], sizes = [64, 1], strides = [1, 1]} : vector<64x4xf32> to vector<64x1xf32>
    %3 = vector.extract_strided_slice %0 {offsets = [0, 0], sizes = [1, 1024], strides = [1, 1]} : vector<4x1024xf32> to vector<1x1024xf32>
    %4 = vector.broadcast %2 : vector<64x1xf32> to vector<64x1024xf32>
    %5 = vector.broadcast %3 : vector<1x1024xf32> to vector<64x1024xf32>
    %6 = arith.mulf %4, %5 : vector<64x1024xf32>
    %7 = vector.extract_strided_slice %1 {offsets = [0, 1], sizes = [64, 1], strides = [1, 1]} : vector<64x4xf32> to vector<64x1xf32>
    %8 = vector.extract_strided_slice %0 {offsets = [1, 0], sizes = [1, 1024], strides = [1, 1]} : vector<4x1024xf32> to vector<1x1024xf32>
    %9 = vector.broadcast %7 : vector<64x1xf32> to vector<64x1024xf32>
    %10 = vector.broadcast %8 : vector<1x1024xf32> to vector<64x1024xf32>
    %11 = arith.mulf %9, %10 : vector<64x1024xf32>
    %12 = arith.addf %6, %11 : vector<64x1024xf32>
    %13 = vector.extract_strided_slice %1 {offsets = [0, 2], sizes = [64, 1], strides = [1, 1]} : vector<64x4xf32> to vector<64x1xf32>
    %14 = vector.extract_strided_slice %0 {offsets = [2, 0], sizes = [1, 1024], strides = [1, 1]} : vector<4x1024xf32> to vector<1x1024xf32>
    %15 = vector.broadcast %13 : vector<64x1xf32> to vector<64x1024xf32>
    %16 = vector.broadcast %14 : vector<1x1024xf32> to vector<64x1024xf32>
    %17 = arith.mulf %15, %16 : vector<64x1024xf32>
    %18 = arith.addf %12, %17 : vector<64x1024xf32>
    %19 = vector.extract_strided_slice %1 {offsets = [0, 3], sizes = [64, 1], strides = [1, 1]} : vector<64x4xf32> to vector<64x1xf32>
    %20 = vector.extract_strided_slice %0 {offsets = [3, 0], sizes = [1, 1024], strides = [1, 1]} : vector<4x1024xf32> to vector<1x1024xf32>
    %21 = vector.broadcast %19 : vector<64x1xf32> to vector<64x1024xf32>
    %22 = vector.broadcast %20 : vector<1x1024xf32> to vector<64x1024xf32>
    %23 = arith.mulf %21, %22 : vector<64x1024xf32>
    %24 = arith.addf %18, %23 : vector<64x1024xf32>
    %c0_3 = arith.constant 0 : index
    %c0_4 = arith.constant 0 : index
    %25 = vector.load %arg3[%c0_3, %c0_4] : memref<64x1xf32, #tpu.memory_space<vmem>>, vector<64x1xf32>
    %26 = vector.broadcast %25 : vector<64x1xf32> to vector<64x1024xf32>
    %27 = arith.addf %24, %26 : vector<64x1024xf32>
    %c0_5 = arith.constant 0 : index
    %c0_6 = arith.constant 0 : index
    %28 = vector.load %arg4[%c0_5, %c0_6] : memref<64x64xbf16, #tpu.memory_space<vmem>>, vector<64x64xbf16>
    %cst = arith.constant 0.000000e+00 : f32
    %29 = vector.broadcast %cst : f32 to vector<64x1024xf32>
    %30 = arith.maximumf %27, %29 : vector<64x1024xf32>
    %31 = arith.truncf %30 : vector<64x1024xf32> to vector<64x1024xbf16>
    %cst_7 = arith.constant dense<0.000000e+00> : vector<64x1024xf32>
    %32 = tpu.matmul %28, %31, %cst_7 {dimension_numbers = #tpu.dot_dimension_numbers<[1], [0], [0], [1], [0, 0, 1, 1], [], []>} : vector<64x64xbf16>, vector<64x1024xbf16>, vector<64x1024xf32> -> vector<64x1024xf32>
    %c0_8 = arith.constant 0 : index
    %c0_9 = arith.constant 0 : index
    %33 = vector.load %arg5[%c0_8, %c0_9] : memref<64x1xf32, #tpu.memory_space<vmem>>, vector<64x1xf32>
    %34 = vector.broadcast %33 : vector<64x1xf32> to vector<64x1024xf32>
    %35 = arith.addf %32, %34 : vector<64x1024xf32>
    %c0_10 = arith.constant 0 : index
    %c0_11 = arith.constant 0 : index
    %36 = vector.load %arg6[%c0_10, %c0_11] : memref<64x64xbf16, #tpu.memory_space<vmem>>, vector<64x64xbf16>
    %cst_12 = arith.constant 0.000000e+00 : f32
    %37 = vector.broadcast %cst_12 : f32 to vector<64x1024xf32>
    %38 = arith.maximumf %35, %37 : vector<64x1024xf32>
    %39 = arith.truncf %38 : vector<64x1024xf32> to vector<64x1024xbf16>
    %cst_13 = arith.constant dense<0.000000e+00> : vector<64x1024xf32>
    %40 = tpu.matmul %36, %39, %cst_13 {dimension_numbers = #tpu.dot_dimension_numbers<[1], [0], [0], [1], [0, 0, 1, 1], [], []>} : vector<64x64xbf16>, vector<64x1024xbf16>, vector<64x1024xf32> -> vector<64x1024xf32>
    %c0_14 = arith.constant 0 : index
    %c0_15 = arith.constant 0 : index
    %41 = vector.load %arg7[%c0_14, %c0_15] : memref<64x1xf32, #tpu.memory_space<vmem>>, vector<64x1xf32>
    %42 = vector.broadcast %41 : vector<64x1xf32> to vector<64x1024xf32>
    %43 = arith.addf %40, %42 : vector<64x1024xf32>
    %c0_16 = arith.constant 0 : index
    %c0_17 = arith.constant 0 : index
    %44 = vector.load %arg8[%c0_16, %c0_17] : memref<64x64xbf16, #tpu.memory_space<vmem>>, vector<64x64xbf16>
    %cst_18 = arith.constant 0.000000e+00 : f32
    %45 = vector.broadcast %cst_18 : f32 to vector<64x1024xf32>
    %46 = arith.maximumf %43, %45 : vector<64x1024xf32>
    %47 = arith.truncf %46 : vector<64x1024xf32> to vector<64x1024xbf16>
    %cst_19 = arith.constant dense<0.000000e+00> : vector<64x1024xf32>
    %48 = tpu.matmul %44, %47, %cst_19 {dimension_numbers = #tpu.dot_dimension_numbers<[1], [0], [0], [1], [0, 0, 1, 1], [], []>} : vector<64x64xbf16>, vector<64x1024xbf16>, vector<64x1024xf32> -> vector<64x1024xf32>
    %c0_20 = arith.constant 0 : index
    %c0_21 = arith.constant 0 : index
    %49 = vector.load %arg9[%c0_20, %c0_21] : memref<64x1xf32, #tpu.memory_space<vmem>>, vector<64x1xf32>
    %50 = vector.broadcast %49 : vector<64x1xf32> to vector<64x1024xf32>
    %51 = arith.addf %48, %50 : vector<64x1024xf32>
    %c0_22 = arith.constant 0 : index
    %c0_23 = arith.constant 0 : index
    %52 = vector.load %arg10[%c0_22, %c0_23] : memref<64x64xbf16, #tpu.memory_space<vmem>>, vector<64x64xbf16>
    %cst_24 = arith.constant 0.000000e+00 : f32
    %53 = vector.broadcast %cst_24 : f32 to vector<64x1024xf32>
    %54 = arith.maximumf %51, %53 : vector<64x1024xf32>
    %55 = arith.truncf %54 : vector<64x1024xf32> to vector<64x1024xbf16>
    %cst_25 = arith.constant dense<0.000000e+00> : vector<64x1024xf32>
    %56 = tpu.matmul %52, %55, %cst_25 {dimension_numbers = #tpu.dot_dimension_numbers<[1], [0], [0], [1], [0, 0, 1, 1], [], []>} : vector<64x64xbf16>, vector<64x1024xbf16>, vector<64x1024xf32> -> vector<64x1024xf32>
    %c0_26 = arith.constant 0 : index
    %c0_27 = arith.constant 0 : index
    %57 = vector.load %arg11[%c0_26, %c0_27] : memref<64x1xf32, #tpu.memory_space<vmem>>, vector<64x1xf32>
    %58 = vector.broadcast %57 : vector<64x1xf32> to vector<64x1024xf32>
    %59 = arith.addf %56, %58 : vector<64x1024xf32>
    %c0_28 = arith.constant 0 : index
    %c0_29 = arith.constant 0 : index
    %60 = vector.load %arg12[%c0_28, %c0_29] : memref<16x64xbf16, #tpu.memory_space<vmem>>, vector<16x64xbf16>
    %cst_30 = arith.constant 0.000000e+00 : f32
    %61 = vector.broadcast %cst_30 : f32 to vector<64x1024xf32>
    %62 = arith.maximumf %59, %61 : vector<64x1024xf32>
    %63 = arith.truncf %62 : vector<64x1024xf32> to vector<64x1024xbf16>
    %cst_31 = arith.constant dense<0.000000e+00> : vector<16x1024xf32>
    %64 = tpu.matmul %60, %63, %cst_31 {dimension_numbers = #tpu.dot_dimension_numbers<[1], [0], [0], [1], [0, 0, 1, 1], [], []>} : vector<16x64xbf16>, vector<64x1024xbf16>, vector<16x1024xf32> -> vector<16x1024xf32>
    %c0_32 = arith.constant 0 : index
    %c0_33 = arith.constant 0 : index
    %65 = vector.load %arg13[%c0_32, %c0_33] : memref<16x1xf32, #tpu.memory_space<vmem>>, vector<16x1xf32>
    %66 = vector.broadcast %65 : vector<16x1xf32> to vector<16x1024xf32>
    %67 = arith.addf %64, %66 : vector<16x1024xf32>
    %68 = arith.truncf %67 : vector<16x1024xf32> to vector<16x1024xbf16>
    %c0_34 = arith.constant 0 : index
    %c0_35 = arith.constant 0 : index
    %69 = vector.load %arg14[%c0_34, %c0_35] : memref<16x1024xbf16, #tpu.memory_space<vmem>>, vector<16x1024xbf16>
    tpu.vector_store %arg14[%c0_34, %c0_35], %68 {strides = array<i32>} : memref<16x1024xbf16, #tpu.memory_space<vmem>>, vector<16x1024xbf16>,
    return
  }
  func.func @transform_0(%arg0: i32) -> (i32, i32) {
    %c0_i32 = arith.constant 0 : i32
    %c0_i32_0 = arith.constant 0 : i32
    return %c0_i32, %arg0 : i32, i32
  }
  func.func @transform_1(%arg0: i32) -> (i32, i32) {
    %c0_i32 = arith.constant 0 : i32
    %c0_i32_0 = arith.constant 0 : i32
    %c0_i32_1 = arith.constant 0 : i32
    return %c0_i32, %c0_i32_0 : i32, i32
  }
  func.func @transform_2(%arg0: i32) -> (i32, i32) {
    %c0_i32 = arith.constant 0 : i32
    %c0_i32_0 = arith.constant 0 : i32
    %c0_i32_1 = arith.constant 0 : i32
    return %c0_i32, %c0_i32_0 : i32, i32
  }
  func.func @transform_3(%arg0: i32) -> (i32, i32) {
    %c0_i32 = arith.constant 0 : i32
    %c0_i32_0 = arith.constant 0 : i32
    %c0_i32_1 = arith.constant 0 : i32
    return %c0_i32, %c0_i32_0 : i32, i32
  }
  func.func @transform_4(%arg0: i32) -> (i32, i32) {
    %c0_i32 = arith.constant 0 : i32
    %c0_i32_0 = arith.constant 0 : i32
    %c0_i32_1 = arith.constant 0 : i32
    return %c0_i32, %c0_i32_0 : i32, i32
  }
  func.func @transform_5(%arg0: i32) -> (i32, i32) {
    %c0_i32 = arith.constant 0 : i32
    %c0_i32_0 = arith.constant 0 : i32
    %c0_i32_1 = arith.constant 0 : i32
    return %c0_i32, %c0_i32_0 : i32, i32
  }
  func.func @transform_6(%arg0: i32) -> (i32, i32) {
    %c0_i32 = arith.constant 0 : i32
    %c0_i32_0 = arith.constant 0 : i32
    %c0_i32_1 = arith.constant 0 : i32
    return %c0_i32, %c0_i32_0 : i32, i32
  }
  func.func @transform_7(%arg0: i32) -> (i32, i32) {
    %c0_i32 = arith.constant 0 : i32
    %c0_i32_0 = arith.constant 0 : i32
    %c0_i32_1 = arith.constant 0 : i32
    return %c0_i32, %c0_i32_0 : i32, i32
  }
  func.func @transform_8(%arg0: i32) -> (i32, i32) {
    %c0_i32 = arith.constant 0 : i32
    %c0_i32_0 = arith.constant 0 : i32
    %c0_i32_1 = arith.constant 0 : i32
    return %c0_i32, %c0_i32_0 : i32, i32
  }
  func.func @transform_9(%arg0: i32) -> (i32, i32) {
    %c0_i32 = arith.constant 0 : i32
    %c0_i32_0 = arith.constant 0 : i32
    %c0_i32_1 = arith.constant 0 : i32
    return %c0_i32, %c0_i32_0 : i32, i32
  }
  func.func @transform_10(%arg0: i32) -> (i32, i32) {
    %c0_i32 = arith.constant 0 : i32
    %c0_i32_0 = arith.constant 0 : i32
    %c0_i32_1 = arith.constant 0 : i32
    return %c0_i32, %c0_i32_0 : i32, i32
  }
  func.func @transform_11(%arg0: i32) -> (i32, i32) {
    %c0_i32 = arith.constant 0 : i32
    %c0_i32_0 = arith.constant 0 : i32
    %c0_i32_1 = arith.constant 0 : i32
    return %c0_i32, %c0_i32_0 : i32, i32
  }
  func.func @transform_12(%arg0: i32) -> (i32, i32) {
    %c0_i32 = arith.constant 0 : i32
    %c0_i32_0 = arith.constant 0 : i32
    %c0_i32_1 = arith.constant 0 : i32
    return %c0_i32, %c0_i32_0 : i32, i32
  }
  func.func @transform_13(%arg0: i32) -> (i32, i32) {
    %c0_i32 = arith.constant 0 : i32
    %c0_i32_0 = arith.constant 0 : i32
    return %c0_i32, %arg0 : i32, i32
  }
}

</mosaic_0001>

<bundles_post_ra>
// kernel: tpu_custom_call.1
= control target key start
LH: loop header
LB: loop body
LE: loop exit
PB: predicated region body
PF: predicated region fallthrough
CT: control target
= control target key end

     0   :  { %s6169_s0 = inlined_call_operand.vmem [shape: f32[4,2048], index: 0, kind: input, shape index: {}]   ;;  %s6170_s1 = inlined_call_operand.vmem [shape: f32[64,4], index: 1, kind: input, shape index: {}]   ;;  %s6171_s2 = inlined_call_operand.vmem [shape: f32[64,1], index: 2, kind: input, shape index: {}]   ;;  %s6172_s3 = inlined_call_operand.vmem [shape: bf16[64,64], index: 3, kind: input, shape index: {}]   ;;  %s6173_s4 = inlined_call_operand.vmem [shape: f32[64,1], index: 4, kind: input, shape index: {}]   ;;  %s6174_s5 = inlined_call_operand.vmem [shape: bf16[64,64], index: 5, kind: input, shape index: {}]   ;;  %s6175_s6 = inlined_call_operand.vmem [shape: f32[64,1], index: 6, kind: input, shape index: {}]   ;;  %s6176_s7 = inlined_call_operand.vmem [shape: bf16[64,64], index: 7, kind: input, shape index: {}]   ;;  %s6177_s8 = inlined_call_operand.vmem [shape: f32[64,1], index: 8, kind: input, shape index: {}]   ;;  %s6178_s9 = inlined_call_operand.vmem [shape: bf16[64,64], index: 9, kind: input, shape index: {}]   ;;  %s6179_s10 = inlined_call_operand.vmem [shape: f32[64,1], index: 10, kind: input, shape index: {}]   ;;  %s6180_s11 = inlined_call_operand.vmem [shape: bf16[16,64], index: 11, kind: input, shape index: {}]   ;;  %s6181_s12 = inlined_call_operand.vmem [shape: f32[16,1], index: 12, kind: input, shape index: {}]   ;;  %s6182_s13 = inlined_call_operand.hbm [shape: bf16[16,2048], index: 13, kind: output, shape index: {}]  }
   0x1   :  { %6258 = sst [smem:[#allocation115_spill]] %s6170_s1 }
   0x2   :  { %18 = vsyncpa [#allocation3], 0 }
   0x3   :  { %20 = vsyncpa [#allocation3 + $0x1], 0  ;;  %s4111_s25 = smov 0   ;;  %s4113_s26 = smov 0  }
   0x4   :  { %s4115_s27 = smov 0   ;;  %s4117_s28 = smov 0  }
   0x5 LB: > { %6259 = sst [smem:[#allocation5_spill]] %s4027_s27  ;;  %s4132_s29 = sadd.s32 4294967295, %s4031_s28   ;;  %s4031_s28 = sphi %s4117_s28, %s6522_s28   ;;  %s4027_s27 = sphi %s4115_s27, %s6519_s27   ;;  %s4023_s26 = sphi %s4113_s26, %s6521_s26   ;;  %s4019_s25 = sphi %s4111_s25, %s6520_s25  }
   0x6   : > { %s3770_s30 = sadd.s32 4294967294, %s4031_s28   ;;  %s4136_s14 = sadd.s32 1, %s4031_s28  }
   0x7   : > { %s311_s15 = sadd.s32 1, %s4027_s27  ;;  %s308_s16 = ssub.s32 %s4031_s28, %s4136_s14 }
   0x8   : > { %p321_p0 = scmp.ne.s32.totalorder %s4027_s27, %s4023_s26  ;;  %p309_p1 = scmp.eq.s32.totalorder %s308_s16, 0 }
   0x9   : > { %p322_p2 = scmp.eq.s32.totalorder %s4132_s29, 1  ;;  %p327_p3 = scmp.ne.s32.totalorder %s4023_s26, %s4019_s25 }
   0xa   : > { %p328_p4 = scmp.eq.s32.totalorder %s3770_s30, 1  ;;  %p3773_p7 = scmp.ge.s32.totalorder %s4031_s28, 1 }
   0xb   : > { %s4147_s17 = scalar_select %p309_p1, %s4027_s27, %s311_s15  }
   0xc   : > { %p4149_p5 = por %p322_p2, %p321_p0  ;;  %p4153_p6 = por %p328_p4, %p327_p3 }
   0xd   : > { %6260 = sst [smem:[#allocation6_spill]] %s4147_s17  ;;  %p391_p8 = scmp.lt.s32.totalorder %s4031_s28, 3 }
   0xf   : > { %p392_p9 = pnand %p3773_p7, %p391_p8 }
  0x11   : > { %395 = sbr.rel (%p392_p9) target bundleno = 1567 (0x61f), region = 72 }
  0x18   : > { %s6263_s1 = sld [smem:[#allocation115_spill]]  ;;  %v4033_v2 = vmov 1   ;;  %v6184_v4 = vmov 0   ;;  %v4035_v5 = vmov 2   ;;  %v4036_v8 = vmov 3   ;;  %v1334_v12 = vld [vmem:[%s6171_s2 + $0x18] sm:$0xff] }
  0x19   : > { %3937 = vset.pattern.permute.xlu0 %v4033_v2  ;;  %3930 = vset.pattern.permute.xlu1 %v4033_v2  ;;  %v1336_v13 = vld [vmem:[%s6171_s2 + $0x28] sm:$0xff]  ;;  %v1331_v14 = vld [vmem:[%s6171_s2] sm:$0xff]  ;;  %v1549_v17 = vld [vmem:[%s6173_s4 + $0x10] sm:$0xff]  ;;  %s3775_s23 = sshll.u32 %s4132_s29, 3  ;;  %v499_v29 = vlaneseq  ;;  %vm1615_vm0 = vcmask 523264   ;;  %s432_s20 = sand.u32 1, %s4023_s26  }
  0x1a   : > { %1660 = vmatprep.mubr.bf16.mxu0 %v6184_v4  ;;  %1733 = vmatprep.mubr.bf16.mxu1 %v6184_v4  ;;  %v1547_v15 = vld [vmem:[%s6173_s4] sm:$0xff]  ;;  %v1332_v16 = vld [vmem:[%s6171_s2 + $0x8] sm:$0xff]  ;;  %v1553_v19 = vld [vmem:[%s6173_s4 + $0x30] sm:$0xff]  ;;  %p436_p10 = scmp.lt.s32.totalorder %s3775_s23, 15  ;;  %s3774_s21 = sshll.u32 %s432_s20, 6 }
  0x1b   : > { %v1551_v18 = vld [vmem:[%s6173_s4 + $0x20] sm:$0xff]  ;;  %v2026_v21 = vld [vmem:[%s6175_s6 + $0x10] sm:$0xff]  ;;  %v500_v32 = vshrl.u32 %v499_v29, 7  ;;  %v1338_v45 = vld [vmem:[%s6171_s2 + $0x38] sm:$0xff]  ;;  %s3883_s22 = sshll.u32 %s4132_s29, 9  ;;  %s6128_s29 = scalar_lea.sflag [#allocation3], %s432_s20 }
  0x1c   : > { %v2024_v20 = vld [vmem:[%s6175_s6] sm:$0xff]  ;;  %v2030_v23 = vld [vmem:[%s6175_s6 + $0x30] sm:$0xff]  ;;  %s6524_s23 = smov (!%p436_p10, %s3775_s23), 15  ;;  %v1548_v61 = vld [vmem:[%s6173_s4 + $0x8] sm:$0xff]  ;;  %s6122_s15 = scalar_lea.hbm %s6182_s13, %s3883_s22 }
  0x1d   : > { %v2028_v22 = vld [vmem:[%s6175_s6 + $0x20] sm:$0xff]  ;;  %v1333_v24 = vld [vmem:[%s6171_s2 + $0x10] sm:$0xff]  ;;  %s3776_s24 = sshll.u32 %s6524_s23, 2  ;;  %v4273_v34 = vsub.s32 4, %v500_v32  ;;  %v4278_v36 = vsub.s32 5, %v500_v32  ;;  %v4280_v37 = vsub.s32 6, %v500_v32 }
  0x1e   : > { %v451_v0 = vld [vmem:[%s6263_s1 + $0x20] sm:$0xff]  ;;  %v448_v3 = vld [vmem:[%s6263_s1 + $0x8] sm:$0xff]  ;;  %v450_v6 = vld [vmem:[%s6263_s1 + $0x18] sm:$0xff]  ;;  %s4271_s27 = scalar_lea.vmem %s6169_s0, %s3776_s24  ;;  %v4286_v40 = vsub.s32 0, %v500_v32  ;;  %v4288_v41 = vsub.s32 1, %v500_v32  ;;  %v4290_v42 = vsub.s32 2, %v500_v32 }
  0x1f   : > { %v447_v1 = vld [vmem:[%s6263_s1] sm:$0xff]  ;;  %652 = vperm.xlu0 %3937, %v451_v0   ;;  %v449_v7 = vld [vmem:[%s6263_s1 + $0x10] sm:$0xff]  ;;  %v452_v10 = vld [vmem:[%s6263_s1 + $0x28] sm:$0xff]  ;;  %v4297_v46 = vsub.s32 3, %v500_v32  ;;  %v4299_v47 = vsub.s32 7, %v500_v32  ;;  %s4037_s16 = smov [#allocation2]  }
  0x20   : > { %636 = vperm.xlu1 %3930, %v447_v1   ;;  %v453_v9 = vld [vmem:[%s6263_s1 + $0x30] sm:$0xff]  ;;  %v454_v11 = vld [vmem:[%s6263_s1 + $0x38] sm:$0xff]  ;;  %v2500_v25 = vld [vmem:[%s6177_s8] sm:$0xff]  ;;  %s3973_s23 = sshll.u32 %s4037_s16, 4  ;;  %s3974_s23 = int_to_ptr.vmem [resolvable:$false] %s3973_s23 }
  0x21   : > { %v2502_v26 = vld [vmem:[%s6177_s8 + $0x10] sm:$0xff]  ;;  %v2504_v27 = vld [vmem:[%s6177_s8 + $0x20] sm:$0xff]  ;;  %v444_v43 = vld [vmem:[%s4271_s27 + $0x8] sm:$0xff] }
  0x22   : > { %v2506_v28 = vld [vmem:[%s6177_s8 + $0x30] sm:$0xff]  ;;  %v2976_v30 = vld [vmem:[%s6179_s10] sm:$0xff]  ;;  %v514_v50 = vrot.slane %v444_v43, %v4273_v34  ;;  %v682_v51 = vrot.slane %v444_v43, %v4278_v36  ;;  %v914_v53 = vrot.slane %v444_v43, %v4280_v37  ;;  %v510_v58 = vrot.slane %v444_v43, %v4286_v40 }
  0x23   : > { %3938 = vset.pattern.permute.xlu0 %v4035_v5  ;;  %v1335_v31 = vld [vmem:[%s6171_s2 + $0x20] sm:$0xff]  ;;  %v2978_v33 = vld [vmem:[%s6179_s10 + $0x10] sm:$0xff]  ;;  %v678_v59 = vrot.slane %v444_v43, %v4288_v41  ;;  %v910_v60 = vrot.slane %v444_v43, %v4290_v42  ;;  %v1146_v63 = vrot.slane %v444_v43, %v4299_v47 }
  0x24   : > { %640 = vperm.xlu1 %3930, %v448_v3   ;;  %868 = vperm.xlu0 %3938, %v447_v1   ;;  %v1337_v35 = vld [vmem:[%s6171_s2 + $0x30] sm:$0xff]  ;;  %v2980_v38 = vld [vmem:[%s6179_s10 + $0x20] sm:$0xff] }
  0x25   : > { %v443_v39 = vld [vmem:[%s4271_s27] sm:$0xff]  ;;  %v2982_v52 = vld [vmem:[%s6179_s10 + $0x30] sm:$0xff] }
  0x26   : > { %v506_v44 = vrot.slane %v443_v39, %v4273_v34  ;;  %v674_v48 = vrot.slane %v443_v39, %v4278_v36  ;;  %v906_v49 = vrot.slane %v443_v39, %v4280_v37  ;;  %v502_v54 = vrot.slane %v443_v39, %v4286_v40 }
  0x27   : > { %v670_v55 = vrot.slane %v443_v39, %v4288_v41  ;;  %v902_v56 = vrot.slane %v443_v39, %v4290_v42  ;;  %v1138_v62 = vrot.slane %v443_v39, %v4299_v47 }
  0x28   : > { %3931 = vset.pattern.permute.xlu1 %v4035_v5  ;;  %880 = vperm.xlu0 %3938, %v450_v6   ;;  %v4313_v57 = vrot.slane %v506_v44, %v4286_v40 }
  0x29   : > { %872 = vperm.xlu1 %3931, %v448_v3  }
  0x2c   : > { %884 = vperm.xlu0 %3938, %v451_v0  }
  0x2d   : > { %3932 = vset.pattern.permute.xlu1 %v6184_v4 }
  0x2e   : > { %467 = vperm.xlu1 %3932, %v449_v7  }
  0x30   : > { %3942 = vset.pattern.permute.xlu0 %v4036_v8 }
  0x31   : > { %1100 = vperm.xlu0 %3942, %v447_v1  }
  0x32   : > { %3933 = vset.pattern.permute.xlu1 %v4033_v2 }
  0x33   : > { %644 = vperm.xlu1 %3933, %v449_v7  }
  0x35   : > { %1112 = vperm.xlu0 %3942, %v450_v6  }
  0x37   : > { %648 = vperm.xlu1 %3933, %v450_v6  }
  0x39   : > { %1116 = vperm.xlu0 %3942, %v451_v0  }
  0x3b   : > { %3934 = vset.pattern.permute.xlu1 %v4036_v8 }
  0x3c   : > { %1104 = vperm.xlu1 %3934, %v448_v3  }
  0x3d   : > { %1124 = vperm.xlu0 %3942, %v453_v9  }
  0x40   : > { %3935 = vset.pattern.permute.xlu1 %v4035_v5 }
  0x41   : > { %876 = vperm.xlu1 %3935, %v449_v7   ;;  %3949 = vset.pattern.permute.xlu0 %v6184_v4 }
  0x42   : > { %457 = vperm.xlu0 %3949, %v447_v1   ;;  %v1142_v1 = vrot.slane %v444_v43, %v4297_v46 }
  0x45   : > { %3936 = vset.pattern.permute.xlu1 %v6184_v4 }
  0x46   : > { %477 = vperm.xlu1 %3936, %v451_v0   ;;  %462 = vperm.xlu0 %3949, %v448_v3   ;;  %v1134_v0 = vrot.slane %v443_v39, %v4297_v46  ;;  %v4327_v3 = vrot.slane %v674_v48, %v4288_v41 }
  0x48   : > { %6264 = vst [vmem:[#allocation7_spill] sm:$0xff] %v4327_v3 }
  0x4a   : > { %482 = vperm.xlu1 %3936, %v452_v10   ;;  %472 = vperm.xlu0 %3949, %v450_v6   ;;  %v4333_v6 = vrot.slane %v514_v50, %v4286_v40 }
  0x4e   : > { %3939 = vset.pattern.permute.xlu1 %v4033_v2  ;;  %492 = vperm.xlu0 %3949, %v454_v11  }
  0x4f   : > { %656 = vperm.xlu1 %3939, %v452_v10  }
  0x52   : > { %1356 = vperm.xlu0 %3949, %v1334_v12   ;;  %v4351_v12 = vrot.slane %v902_v56, %v4290_v42 }
  0x53   : > { %3940 = vset.pattern.permute.xlu1 %v4036_v8 }
  0x54   : > { %1108 = vperm.xlu1 %3940, %v449_v7   ;;  %v4336_v7 = vrot.slane %v682_v51, %v4288_v41 }
  0x56   : > { %1366 = vperm.xlu0 %3949, %v1336_v13   ;;  %6265 = vst [vmem:[#allocation8_spill] sm:$0xff] %v4336_v7  ;;  %v446_v13 = vld [vmem:[%s4271_s27 + $0x18] sm:$0xff] }
  0x57   : > { %v930_v29 = vrot.slane %v446_v13, %v4280_v37  ;;  %v1158_v39 = vrot.slane %v446_v13, %v4297_v46 }
  0x58   : > { %3941 = vset.pattern.permute.xlu1 %v6184_v4 }
  0x59   : > { %1341 = vperm.xlu1 %3941, %v1331_v14   ;;  %v4355_v14 = vrot.slane %v510_v58, %v4286_v40  ;;  %v1554_v58 = vld [vmem:[%s6173_s4 + $0x38] sm:$0xff] }
  0x5a   : > { %1557 = vperm.xlu0 %3949, %v1547_v15   ;;  %v4358_v15 = vrot.slane %v678_v59, %v4288_v41 }
  0x5c   : > { %6267 = vst [vmem:[#allocation10_spill] sm:$0xff] %v4358_v15 }
  0x5d   : > { %1346 = vperm.xlu1 %3941, %v1332_v16   ;;  %v4361_v16 = vrot.slane %v910_v60, %v4290_v42 }
  0x5e   : > { %1567 = vperm.xlu0 %3949, %v1549_v17  }
  0x5f   : > { %6268 = vst [vmem:[#allocation11_spill] sm:$0xff] %v4361_v16 }
  0x61   : > { %3943 = vset.pattern.permute.xlu1 %v4035_v5 }
  0x62   : > { %888 = vperm.xlu1 %3943, %v452_v10   ;;  %1577 = vperm.xlu0 %3949, %v1551_v18   ;;  %v1550_v18 = vld [vmem:[%s6173_s4 + $0x18] sm:$0xff] }
  0x66   : > { %3944 = vset.pattern.permute.xlu1 %v6184_v4  ;;  %1587 = vperm.xlu0 %3949, %v1553_v19   ;;  %v4368_v19 = vrot.slane %v1138_v62, %v4297_v46  ;;  %v4449_v62 = vrot.slane %v1158_v39, %v4297_v46 }
  0x67   : > { %487 = vperm.xlu1 %3944, %v453_v9  }
  0x68   : > { %6285 = vst [vmem:[#allocation28_spill] sm:$0xff] %v4449_v62 }
  0x6a   : > { %2034 = vperm.xlu0 %3949, %v2024_v20   ;;  %v4371_v20 = vrot.slane %v1146_v63, %v4297_v46 }
  0x6b   : > { %3945 = vset.pattern.permute.xlu1 %v4033_v2  ;;  %v445_v2 = vld [vmem:[%s4271_s27 + $0x10] sm:$0xff]  ;;  %s6107_s27 = scalar_lea.vmem [#allocation2], %s3774_s21  ;;  %s3975_s21 = scalar_lea.vmem %s3974_s23, 2048 }
  0x6c   : > { %660 = vperm.xlu1 %3945, %v453_v9   ;;  %v690_v17 = vrot.slane %v445_v2, %v4278_v36  ;;  %v918_v32 = vrot.slane %v445_v2, %v4290_v42  ;;  %s3708_s17 = sshll.u32 %s6107_s27, 4  ;;  %s6117_s17 = int_to_ptr.vmem [resolvable:$true] %s3708_s17 }
  0x6d   : > { %s3969_s1 = scalar_lea.vmem %s6117_s17, 1024  ;;  %p3976_p0 = scmp.lt.s32.totalorder %s6117_s17, %s3974_s23 }
  0x6e   : > { %2044 = vperm.xlu0 %3949, %v2026_v21   ;;  %v4374_v21 = vrot.slane %v1134_v0, %v4297_v46  ;;  %p3970_p11 = scmp.ne.s32.totalorder %s6117_s17, %s3969_s1  ;;  %p3977_p1 = scmp.lt.s32.totalorder %s3975_s21, %s3969_s1 }
  0x70   : > { %664 = vperm.xlu1 %3945, %v454_v11   ;;  %6269 = vst [vmem:[#allocation12_spill] sm:$0xff] %v4374_v21  ;;  %p3971_p12 = pnand %p3970_p11, %p4149_p5  ;;  %p3978_p2 = por %p3977_p1, %p3976_p0 }
  0x72   : > { %2054 = vperm.xlu0 %3949, %v2028_v22   ;;  %v4377_v22 = vrot.slane %v1142_v1, %v4297_v46  ;;  %p3972_p13 = pneg %p3971_p12 }
  0x74   : > { %3946 = vset.pattern.permute.xlu1 %v4036_v8  ;;  %6270 = vst [vmem:[#allocation13_spill] sm:$0xff] %v4377_v22  ;;  %p3979_p3 = pnand %p3978_p2, %p3972_p13 }
  0x75   : > { %1120 = vperm.xlu1 %3946, %v452_v10   ;;  %v4345_v10 = vrot.slane %v502_v54, %v4286_v40 }
  0x76   : > { %2064 = vperm.xlu0 %3949, %v2030_v23   ;;  %v522_v23 = vrot.slane %v445_v2, %v4273_v34 }
  0x79   : > { %3947 = vset.pattern.permute.xlu1 %v6184_v4 }
  0x7a   : > { %1351 = vperm.xlu1 %3947, %v1333_v24   ;;  %2510 = vperm.xlu0 %3949, %v2500_v25   ;;  %v698_v24 = vrot.slane %v446_v13, %v4278_v36  ;;  %v686_v25 = vrot.slane %v445_v2, %v4288_v41  ;;  %v1552_v36 = vld [vmem:[%s6173_s4 + $0x28] sm:$0xff] }
  0x7c   : > { %v4404_v48 = vrot.slane %v698_v24, %v4288_v41 }
  0x7e   : > { %3948 = vset.pattern.permute.xlu1 %v4035_v5  ;;  %2520 = vperm.xlu0 %3949, %v2502_v26   ;;  %v4330_v5 = vrot.slane %v906_v49, %v4290_v42  ;;  %v694_v26 = vrot.slane %v446_v13, %v4288_v41  ;;  %6273 = vst [vmem:[#allocation16_spill] sm:$0xff] %v4404_v48 }
  0x7f   : > { %892 = vperm.xlu1 %3948, %v453_v9   ;;  %v4342_v9 = vrot.slane %v914_v53, %v4290_v42  ;;  %v4407_v49 = vrot.slane %v686_v25, %v4288_v41 }
  0x80   : > { %v4410_v50 = vrot.slane %v694_v26, %v4288_v41  ;;  %v2025_v26 = vld [vmem:[%s6175_s6 + $0x8] sm:$0xff] }
  0x81   : > { %6274 = vst [vmem:[#allocation17_spill] sm:$0xff] %v4407_v49 }
  0x82   : > { %2530 = vperm.xlu0 %3949, %v2504_v27   ;;  %v922_v27 = vrot.slane %v445_v2, %v4280_v37  ;;  %v1150_v37 = vrot.slane %v445_v2, %v4297_v46  ;;  %6275 = vst [vmem:[#allocation18_spill] sm:$0xff] %v4410_v50 }
  0x83   : > { %896 = vperm.xlu1 %3948, %v454_v11  }
  0x86   : > { %2540 = vperm.xlu0 %3949, %v2506_v28   ;;  %v530_v28 = vrot.slane %v446_v13, %v4273_v34  ;;  %v1162_v34 = vrot.slane %v446_v13, %v4299_v47 }
  0x87   : > { %3950 = vset.pattern.permute.xlu1 %v4036_v8  ;;  %v3446_v8 = vld [vmem:[%s6181_s12] sm:$0xff] }
  0x88   : > { %1128 = vperm.xlu1 %3950, %v454_v11   ;;  %v4348_v11 = vrot.slane %v670_v55, %v4288_v41  ;;  %v4416_v51 = vrot.slane %v530_v28, %v4286_v40  ;;  %v4428_v55 = vrot.slane %v918_v32, %v4290_v42  ;;  %v4443_v60 = vrot.slane %v1162_v34, %v4297_v46 }
  0x8a   : > { %2986 = vperm.xlu0 %3949, %v2976_v30   ;;  %6266 = vst [vmem:[#allocation9_spill] sm:$0xff] %v4348_v11  ;;  %v518_v30 = vrot.slane %v445_v2, %v4286_v40  ;;  %6277 = vst [vmem:[#allocation20_spill] sm:$0xff] %v4416_v51 }
  0x8b   : > { %6280 = vst [vmem:[#allocation23_spill] sm:$0xff] %v4428_v55  ;;  %6283 = vst [vmem:[#allocation26_spill] sm:$0xff] %v4443_v60 }
  0x8c   : > { %3951 = vset.pattern.permute.xlu1 %v6184_v4  ;;  %v4422_v53 = vrot.slane %v518_v30, %v4286_v40 }
  0x8d   : > { %1361 = vperm.xlu1 %3951, %v1335_v31   ;;  %v1154_v31 = vrot.slane %v445_v2, %v4299_v47  ;;  %v4413_v47 = vrot.slane %v922_v27, %v4290_v42 }
  0x8e   : > { %2996 = vperm.xlu0 %3949, %v2978_v33   ;;  %v526_v33 = vrot.slane %v446_v13, %v4286_v40  ;;  %6279 = vst [vmem:[#allocation22_spill] sm:$0xff] %v4422_v53 }
  0x8f   : > { %6276 = vst [vmem:[#allocation19_spill] sm:$0xff] %v4413_v47  ;;  %v4425_v54 = vrot.slane %v1154_v31, %v4297_v46 }
  0x91   : > { %1371 = vperm.xlu1 %3951, %v1337_v35   ;;  %v926_v35 = vrot.slane %v446_v13, %v4290_v42 }
  0x92   : > { %3006 = vperm.xlu0 %3949, %v2980_v38   ;;  %v4395_v38 = vrot.slane %v690_v17, %v4288_v41  ;;  %v4431_v41 = vrot.slane %v526_v33, %v4286_v40 }
  0x93   : > { %v4434_v56 = vrot.slane %v926_v35, %v4290_v42 }
  0x94   : > { %6271 = vst [vmem:[#allocation14_spill] sm:$0xff] %v4395_v38  ;;  %6281 = vst [vmem:[#allocation24_spill] sm:$0xff] %v4431_v41 }
  0x95   : > { %1376 = vperm.xlu1 %3951, %v1338_v45   ;;  %v4401_v45 = vrot.slane %v522_v23, %v4286_v40  ;;  %6282 = vst [vmem:[#allocation25_spill] sm:$0xff] %v4434_v56 }
  0x96   : > { %3016 = vperm.xlu0 %3949, %v2982_v52   ;;  %v4419_v52 = vrot.slane %v930_v29, %v4290_v42 }
  0x97   : > { %6272 = vst [vmem:[#allocation15_spill] sm:$0xff] %v4401_v45 }
  0x98   : > { %6278 = vst [vmem:[#allocation21_spill] sm:$0xff] %v4419_v52 }
  0x99   : > { %1562 = vperm.xlu1 %3951, %v1548_v61   ;;  %v4446_v61 = vrot.slane %v1150_v37, %v4297_v46 }
  0x9a   : > { %3450 = vperm.xlu0 %3949, %v3446_v8  }
  0x9b   : > { %6284 = vst [vmem:[#allocation27_spill] sm:$0xff] %v4446_v61 }
  0x9d   : > { %1572 = vperm.xlu1 %3951, %v1550_v18  }
  0x9e   : > { %v653_v44 = vpop.permute.xlu0 %652 }
  0x9f   : > { %v637_v43 = vpop.permute.xlu1 %636  ;;  %v4461_v1 = vmul.f32 %v4327_v3, %v653_v44  ;;  %v4464_v8 = vmul.f32 %v4336_v7, %v653_v44  ;;  %v4467_v46 = vmul.f32 %v4348_v11, %v653_v44  ;;  %v4470_v13 = vmul.f32 %v4358_v15, %v653_v44 }
  0xa0   : > { %v4440_v59 = vmul.f32 %v4327_v3, %v637_v43  ;;  %v4452_v42 = vmul.f32 %v4336_v7, %v637_v43  ;;  %v4455_v63 = vmul.f32 %v4348_v11, %v637_v43  ;;  %v4458_v0 = vmul.f32 %v4358_v15, %v637_v43 }
  0xa1   : > { %1582 = vperm.xlu1 %3951, %v1552_v36   ;;  %6286 = vst [vmem:[#allocation29_spill] sm:$0xff] %v4461_v1  ;;  %6287 = vst [vmem:[#allocation30_spill] sm:$0xff] %v4464_v8  ;;  %v4473_v17 = vmul.f32 %v4395_v38, %v637_v43  ;;  %v4476_v18 = vmul.f32 %v4404_v48, %v637_v43  ;;  %v4479_v23 = vmul.f32 %v4407_v49, %v637_v43  ;;  %v2029_v8 = vld [vmem:[%s6175_s6 + $0x28] sm:$0xff] }
  0xa2   : > { %6288 = vst [vmem:[#allocation31_spill] sm:$0xff] %v4467_v46  ;;  %6289 = vst [vmem:[#allocation32_spill] sm:$0xff] %v4470_v13  ;;  %v4482_v24 = vmul.f32 %v4410_v50, %v637_v43  ;;  %v4485_v25 = vmul.f32 %v4395_v38, %v653_v44  ;;  %v4494_v28 = vmul.f32 %v4404_v48, %v653_v44 }
  0xa3   : > { %v641_v40 = vpop.permute.xlu1 %640  ;;  %v869_v2 = vpop.permute.xlu0 %868  ;;  %6290 = vst [vmem:[#allocation33_spill] sm:$0xff] %v4473_v17  ;;  %6291 = vst [vmem:[#allocation34_spill] sm:$0xff] %v4476_v18  ;;  %v4497_v29 = vmul.f32 %v4407_v49, %v653_v44  ;;  %v4500_v30 = vmul.f32 %v4410_v50, %v653_v44 }
  0xa4   : > { %6292 = vst [vmem:[#allocation35_spill] sm:$0xff] %v4479_v23  ;;  %6293 = vst [vmem:[#allocation36_spill] sm:$0xff] %v4482_v24  ;;  %v4491_v27 = vmul.f32 %v4327_v3, %v641_v40  ;;  %v4503_v31 = vmul.f32 %v4330_v5, %v869_v2  ;;  %v4506_v32 = vmul.f32 %v4336_v7, %v641_v40 }
  0xa5   : > { %1592 = vperm.xlu1 %3951, %v1554_v58   ;;  %6294 = vst [vmem:[#allocation37_spill] sm:$0xff] %v4485_v25  ;;  %6295 = vst [vmem:[#allocation38_spill] sm:$0xff] %v4494_v28  ;;  %v4509_v33 = vmul.f32 %v4348_v11, %v641_v40  ;;  %v4512_v35 = vmul.f32 %v4358_v15, %v641_v40  ;;  %v4515_v37 = vmul.f32 %v4342_v9, %v869_v2  ;;  %v2027_v28 = vld [vmem:[%s6175_s6 + $0x18] sm:$0xff] }
  0xa6   : > { %6296 = vst [vmem:[#allocation39_spill] sm:$0xff] %v4497_v29  ;;  %6297 = vst [vmem:[#allocation40_spill] sm:$0xff] %v4500_v30  ;;  %v4518_v39 = vmul.f32 %v4351_v12, %v869_v2  ;;  %v4521_v43 = vmul.f32 %v4361_v16, %v869_v2  ;;  %v4524_v44 = vmul.f32 %v4395_v38, %v641_v40 }
  0xa7   : > { %v881_v34 = vpop.permute.xlu0 %880  ;;  %v4527_v58 = vmul.f32 %v4413_v47, %v869_v2  ;;  %v4530_v4 = vmul.f32 %v4404_v48, %v641_v40  ;;  %v4533_v30 = vmul.f32 %v4419_v52, %v869_v2  ;;  %v4536_v29 = vmul.f32 %v4407_v49, %v641_v40 }
  0xa8   : > { %v873_v36 = vpop.permute.xlu1 %872  ;;  %6298 = vst [vmem:[#allocation41_spill] sm:$0xff] %v4524_v44  ;;  %v4548_v24 = vmul.f32 %v4410_v50, %v641_v40  ;;  %v4551_v23 = vmul.f32 %v4434_v56, %v869_v2  ;;  %v4569_v40 = vmul.f32 %v4351_v12, %v881_v34  ;;  %v4587_v46 = vmul.f32 %v4413_v47, %v881_v34 }
  0xa9   : > { %2039 = vperm.xlu1 %3951, %v2025_v26   ;;  %6299 = vst [vmem:[#allocation42_spill] sm:$0xff] %v4527_v58  ;;  %6300 = vst [vmem:[#allocation43_spill] sm:$0xff] %v4530_v4  ;;  %v4542_v25 = vmul.f32 %v4330_v5, %v873_v36  ;;  %v4545_v26 = vmul.f32 %v4428_v55, %v869_v2  ;;  %v4560_v4 = vmul.f32 %v4361_v16, %v873_v36 }
  0xaa   : > { %6301 = vst [vmem:[#allocation44_spill] sm:$0xff] %v4533_v30  ;;  %6302 = vst [vmem:[#allocation45_spill] sm:$0xff] %v4536_v29  ;;  %v4554_v30 = vmul.f32 %v4342_v9, %v873_v36  ;;  %v4557_v29 = vmul.f32 %v4351_v12, %v873_v36  ;;  %v4563_v58 = vmul.f32 %v4330_v5, %v881_v34 }
  0xab   : > { %6303 = vst [vmem:[#allocation46_spill] sm:$0xff] %v4545_v26  ;;  %6304 = vst [vmem:[#allocation47_spill] sm:$0xff] %v4548_v24  ;;  %v885_v18 = vpop.permute.xlu0 %884  ;;  %v4566_v26 = vmul.f32 %v4342_v9, %v881_v34  ;;  %v4572_v2 = vmul.f32 %v4361_v16, %v881_v34  ;;  %v4575_v24 = vmul.f32 %v4413_v47, %v873_v36 }
  0xac   : > { %6305 = vst [vmem:[#allocation48_spill] sm:$0xff] %v4551_v23  ;;  %6306 = vst [vmem:[#allocation49_spill] sm:$0xff] %v4554_v30  ;;  %v4578_v44 = vmul.f32 %v4419_v52, %v873_v36  ;;  %v4581_v17 = vmul.f32 %v4428_v55, %v873_v36  ;;  %v4584_v13 = vmul.f32 %v4434_v56, %v873_v36 }
  0xad   : > { %6307 = vst [vmem:[#allocation50_spill] sm:$0xff] %v4557_v29  ;;  %6308 = vst [vmem:[#allocation51_spill] sm:$0xff] %v4560_v4  ;;  %2049 = vperm.xlu1 %3951, %v2027_v28   ;;  %v468_v23 = vpop.permute.xlu1 %467  ;;  %v4596_v28 = vmul.f32 %v4419_v52, %v881_v34  ;;  %v4612_v1 = vmul.f32 %v4361_v16, %v885_v18 }
  0xae   : > { %6309 = vst [vmem:[#allocation52_spill] sm:$0xff] %v4563_v58  ;;  %6310 = vst [vmem:[#allocation53_spill] sm:$0xff] %v4566_v26  ;;  %v588_v36 = vmul.f32 %v4313_v57, %v468_v23  ;;  %v2031_v26 = vld [vmem:[%s6175_s6 + $0x38] sm:$0xff] }
  0xaf   : > { %6311 = vst [vmem:[#allocation54_spill] sm:$0xff] %v4569_v40  ;;  %6312 = vst [vmem:[#allocation55_spill] sm:$0xff] %v4572_v2  ;;  %v594_v2 = vmul.f32 %v4416_v51, %v468_v23  ;;  %v4621_v40 = vmul.f32 %v4431_v41, %v468_v23 }
  0xb0   : > { %6313 = vst [vmem:[#allocation56_spill] sm:$0xff] %v4575_v24  ;;  %6314 = vst [vmem:[#allocation57_spill] sm:$0xff] %v4578_v44  ;;  %v4593_v24 = vmul.f32 %v4330_v5, %v885_v18  ;;  %v4599_v44 = vmul.f32 %v4428_v55, %v881_v34 }
  0xb1   : > { %6315 = vst [vmem:[#allocation58_spill] sm:$0xff] %v4581_v17  ;;  %6316 = vst [vmem:[#allocation59_spill] sm:$0xff] %v4584_v13  ;;  %v4602_v17 = vmul.f32 %v4434_v56, %v881_v34  ;;  %v4609_v13 = vmul.f32 %v4351_v12, %v885_v18  ;;  %v592_v34 = vmul.f32 %v4401_v45, %v468_v23  ;;  %2059 = vperm.xlu1 %3951, %v2029_v8  }
  0xb2   : > { %6317 = vst [vmem:[#allocation60_spill] sm:$0xff] %v4587_v46  ;;  %6318 = vst [vmem:[#allocation61_spill] sm:$0xff] %v4593_v24  ;;  %v4606_v46 = vmul.f32 %v4342_v9, %v885_v18  ;;  %v590_v24 = vmul.f32 %v4333_v6, %v468_v23  ;;  %v4635_v8 = vmul.f32 %v4419_v52, %v885_v18 }
  0xb3   : > { %6319 = vst [vmem:[#allocation62_spill] sm:$0xff] %v4596_v28  ;;  %6320 = vst [vmem:[#allocation63_spill] sm:$0xff] %v4599_v44  ;;  %v587_v28 = vmul.f32 %v4345_v10, %v468_v23  ;;  %v589_v44 = vmul.f32 %v4355_v14, %v468_v23 }
  0xb4   : > { %6321 = vst [vmem:[#allocation64_spill] sm:$0xff] %v4602_v17  ;;  %6322 = vst [vmem:[#allocation65_spill] sm:$0xff] %v4606_v46  ;;  %v1101_v17 = vpop.permute.xlu0 %1100  ;;  %v591_v46 = vmul.f32 %v4422_v53, %v468_v23  ;;  %v4638_v53 = vmul.f32 %v4428_v55, %v885_v18  ;;  %v4641_v23 = vmul.f32 %v4434_v56, %v885_v18 }
  0xb5   : > { %6323 = vst [vmem:[#allocation66_spill] sm:$0xff] %v4609_v13  ;;  %6324 = vst [vmem:[#allocation67_spill] sm:$0xff] %v4612_v1  ;;  %v4624_v13 = vmul.f32 %v4413_v47, %v885_v18  ;;  %v4626_v1 = vpop.permute.xlu1 %644  ;;  %v4632_v45 = vmul.f32 %v4368_v19, %v1101_v17  ;;  %v4658_v18 = vmul.f32 %v4377_v22, %v1101_v17  ;;  %2069 = vperm.xlu1 %3951, %v2031_v26  }
  0xb6   : > { %6326 = vst [vmem:[#allocation69_spill] sm:$0xff] %v4635_v8  ;;  %6327 = vst [vmem:[#allocation70_spill] sm:$0xff] %v4638_v53  ;;  %v758_v41 = vmul.f32 %v4336_v7, %v4626_v1  ;;  %v755_v51 = vmul.f32 %v4348_v11, %v4626_v1  ;;  %v757_v58 = vmul.f32 %v4358_v15, %v4626_v1 }
  0xb7   : > { %6325 = vst [vmem:[#allocation68_spill] sm:$0xff] %v4624_v13  ;;  %6328 = vst [vmem:[#allocation71_spill] sm:$0xff] %v4641_v23  ;;  %v756_v13 = vmul.f32 %v4327_v3, %v4626_v1  ;;  %v4652_v8 = vmul.f32 %v4371_v20, %v1101_v17  ;;  %v4655_v53 = vmul.f32 %v4374_v21, %v1101_v17 }
  0xb8   : > { %6331 = vst [vmem:[#allocation74_spill] sm:$0xff] %v4658_v18  ;;  %v4661_v23 = vmul.f32 %v4425_v54, %v1101_v17  ;;  %v1113_v56 = vpop.permute.xlu0 %1112  ;;  %v4666_v29 = vmul.f32 %v4443_v60, %v1101_v17  ;;  %v4669_v30 = vmul.f32 %v4446_v61, %v1101_v17  ;;  %v2501_v18 = vld [vmem:[%s6177_s8 + $0x8] sm:$0xff]  ;;  %v4680_v26 = vadd.f32 %v758_v41, %v590_v24 }
  0xb9   : > { %6329 = vst [vmem:[#allocation72_spill] sm:$0xff] %v4652_v8  ;;  %6330 = vst [vmem:[#allocation73_spill] sm:$0xff] %v4655_v53  ;;  %v4663_v4 = vadd.f32 %v756_v13, %v588_v36  ;;  %v4672_v8 = vmul.f32 %v4449_v62, %v1101_v17  ;;  %v649_v53 = vpop.permute.xlu1 %648  ;;  %v4682_v13 = vadd.f32 %v755_v51, %v587_v28  ;;  %2515 = vperm.xlu1 %3951, %v2501_v18  }
  0xba   : > { %6332 = vst [vmem:[#allocation75_spill] sm:$0xff] %v4661_v23  ;;  %6333 = vst [vmem:[#allocation76_spill] sm:$0xff] %v4666_v29  ;;  %v4678_v23 = vmul.f32 %v4368_v19, %v1113_v56  ;;  %v4684_v36 = vadd.f32 %v757_v58, %v589_v44  ;;  %v4687_v29 = vmul.f32 %v4327_v3, %v649_v53 }
  0xbb   : > { %6334 = vst [vmem:[#allocation77_spill] sm:$0xff] %v4669_v30  ;;  %6335 = vst [vmem:[#allocation78_spill] sm:$0xff] %v4672_v8  ;;  %v4690_v17 = vmul.f32 %v4371_v20, %v1113_v56  ;;  %v4693_v8 = vmul.f32 %v4374_v21, %v1113_v56  ;;  %v4696_v30 = vmul.f32 %v4377_v22, %v1113_v56 }
  0xbc   : > { %6336 = vst [vmem:[#allocation79_spill] sm:$0xff] %v4678_v23  ;;  %v4699_v23 = vmul.f32 %v4336_v7, %v649_v53  ;;  %v4702_v51 = vmul.f32 %v4348_v11, %v649_v53  ;;  %v760_v41 = vmul.f32 %v4395_v38, %v4626_v1  ;;  %v762_v24 = vmul.f32 %v4404_v48, %v4626_v1  ;;  %v1117_v44 = vpop.permute.xlu0 %1116 }
  0xbd   : > { %6337 = vst [vmem:[#allocation80_spill] sm:$0xff] %v4690_v17  ;;  %6338 = vst [vmem:[#allocation81_spill] sm:$0xff] %v4693_v8  ;;  %v4709_v58 = vmul.f32 %v4358_v15, %v649_v53  ;;  %v4712_v28 = vmul.f32 %v4395_v38, %v649_v53  ;;  %v759_v11 = vmul.f32 %v4407_v49, %v4626_v1  ;;  %v2503_v8 = vld [vmem:[%s6177_s8 + $0x18] sm:$0xff] }
  0xbe   : > { %6339 = vst [vmem:[#allocation82_spill] sm:$0xff] %v4696_v30  ;;  %v4715_v30 = vmul.f32 %v4425_v54, %v1113_v56  ;;  %v4723_v7 = vmul.f32 %v4368_v19, %v1117_v44  ;;  %v4726_v18 = vmul.f32 %v4404_v48, %v649_v53  ;;  %v4729_v15 = vmul.f32 %v4443_v60, %v1113_v56 }
  0xbf   : > { %6340 = vst [vmem:[#allocation83_spill] sm:$0xff] %v4709_v58  ;;  %6341 = vst [vmem:[#allocation84_spill] sm:$0xff] %v4712_v28  ;;  %v4732_v38 = vmul.f32 %v4407_v49, %v649_v53  ;;  %v4735_v28 = vmul.f32 %v4371_v20, %v1117_v44  ;;  %v4737_v17 = vadd.f32 %v760_v41, %v592_v34  ;;  %2525 = vperm.xlu1 %3951, %v2503_v8   ;;  %v2505_v41 = vld [vmem:[%s6177_s8 + $0x28] sm:$0xff] }
  0xc0   : > { %6342 = vst [vmem:[#allocation85_spill] sm:$0xff] %v4715_v30  ;;  %6343 = vst [vmem:[#allocation86_spill] sm:$0xff] %v4723_v7  ;;  %v1105_v30 = vpop.permute.xlu1 %1104  ;;  %v4739_v3 = vadd.f32 %v762_v24, %v594_v2  ;;  %v4741_v58 = vadd.f32 %v759_v11, %v591_v46  ;;  %v4747_v48 = vmul.f32 %v4374_v21, %v1117_v44 }
  0xc1   : > { %6344 = vst [vmem:[#allocation87_spill] sm:$0xff] %v4726_v18  ;;  %6345 = vst [vmem:[#allocation88_spill] sm:$0xff] %v4729_v15  ;;  %v4744_v7 = vmul.f32 %v4368_v19, %v1105_v30  ;;  %v4750_v15 = vmul.f32 %v4377_v22, %v1117_v44  ;;  %v4753_v49 = vmul.f32 %v4446_v61, %v1113_v56 }
  0xc2   : > { %6346 = vst [vmem:[#allocation89_spill] sm:$0xff] %v4732_v38  ;;  %6347 = vst [vmem:[#allocation90_spill] sm:$0xff] %v4737_v17  ;;  %v4755_v38 = vpop.permute.xlu0 %1124  ;;  %v4758_v2 = vmul.f32 %v4371_v20, %v1105_v30  ;;  %v4761_v11 = vmul.f32 %v4374_v21, %v1105_v30  ;;  %v4764_v46 = vmul.f32 %v4377_v22, %v1105_v30 }
  0xc3   : > { %6348 = vst [vmem:[#allocation91_spill] sm:$0xff] %v4739_v3  ;;  %6349 = vst [vmem:[#allocation92_spill] sm:$0xff] %v4741_v58  ;;  %v4767_v34 = vmul.f32 %v4425_v54, %v1105_v30  ;;  %v4774_v8 = vmul.f32 %v4368_v19, %v4755_v38  ;;  %v4777_v24 = vmul.f32 %v4443_v60, %v1105_v30  ;;  %2535 = vperm.xlu1 %3951, %v2505_v41  }
  0xc4   : > { %6350 = vst [vmem:[#allocation93_spill] sm:$0xff] %v4753_v49  ;;  %6351 = vst [vmem:[#allocation94_spill] sm:$0xff] %v4755_v38  ;;  %v4780_v49 = vmul.f32 %v4446_v61, %v1105_v30  ;;  %v4783_v58 = vmul.f32 %v4449_v62, %v1105_v30  ;;  %v4787_v3 = vmul.f32 %v4371_v20, %v4755_v38 }
  0xc5   : > { %6352 = vst [vmem:[#allocation95_spill] sm:$0xff] %v4774_v8  ;;  %6353 = vst [vmem:[#allocation96_spill] sm:$0xff] %v4777_v24  ;;  %v4791_v18 = vmul.f32 %v4374_v21, %v4755_v38  ;;  %v4795_v8 = vmul.f32 %v4377_v22, %v4755_v38  ;;  %v761_v17 = vmul.f32 %v4410_v50, %v4626_v1  ;;  %v4799_v24 = vpop.permute.xlu1 %876 }
  0xc6   : > { %6354 = vst [vmem:[#allocation97_spill] sm:$0xff] %v4780_v49  ;;  %6355 = vst [vmem:[#allocation98_spill] sm:$0xff] %v4783_v58  ;;  %v4802_v30 = vmul.f32 %v4410_v50, %v649_v53  ;;  %v4805_v58 = vmul.f32 %v4449_v62, %v1113_v56  ;;  %v990_v1 = vmul.f32 %v4342_v9, %v4799_v24  ;;  %v4823_v56 = vpop.permute.xlu0 %457  ;;  %v2507_v50 = vld [vmem:[%s6177_s8 + $0x38] sm:$0xff] }
  0xc7   : > { %6356 = vst [vmem:[#allocation99_spill] sm:$0xff] %v4787_v3  ;;  %6357 = vst [vmem:[#allocation100_spill] sm:$0xff] %v4791_v18  ;;  %v4808_v3 = vmul.f32 %v4425_v54, %v1117_v44  ;;  %v4811_v18 = vmul.f32 %v4443_v60, %v1117_v44  ;;  %v4818_v49 = vmul.f32 %v4446_v61, %v1117_v44  ;;  %2545 = vperm.xlu1 %3951, %v2507_v50   ;;  %v6383_v60 = vld [vmem:[#allocation54_spill] sm:$0xff] }
  0xc8   : > { %6358 = vst [vmem:[#allocation101_spill] sm:$0xff] %v4795_v8  ;;  %6359 = vst [vmem:[#allocation102_spill] sm:$0xff] %v4799_v24  ;;  %v988_v8 = vmul.f32 %v4330_v5, %v4799_v24  ;;  %v4821_v53 = vmul.f32 %v4449_v62, %v1117_v44  ;;  %v987_v41 = vmul.f32 %v4351_v12, %v4799_v24 }
  0xc9   : > { %6360 = vst [vmem:[#allocation103_spill] sm:$0xff] %v4802_v30  ;;  %6361 = vst [vmem:[#allocation104_spill] sm:$0xff] %v4805_v58  ;;  %v572_v44 = vmul.f32 %v4313_v57, %v4823_v56  ;;  %v571_v58 = vmul.f32 %v4345_v10, %v4823_v56  ;;  %v573_v62 = vmul.f32 %v4355_v14, %v4823_v56 }
  0xca   : > { %6362 = vst [vmem:[#allocation105_spill] sm:$0xff] %v4808_v3  ;;  %6363 = vst [vmem:[#allocation106_spill] sm:$0xff] %v4811_v18  ;;  %v989_v18 = vmul.f32 %v4361_v16, %v4799_v24  ;;  %v4833_v3 = vadd.f32 %v761_v17, %v4621_v40  ;;  %v4848_v30 = vadd.f32 %v988_v8, %v4663_v4  ;;  %v4870_v61 = vpop.permute.xlu0 %462 }
  0xcb   : > { %6364 = vst [vmem:[#allocation107_spill] sm:$0xff] %v4818_v49  ;;  %6365 = vst [vmem:[#allocation108_spill] sm:$0xff] %v4821_v53  ;;  %v4837_v49 = vmul.f32 %v4425_v54, %v4755_v38  ;;  %v574_v53 = vmul.f32 %v4333_v6, %v4823_v56  ;;  %v4852_v40 = vmul.f32 %v4413_v47, %v4799_v24 }
  0xcc   : > { %6366 = vst [vmem:[#allocation109_spill] sm:$0xff] %v4833_v3  ;;  %v4856_v17 = vmul.f32 %v4419_v52, %v4799_v24  ;;  %v4860_v38 = vmul.f32 %v4428_v55, %v4799_v24  ;;  %v804_v3 = vadd.f32 %v4440_v59, %v572_v44  ;;  %v803_v8 = vadd.f32 %v4455_v63, %v571_v58  ;;  %v2977_v52 = vld [vmem:[%s6179_s10 + $0x8] sm:$0xff]  ;;  %v2979_v44 = vld [vmem:[%s6179_s10 + $0x18] sm:$0xff] }
  0xcd   : > { %6367 = vst [vmem:[#allocation110_spill] sm:$0xff] %v4837_v49  ;;  %v4862_v49 = vpop.permute.xlu1 %477  ;;  %v806_v4 = vadd.f32 %v4452_v42, %v574_v53  ;;  %v4868_v47 = vadd.f32 %v990_v1, %v4680_v26  ;;  %v805_v55 = vadd.f32 %v4458_v0, %v573_v62  ;;  %v4877_v50 = vadd.f32 %v987_v41, %v4682_v13  ;;  %v6373_v24 = vld [vmem:[#allocation72_spill] sm:$0xff] }
  0xce   : > { %6368 = vst [vmem:[#allocation111_spill] sm:$0xff] %v4856_v17  ;;  %6369 = vst [vmem:[#allocation112_spill] sm:$0xff] %v4860_v38  ;;  %v4880_v59 = vadd.f32 %v989_v18, %v4684_v36  ;;  %v604_v42 = vmul.f32 %v4313_v57, %v4862_v49  ;;  %v580_v63 = vmul.f32 %v4313_v57, %v4870_v61  ;;  %2991 = vperm.xlu1 %3951, %v2977_v52   ;;  %v4909_v41 = vpop.permute.xlu0 %472 }
  0xcf   : > { %6370 = vst [vmem:[#allocation113_spill] sm:$0xff] %v4862_v49  ;;  %v1036_v26 = vadd.f32 %v4503_v31, %v804_v3  ;;  %v582_v58 = vmul.f32 %v4333_v6, %v4870_v61  ;;  %v606_v62 = vmul.f32 %v4333_v6, %v4862_v49  ;;  %v1038_v0 = vadd.f32 %v4515_v37, %v806_v4 }
  0xd0   : > { %v579_v13 = vmul.f32 %v4345_v10, %v4870_v61  ;;  %v581_v36 = vmul.f32 %v4355_v14, %v4870_v61  ;;  %v4898_v18 = vmul.f32 %v4345_v10, %v4862_v49  ;;  %v812_v31 = vadd.f32 %v4491_v27, %v580_v63 }
  0xd1   : > { %v4900_v3 = vpop.permute.xlu1 %482  ;;  %v814_v1 = vadd.f32 %v4506_v32, %v582_v58  ;;  %v1035_v53 = vadd.f32 %v4518_v39, %v803_v8  ;;  %v4907_v37 = vmul.f32 %v4355_v14, %v4862_v49  ;;  %v4915_v52 = vadd.f32 %v4632_v45, %v1036_v26  ;;  %v6372_v8 = vld [vmem:[#allocation49_spill] sm:$0xff]  ;;  %v6374_v45 = vld [vmem:[#allocation50_spill] sm:$0xff] }
  0xd2   : > { %6371 = vst [vmem:[#allocation114_spill] sm:$0xff] %v4900_v3  ;;  %v811_v4 = vadd.f32 %v4509_v33, %v579_v13  ;;  %v813_v27 = vadd.f32 %v4512_v35, %v581_v36  ;;  %v1037_v32 = vadd.f32 %v4521_v43, %v805_v55  ;;  %v1044_v39 = vadd.f32 %v4542_v25, %v812_v31  ;;  %v6375_v25 = vld [vmem:[#allocation73_spill] sm:$0xff]  ;;  %v6376_v43 = vld [vmem:[#allocation51_spill] sm:$0xff] }
  0xd3   : > { %v1046_v63 = vadd.f32 %v6372_v8, %v814_v1  ;;  %v596_v58 = vmul.f32 %v4313_v57, %v4909_v41  ;;  %v598_v49 = vmul.f32 %v4333_v6, %v4909_v41  ;;  %v4927_v38 = vadd.f32 %v6373_v24, %v1038_v0  ;;  %3001 = vperm.xlu1 %3951, %v2979_v44   ;;  %v4938_v1 = vpop.permute.xlu0 %492  ;;  %v2981_v0 = vld [vmem:[%s6179_s10 + $0x28] sm:$0xff]  ;;  %v6379_v44 = vld [vmem:[#allocation74_spill] sm:$0xff] }
  0xd4   : > { %v1043_v26 = vadd.f32 %v6374_v45, %v811_v4  ;;  %v595_v33 = vmul.f32 %v4345_v10, %v4909_v41  ;;  %v597_v55 = vmul.f32 %v4355_v14, %v4909_v41  ;;  %v1267_v35 = vadd.f32 %v6375_v25, %v1035_v53  ;;  %6377 = vst [vmem:[#allocation49_spill] sm:$0xff] %v4938_v1  ;;  %v6382_v25 = vld [vmem:[#allocation53_spill] sm:$0xff] }
  0xd5   : > { %v1045_v13 = vadd.f32 %v6376_v43, %v813_v27  ;;  %v828_v36 = vadd.f32 %v4687_v29, %v596_v58  ;;  %v830_v31 = vadd.f32 %v4699_v23, %v598_v49  ;;  %v4940_v24 = vpop.permute.xlu1 %656  ;;  %v4946_v4 = vadd.f32 %v4744_v7, %v1044_v39  ;;  %v6380_v27 = vld [vmem:[#allocation83_spill] sm:$0xff]  ;;  %v6381_v23 = vld [vmem:[#allocation52_spill] sm:$0xff] }
  0xd6   : > { %6378 = vst [vmem:[#allocation72_spill] sm:$0xff] %v4940_v24  ;;  %v1269_v8 = vadd.f32 %v6379_v44, %v1037_v32  ;;  %v827_v53 = vadd.f32 %v4702_v51, %v595_v33  ;;  %v829_v45 = vadd.f32 %v6380_v27, %v597_v55  ;;  %v4952_v29 = vadd.f32 %v4758_v2, %v1046_v63  ;;  %v6384_v7 = vld [vmem:[#allocation55_spill] sm:$0xff]  ;;  %v6386_v51 = vld [vmem:[#allocation29_spill] sm:$0xff] }
  0xd7   : > { %v4955_v49 = vadd.f32 %v4761_v11, %v1043_v26  ;;  %v1060_v58 = vadd.f32 %v6381_v23, %v828_v36  ;;  %v1062_v43 = vadd.f32 %v6382_v25, %v830_v31  ;;  %v6385_v32 = vld [vmem:[#allocation7_spill] sm:$0xff]  ;;  %v836_v33 = vadd.f32 %v6386_v51, %v604_v42  ;;  %3011 = vperm.xlu1 %3951, %v2981_v0   ;;  %v6388_v11 = vld [vmem:[#allocation80_spill] sm:$0xff]  ;;  %v4969_v31 = vpop.permute.xlu0 %1356  ;;  %v6392_v23 = vld [vmem:[#allocation82_spill] sm:$0xff] }
  0xd8   : > { %v1059_v17 = vadd.f32 %v6383_v60, %v827_v53  ;;  %v1061_v39 = vadd.f32 %v6384_v7, %v829_v45  ;;  %v780_v44 = vmul.f32 %v6385_v32, %v4940_v24  ;;  %v1277_v2 = vadd.f32 %v4764_v46, %v1045_v13  ;;  %v6387_v63 = vld [vmem:[#allocation79_spill] sm:$0xff]  ;;  %v6389_v36 = vld [vmem:[#allocation8_spill] sm:$0xff]  ;;  %6390 = vst [vmem:[#allocation50_spill] sm:$0xff] %v4969_v31  ;;  %v2983_v60 = vld [vmem:[%s6179_s10 + $0x38] sm:$0xff] }
  0xd9   : > { %v1292_v55 = vadd.f32 %v6387_v63, %v1060_v58  ;;  %v1294_v26 = vadd.f32 %v6388_v11, %v1062_v43  ;;  %v782_v27 = vmul.f32 %v6389_v36, %v4940_v24  ;;  %v6391_v53 = vld [vmem:[#allocation81_spill] sm:$0xff]  ;;  %v612_v46 = vmul.f32 %v4313_v57, %v4900_v3  ;;  %v4979_v58 = vpop.permute.xlu1 %1108  ;;  %v6394_v51 = vld [vmem:[#allocation30_spill] sm:$0xff] }
  0xda   : > { %v1291_v45 = vadd.f32 %v6391_v53, %v1059_v17  ;;  %v1293_v42 = vadd.f32 %v6392_v23, %v1061_v39  ;;  %v6393_v13 = vld [vmem:[#allocation61_spill] sm:$0xff]  ;;  %v614_v7 = vmul.f32 %v4333_v6, %v4900_v3  ;;  %v838_v17 = vadd.f32 %v6394_v51, %v606_v62  ;;  %v3447_v23 = vld [vmem:[%s6181_s12 + $0x8] sm:$0xff] }
  0xdb   : > { %v1068_v0 = vadd.f32 %v6393_v13, %v836_v33  ;;  %v4982_v25 = vadd.f32 %v4969_v31, %v1292_v55  ;;  %v4985_v43 = vadd.f32 %v4969_v31, %v1294_v26  ;;  %v1220_v39 = vmul.f32 %v4368_v19, %v4979_v58  ;;  %3021 = vperm.xlu1 %3951, %v2983_v60   ;;  %v6398_v60 = vld [vmem:[#allocation9_spill] sm:$0xff] }
  0xdc   : > { %v1222_v63 = vmul.f32 %v4371_v20, %v4979_v58  ;;  %v1219_v33 = vmul.f32 %v4374_v21, %v4979_v58  ;;  %v4996_v11 = vadd.f32 %v780_v44, %v612_v46  ;;  %v4999_v55 = vadd.f32 %v4969_v31, %v1291_v45  ;;  %v6399_v44 = vld [vmem:[#allocation31_spill] sm:$0xff] }
  0xdd   : > { %v1221_v26 = vmul.f32 %v4377_v22, %v4979_v58  ;;  %v5003_v53 = vadd.f32 %v782_v27, %v614_v7  ;;  %v611_v62 = vmul.f32 %v4345_v10, %v4900_v3  ;;  %v5011_v13 = vadd.f32 %v1220_v39, %v4848_v30  ;;  %v6395_v7 = vld [vmem:[#allocation86_spill] sm:$0xff]  ;;  %v6397_v22 = vld [vmem:[#allocation65_spill] sm:$0xff]  ;;  %v5028_v30 = vpop.permute.xlu1 %1341 }
  0xde   : > { %v5016_v45 = vadd.f32 %v4969_v31, %v1293_v42  ;;  %v5019_v27 = vadd.f32 %v1222_v63, %v4868_v47  ;;  %v5022_v46 = vadd.f32 %v1219_v33, %v4877_v50  ;;  %v5025_v51 = vadd.f32 %v6395_v7, %v1068_v0  ;;  %v6400_v63 = vld [vmem:[#allocation10_spill] sm:$0xff] }
  0xdf   : > { %v1070_v21 = vadd.f32 %v6397_v22, %v838_v17  ;;  %v5031_v39 = vadd.f32 %v1221_v26, %v4880_v59  ;;  %v779_v42 = vmul.f32 %v6398_v60, %v4940_v24  ;;  %v835_v47 = vadd.f32 %v6399_v44, %v4898_v18  ;;  %3455 = vperm.xlu1 %3951, %v3447_v23   ;;  %v6402_v26 = vld [vmem:[#allocation66_spill] sm:$0xff]  ;;  %v6403_v23 = vld [vmem:[#allocation32_spill] sm:$0xff] }
  0xe0   : > { %6396 = vst [vmem:[#allocation73_spill] sm:$0xff] %v5025_v51  ;;  %v781_v50 = vmul.f32 %v6400_v63, %v4940_v24  ;;  %v1380_v0 = vadd.f32 %v5028_v30, %v4915_v52  ;;  %v1382_v22 = vadd.f32 %v5028_v30, %v4927_v38  ;;  %v1379_v17 = vadd.f32 %v5028_v30, %v1267_v35 }
  0xe1   : > { %v1381_v59 = vadd.f32 %v5028_v30, %v1269_v8  ;;  %v5046_v33 = vadd.f32 %v4735_v28, %v1070_v21  ;;  %v1067_v7 = vadd.f32 %v6402_v26, %v835_v47  ;;  %v613_v18 = vmul.f32 %v4355_v14, %v4900_v3  ;;  %v5053_v38 = vpop.permute.xlu1 %1346  ;;  %v6405_v28 = vld [vmem:[#allocation67_spill] sm:$0xff] }
  0xe2   : > { %v837_v44 = vadd.f32 %v6403_v23, %v4907_v37  ;;  %v1452_v24 = vmax.f32 %v1380_v0, 0.0  ;;  %v1454_v52 = vmax.f32 %v1382_v22, 0.0  ;;  %v1451_v51 = vmax.f32 %v1379_v17, 0.0 }
  0xe3   : > { %6401 = vst [vmem:[#allocation51_spill] sm:$0xff] %v5046_v33  ;;  %v843_v31 = vadd.f32 %v779_v42, %v611_v62  ;;  %v1453_v35 = vmax.f32 %v1381_v59, 0.0  ;;  %v5056_v8 = vadd.f32 %v4747_v48, %v1067_v7  ;;  %v845_v21 = vadd.f32 %v781_v50, %v613_v18  ;;  %v6408_v59 = vld [vmem:[#allocation20_spill] sm:$0xff] }
  0xe4   : > { %v1069_v33 = vadd.f32 %v6405_v28, %v837_v44  ;;  %v1388_v47 = vadd.f32 %v5053_v38, %v4946_v4  ;;  %v1390_v26 = vadd.f32 %v5053_v38, %v4952_v29  ;;  %v1387_v37 = vadd.f32 %v5053_v38, %v4955_v49 }
  0xe5   : > { %6404 = vst [vmem:[#allocation74_spill] sm:$0xff] %v5056_v8  ;;  %v1389_v62 = vadd.f32 %v5053_v38, %v1277_v2  ;;  %v5071_v48 = vmul.f32 %v4313_v57, %v4938_v1  ;;  %v5075_v50 = vmul.f32 %v4333_v6, %v4938_v1  ;;  %v5079_v4 = vmul.f32 %v4345_v10, %v4938_v1  ;;  %v6407_v2 = vld [vmem:[#allocation15_spill] sm:$0xff]  ;;  %v5089_v18 = vpop.permute.xlu1 %888  ;;  %v6422_v8 = vld [vmem:[#allocation76_spill] sm:$0xff] }
  0xe6   : > { %v5067_v42 = vadd.f32 %v4750_v15, %v1069_v33  ;;  %v1460_v29 = vmax.f32 %v1388_v47, 0.0  ;;  %v1462_v0 = vmax.f32 %v1390_v26, 0.0  ;;  %v1459_v49 = vmax.f32 %v1387_v37, 0.0  ;;  %6409 = vst [vmem:[#allocation52_spill] sm:$0xff] %v5089_v18 }
  0xe7   : > { %v1461_v22 = vmax.f32 %v1389_v62, 0.0  ;;  %v576_v15 = vmul.f32 %v6407_v2, %v4823_v56  ;;  %v584_v17 = vmul.f32 %v6407_v2, %v4870_v61  ;;  %v578_v33 = vmul.f32 %v6408_v59, %v4823_v56 }
  0xe8   : > { %6406 = vst [vmem:[#allocation83_spill] sm:$0xff] %v5067_v42  ;;  %v586_v7 = vmul.f32 %v6408_v59, %v4870_v61  ;;  %v1516_v23 = vpack.c.bf16 %v1460_v29, %v1452_v24  ;;  %v1518_v44 = vpack.c.bf16 %v1462_v0, %v1454_v52  ;;  %v1515_v28 = vpack.c.bf16 %v1459_v49, %v1451_v51  ;;  %v6410_v24 = vld [vmem:[#allocation33_spill] sm:$0xff]  ;;  %v6412_v29 = vld [vmem:[#allocation34_spill] sm:$0xff] }
  0xe9   : > { %v1517_v47 = vpack.c.bf16 %v1461_v22, %v1453_v35  ;;  %v1012_v26 = vmul.f32 %v4330_v5, %v5089_v18  ;;  %v1014_v37 = vmul.f32 %v4342_v9, %v5089_v18  ;;  %v1011_v62 = vmul.f32 %v4351_v12, %v5089_v18  ;;  %v6411_v51 = vld [vmem:[#allocation41_spill] sm:$0xff] }
  0xea   : > { %v1013_v42 = vmul.f32 %v4361_v16, %v5089_v18  ;;  %1628 = vmatprep.subr.bf16.mxu0 %v1516_v23  ;;  %1701 = vmatprep.subr.bf16.mxu1 %v1518_v44  ;;  %v808_v52 = vadd.f32 %v6410_v24, %v576_v15  ;;  %v816_v35 = vadd.f32 %v6411_v51, %v584_v17  ;;  %v6413_v15 = vld [vmem:[#allocation42_spill] sm:$0xff]  ;;  %v6414_v17 = vld [vmem:[#allocation56_spill] sm:$0xff] }
  0xeb   : > { %v810_v0 = vadd.f32 %v6412_v29, %v578_v33  ;;  %1629 = vmatpush1.bf16.msra.mxu0 %v1515_v28  ;;  %1702 = vmatpush1.bf16.msra.mxu1 %v1517_v47  ;;  %v5105_v22 = vadd.f32 %v1012_v26, %v4996_v11  ;;  %v5108_v3 = vadd.f32 %v1014_v37, %v5003_v53  ;;  %v6415_v33 = vld [vmem:[#allocation43_spill] sm:$0xff]  ;;  %v5117_v47 = vpop.permute.xlu1 %487  ;;  %v6417_v29 = vld [vmem:[#allocation44_spill] sm:$0xff]  ;;  %v6418_v11 = vld [vmem:[#allocation22_spill] sm:$0xff] }
  0xec   : > { %v629_v23 = vmul.f32 %v4355_v14, %v4938_v1  ;;  %v5112_v44 = vadd.f32 %v1011_v62, %v843_v31  ;;  %v1040_v24 = vadd.f32 %v6413_v15, %v808_v52  ;;  %v1048_v51 = vadd.f32 %v6414_v17, %v816_v35  ;;  %6416 = vst [vmem:[#allocation53_spill] sm:$0xff] %v5117_v47  ;;  %v6419_v37 = vld [vmem:[#allocation24_spill] sm:$0xff] }
  0xed   : > { %v818_v28 = vadd.f32 %v6415_v33, %v586_v7  ;;  %v1042_v49 = vadd.f32 %v6417_v29, %v810_v0  ;;  %v575_v26 = vmul.f32 %v6418_v11, %v4823_v56  ;;  %v583_v53 = vmul.f32 %v6418_v11, %v4870_v61  ;;  %v6420_v0 = vld [vmem:[#allocation75_spill] sm:$0xff]  ;;  %v6421_v33 = vld [vmem:[#allocation57_spill] sm:$0xff]  ;;  %v6425_v11 = vld [vmem:[#allocation36_spill] sm:$0xff] }
  0xee   : > { %v577_v31 = vmul.f32 %v6419_v37, %v4823_v56  ;;  %v5126_v62 = vadd.f32 %v1013_v42, %v845_v21  ;;  %v620_v52 = vmul.f32 %v4313_v57, %v5117_v47  ;;  %v622_v7 = vmul.f32 %v4333_v6, %v5117_v47  ;;  %v6423_v56 = vld [vmem:[#allocation35_spill] sm:$0xff]  ;;  %v6424_v42 = vld [vmem:[#allocation45_spill] sm:$0xff] }
  0xef   : > { %v619_v35 = vmul.f32 %v4345_v10, %v5117_v47  ;;  %v1272_v15 = vadd.f32 %v6420_v0, %v1040_v24  ;;  %v1280_v17 = vadd.f32 %v4767_v34, %v1048_v51  ;;  %v1050_v29 = vadd.f32 %v6421_v33, %v818_v28  ;;  %v6426_v24 = vld [vmem:[#allocation96_spill] sm:$0xff]  ;;  %v5147_v51 = vpop.permute.xlu1 %660 }
  0xf0   : > { %v1274_v1 = vadd.f32 %v6422_v8, %v1042_v49  ;;  %v807_v21 = vadd.f32 %v6423_v56, %v575_v26  ;;  %v815_v18 = vadd.f32 %v6424_v42, %v583_v53  ;;  %v585_v57 = vmul.f32 %v6419_v37, %v4870_v61  ;;  %6427 = vst [vmem:[#allocation54_spill] sm:$0xff] %v5147_v51  ;;  %v6428_v49 = vld [vmem:[#allocation46_spill] sm:$0xff]  ;;  %v6430_v61 = vld [vmem:[#allocation48_spill] sm:$0xff] }
  0xf1   : > { %v809_v6 = vadd.f32 %v6425_v11, %v577_v31  ;;  %v1384_v16 = vadd.f32 %v5028_v30, %v1272_v15  ;;  %v1392_v10 = vadd.f32 %v5053_v38, %v1280_v17  ;;  %v1282_v0 = vadd.f32 %v6426_v24, %v1050_v29  ;;  %v6429_v26 = vld [vmem:[#allocation58_spill] sm:$0xff]  ;;  %v6431_v15 = vld [vmem:[#allocation47_spill] sm:$0xff] }
  0xf2   : > { %v1386_v34 = vadd.f32 %v5028_v30, %v1274_v1  ;;  %v621_v8 = vmul.f32 %v4355_v14, %v5117_v47  ;;  %v1039_v28 = vadd.f32 %v6428_v49, %v807_v21  ;;  %v1047_v53 = vadd.f32 %v6429_v26, %v815_v18  ;;  %v6434_v47 = vld [vmem:[#allocation97_spill] sm:$0xff] }
  0xf3   : > { %v1041_v33 = vadd.f32 %v6430_v61, %v809_v6  ;;  %v788_v11 = vmul.f32 %v6385_v32, %v5147_v51  ;;  %v790_v31 = vmul.f32 %v6389_v36, %v5147_v51  ;;  %v787_v1 = vmul.f32 %v6398_v60, %v5147_v51  ;;  %v5170_v49 = vpop.permute.xlu1 %664 }
  0xf4   : > { %v817_v17 = vadd.f32 %v6431_v15, %v585_v57  ;;  %v789_v14 = vmul.f32 %v6400_v63, %v5147_v51  ;;  %v1456_v29 = vmax.f32 %v1384_v16, 0.0  ;;  %v1464_v56 = vmax.f32 %v1392_v10, 0.0  ;;  %6432 = vst [vmem:[#allocation55_spill] sm:$0xff] %v5170_v49  ;;  %v6433_v57 = vld [vmem:[#allocation77_spill] sm:$0xff] }
  0xf5   : > { %v1394_v18 = vadd.f32 %v5053_v38, %v1282_v0  ;;  %v5164_v21 = vadd.f32 %v788_v11, %v620_v52  ;;  %v5166_v42 = vadd.f32 %v790_v31, %v622_v7  ;;  %v5168_v6 = vadd.f32 %v787_v1, %v619_v35  ;;  %v6436_v31 = vld [vmem:[#allocation78_spill] sm:$0xff] }
  0xf6   : > { %v1458_v24 = vmax.f32 %v1386_v34, 0.0  ;;  %v5172_v26 = vpack.c.bf16 %v1464_v56, %v1456_v29  ;;  %v1271_v15 = vadd.f32 %v6433_v57, %v1039_v28  ;;  %v1279_v51 = vadd.f32 %v6434_v47, %v1047_v53  ;;  %v6435_v28 = vld [vmem:[#allocation59_spill] sm:$0xff]  ;;  %v6437_v29 = vld [vmem:[#allocation98_spill] sm:$0xff] }
  0xf7   : > { %v1466_v61 = vmax.f32 %v1394_v18, 0.0  ;;  %v796_v16 = vmul.f32 %v6385_v32, %v5170_v49  ;;  %v798_v52 = vmul.f32 %v6389_v36, %v5170_v49  ;;  %v795_v7 = vmul.f32 %v6398_v60, %v5170_v49  ;;  %v5204_v56 = vpop.permute.xlu1 %1120 }
  0xf8   : > { %v797_v35 = vmul.f32 %v6400_v63, %v5170_v49  ;;  %v1383_v0 = vadd.f32 %v5028_v30, %v1271_v15  ;;  %v1391_v34 = vadd.f32 %v5053_v38, %v1279_v51  ;;  %v1049_v47 = vadd.f32 %v6435_v28, %v817_v17  ;;  %v5229_v28 = vpop.permute.xlu0 %1366 }
  0xf9   : > { %v5184_v10 = vpack.c.bf16 %v1466_v61, %v1458_v24  ;;  %v5190_v53 = vadd.f32 %v796_v16, %v5071_v48  ;;  %v5193_v32 = vadd.f32 %v798_v52, %v5075_v50  ;;  %v5196_v36 = vadd.f32 %v795_v7, %v5079_v4  ;;  %v6438_v50 = vld [vmem:[#allocation90_spill] sm:$0xff]  ;;  %v6440_v24 = vld [vmem:[#allocation13_spill] sm:$0xff]  ;;  %v6441_v16 = vld [vmem:[#allocation84_spill] sm:$0xff] }
  0xfa   : > { %v5198_v60 = vadd.f32 %v789_v14, %v621_v8  ;;  %v5200_v63 = vadd.f32 %v797_v35, %v629_v23  ;;  %v1463_v11 = vmax.f32 %v1391_v34, 0.0  ;;  %v1273_v1 = vadd.f32 %v6436_v31, %v1041_v33  ;;  %v6439_v33 = vld [vmem:[#allocation12_spill] sm:$0xff] }
  0xfb   : > { %v1281_v51 = vadd.f32 %v6437_v29, %v1049_v47  ;;  %v1455_v17 = vmax.f32 %v1383_v0, 0.0  ;;  %v600_v48 = vmul.f32 %v6407_v2, %v4909_v41  ;;  %v1056_v18 = vadd.f32 %v4852_v40, %v6438_v50  ;;  %v6442_v31 = vld [vmem:[#allocation60_spill] sm:$0xff] }
  0xfc   : > { %v1224_v4 = vmul.f32 %v4425_v54, %v4979_v58  ;;  %v1244_v23 = vmul.f32 %v4368_v19, %v5204_v56  ;;  %v1246_v8 = vmul.f32 %v4371_v20, %v5204_v56  ;;  %v1243_v14 = vmul.f32 %v6439_v33, %v5204_v56 }
  0xfd   : > { %v1245_v61 = vmul.f32 %v6440_v24, %v5204_v56  ;;  %v5220_v57 = vpack.c.bf16 %v1463_v11, %v1455_v17  ;;  %v1385_v15 = vadd.f32 %v5028_v30, %v1273_v1  ;;  %v1393_v40 = vadd.f32 %v5053_v38, %v1281_v51  ;;  %v5234_v38 = vpop.permute.xlu1 %1351 }
  0xfe   : > { %v832_v52 = vadd.f32 %v6441_v16, %v600_v48  ;;  %v1308_v7 = vadd.f32 %v1244_v23, %v5105_v22  ;;  %v1310_v35 = vadd.f32 %v1246_v8, %v5108_v3  ;;  %v1307_v0 = vadd.f32 %v1243_v14, %v5112_v44 }
  0xff   : > { %v1309_v34 = vadd.f32 %v1245_v61, %v5126_v62  ;;  %v1457_v47 = vmax.f32 %v1385_v15, 0.0  ;;  %v1288_v29 = vadd.f32 %v1224_v4, %v1056_v18  ;;  %v602_v30 = vmul.f32 %v6408_v59, %v4909_v41  ;;  %v6443_v15 = vld [vmem:[#allocation85_spill] sm:$0xff] }
 0x100   : > { %v1064_v11 = vadd.f32 %v6442_v31, %v832_v52  ;;  %v5237_v1 = vadd.f32 %v5229_v28, %v1308_v7  ;;  %v5240_v3 = vadd.f32 %v5229_v28, %v1310_v35  ;;  %v5243_v22 = vadd.f32 %v5229_v28, %v1307_v0 }
 0x101   : > { %v1465_v44 = vmax.f32 %v1393_v40, 0.0  ;;  %v1396_v62 = vadd.f32 %v5234_v38, %v5011_v13  ;;  %v1398_v51 = vadd.f32 %v5234_v38, %v5019_v27  ;;  %v1395_v17 = vadd.f32 %v5234_v38, %v5022_v46  ;;  %v5264_v52 = vpop.permute.xlu1 %892 }
 0x102   : > { %v1397_v48 = vadd.f32 %v5234_v38, %v5031_v39  ;;  %v5257_v23 = vadd.f32 %v5229_v28, %v1309_v34  ;;  %v1296_v46 = vadd.f32 %v6443_v15, %v1064_v11  ;;  %v1400_v40 = vadd.f32 %v5234_v38, %v1288_v29  ;;  %v6444_v39 = vld [vmem:[#allocation87_spill] sm:$0xff]  ;;  %6445 = vst [vmem:[#allocation7_spill] sm:$0xff] %v5264_v52 }
 0x103   : > { %v1468_v8 = vmax.f32 %v1396_v62, 0.0  ;;  %v1470_v13 = vmax.f32 %v1398_v51, 0.0  ;;  %v1467_v14 = vmax.f32 %v1395_v17, 0.0  ;;  %v5259_v27 = vpack.c.bf16 %v1465_v44, %v1457_v47 }
 0x104   : > { %v1469_v61 = vmax.f32 %v1397_v48, 0.0  ;;  %v834_v16 = vadd.f32 %v6444_v39, %v602_v30  ;;  %v6446_v7 = vmax.f32 %v4982_v25, 0.0  ;;  %v6447_v0 = vmax.f32 %v4985_v43, 0.0  ;;  %v6450_v25 = vld [vmem:[#allocation11_spill] sm:$0xff] }
 0x105   : > { %v6448_v31 = vmax.f32 %v4999_v55, 0.0  ;;  %v6449_v47 = vmax.f32 %v5016_v45, 0.0  ;;  %v1020_v11 = vmul.f32 %v4330_v5, %v5264_v52  ;;  %v1022_v29 = vmul.f32 %v4342_v9, %v5264_v52  ;;  %v6451_v55 = vld [vmem:[#allocation50_spill] sm:$0xff]  ;;  %v6452_v45 = vld [vmem:[#allocation91_spill] sm:$0xff] }
 0x106   : > { %v1524_v35 = vpack.c.bf16 %v6446_v7, %v1468_v8  ;;  %v1526_v34 = vpack.c.bf16 %v6447_v0, %v1470_v13  ;;  %v1019_v30 = vmul.f32 %v4351_v12, %v5264_v52  ;;  %v1021_v51 = vmul.f32 %v6450_v25, %v5264_v52  ;;  %v6453_v48 = vld [vmem:[#allocation111_spill] sm:$0xff]  ;;  %v6454_v13 = vld [vmem:[#allocation62_spill] sm:$0xff]  ;;  %v6483_v52 = vld [vmem:[#allocation72_spill] sm:$0xff] }
 0x107   : > { %v1523_v62 = vpack.c.bf16 %v6448_v31, %v1467_v14  ;;  %v1525_v44 = vpack.c.bf16 %v6449_v47, %v1469_v61  ;;  %v1408_v17 = vadd.f32 %v6451_v55, %v1296_v46  ;;  %v1058_v8 = vadd.f32 %v6453_v48, %v6452_v45  ;;  %v6456_v46 = vld [vmem:[#allocation26_spill] sm:$0xff]  ;;  %v6457_v47 = vld [vmem:[#allocation88_spill] sm:$0xff] }
 0x108   : > { %1630 = vmatprep.subr.bf16.mxu0 %v1524_v35  ;;  %1703 = vmatprep.subr.bf16.mxu1 %v1526_v34  ;;  %v1066_v14 = vadd.f32 %v6454_v13, %v834_v16  ;;  %v1084_v61 = vadd.f32 %v1020_v11, %v5164_v21  ;;  %v1086_v15 = vadd.f32 %v1022_v29, %v5166_v42  ;;  %v1472_v7 = vmax.f32 %v1400_v40, 0.0  ;;  %v5290_v35 = vpop.permute.xlu1 %896 }
 0x109   : > { %1631 = vmatpush1.bf16.msra.mxu0 %v1523_v62  ;;  %1704 = vmatpush1.bf16.msra.mxu1 %v1525_v44  ;;  %v1083_v39 = vadd.f32 %v1019_v30, %v5168_v6  ;;  %6455 = vst [vmem:[#allocation29_spill] sm:$0xff] %v5290_v35  ;;  %v1085_v0 = vadd.f32 %v1021_v51, %v5198_v60  ;;  %v1480_v34 = vmax.f32 %v1408_v17, 0.0  ;;  %v6458_v62 = vld [vmem:[#allocation95_spill] sm:$0xff]  ;;  %v6460_v60 = vld [vmem:[#allocation100_spill] sm:$0xff]  ;;  %v6461_v30 = vld [vmem:[#allocation101_spill] sm:$0xff] }
 0x10a   : > { %v1226_v31 = vmul.f32 %v6456_v46, %v4979_v58  ;;  %v1298_v45 = vadd.f32 %v6457_v47, %v1066_v14  ;;  %v1028_v16 = vmul.f32 %v4330_v5, %v5290_v35  ;;  %v1316_v21 = vadd.f32 %v6458_v62, %v1084_v61  ;;  %v6459_v6 = vld [vmem:[#allocation99_spill] sm:$0xff]  ;;  %v6462_v61 = vld [vmem:[#allocation22_spill] sm:$0xff]  ;;  %v6467_v62 = vld [vmem:[#allocation89_spill] sm:$0xff] }
 0x10b   : > { %v1030_v42 = vmul.f32 %v4342_v9, %v5290_v35  ;;  %v1318_v40 = vadd.f32 %v6459_v6, %v1086_v15  ;;  %v1027_v44 = vmul.f32 %v4351_v12, %v5290_v35  ;;  %v1315_v11 = vadd.f32 %v6460_v60, %v1083_v39 }
 0x10c   : > { %v1029_v29 = vmul.f32 %v6450_v25, %v5290_v35  ;;  %v1317_v51 = vadd.f32 %v6461_v30, %v1085_v0  ;;  %v1092_v17 = vadd.f32 %v1028_v16, %v5190_v53  ;;  %v5310_v48 = vpack.c.bf16 %v1480_v34, %v1472_v7  ;;  %v5317_v39 = vpop.permute.xlu1 %1128  ;;  %v6464_v0 = vld [vmem:[#allocation92_spill] sm:$0xff] }
 0x10d   : > { %v1094_v5 = vadd.f32 %v1030_v42, %v5193_v32  ;;  %v1290_v13 = vadd.f32 %v1226_v31, %v1058_v8  ;;  %v1091_v9 = vadd.f32 %v1027_v44, %v5196_v36  ;;  %v1410_v12 = vadd.f32 %v6451_v55, %v1298_v45  ;;  %6463 = vst [vmem:[#allocation79_spill] sm:$0xff] %v5317_v39  ;;  %v6465_v53 = vld [vmem:[#allocation112_spill] sm:$0xff]  ;;  %v6466_v32 = vld [vmem:[#allocation27_spill] sm:$0xff] }
 0x10e   : > { %v1093_v14 = vadd.f32 %v1029_v29, %v5200_v63  ;;  %v599_v15 = vmul.f32 %v6462_v61, %v4909_v41  ;;  %v1055_v47 = vadd.f32 %v6465_v53, %v6464_v0  ;;  %v1223_v7 = vmul.f32 %v6466_v32, %v4979_v58  ;;  %v6469_v0 = vld [vmem:[#allocation103_spill] sm:$0xff] }
 0x10f   : > { %v1402_v25 = vadd.f32 %v5234_v38, %v1290_v13  ;;  %v601_v36 = vmul.f32 %v6419_v37, %v4909_v41  ;;  %v1260_v63 = vmul.f32 %v4368_v19, %v5317_v39  ;;  %v1262_v8 = vmul.f32 %v4371_v20, %v5317_v39  ;;  %v6468_v19 = vld [vmem:[#allocation63_spill] sm:$0xff] }
 0x110   : > { %v1259_v34 = vmul.f32 %v6439_v33, %v5317_v39  ;;  %v1261_v31 = vmul.f32 %v6440_v24, %v5317_v39  ;;  %v1482_v16 = vmax.f32 %v1410_v12, 0.0  ;;  %v831_v42 = vadd.f32 %v6467_v62, %v599_v15  ;;  %v5340_v53 = vpop.permute.xlu1 %1361  ;;  %v6470_v24 = vld [vmem:[#allocation102_spill] sm:$0xff]  ;;  %v6472_v15 = vld [vmem:[#allocation28_spill] sm:$0xff]  ;;  %v6479_v62 = vld [vmem:[#allocation93_spill] sm:$0xff] }
 0x111   : > { %v1474_v45 = vmax.f32 %v1402_v25, 0.0  ;;  %v1287_v6 = vadd.f32 %v1223_v7, %v1055_v47  ;;  %v1324_v44 = vadd.f32 %v1260_v63, %v1092_v17  ;;  %v1326_v60 = vadd.f32 %v1262_v8, %v1094_v5  ;;  %v6471_v25 = vld [vmem:[#allocation25_spill] sm:$0xff]  ;;  %v6476_v8 = vld [vmem:[#allocation51_spill] sm:$0xff] }
 0x112   : > { %v1323_v41 = vadd.f32 %v1259_v34, %v1091_v9  ;;  %v1325_v29 = vadd.f32 %v1261_v31, %v1093_v14  ;;  %v1063_v13 = vadd.f32 %v6468_v19, %v831_v42  ;;  %v833_v33 = vadd.f32 %v6469_v0, %v601_v36  ;;  %v6473_v17 = vld [vmem:[#allocation113_spill] sm:$0xff]  ;;  %v6474_v9 = vld [vmem:[#allocation114_spill] sm:$0xff]  ;;  %v6481_v0 = vld [vmem:[#allocation64_spill] sm:$0xff] }
 0x113   : > { %v5335_v30 = vpack.c.bf16 %v1482_v16, %v1474_v45  ;;  %v1399_v20 = vadd.f32 %v5234_v38, %v1287_v6  ;;  %v993_v12 = vmul.f32 %v6471_v25, %v6470_v24  ;;  %v1225_v47 = vmul.f32 %v6472_v15, %v4979_v58  ;;  %v6475_v7 = vld [vmem:[#allocation73_spill] sm:$0xff]  ;;  %v6477_v34 = vld [vmem:[#allocation74_spill] sm:$0xff]  ;;  %v6478_v45 = vld [vmem:[#allocation83_spill] sm:$0xff] }
 0x114   : > { %v608_v5 = vmul.f32 %v6407_v2, %v6473_v17  ;;  %v616_v14 = vmul.f32 %v6407_v2, %v6474_v9  ;;  %v1412_v63 = vadd.f32 %v5340_v53, %v6475_v7  ;;  %v1414_v36 = vadd.f32 %v5340_v53, %v6476_v8  ;;  %v6480_v6 = vld [vmem:[#allocation109_spill] sm:$0xff]  ;;  %v5361_v50 = vpop.permute.xlu1 %1371 }
 0x115   : > { %v1411_v31 = vadd.f32 %v5340_v53, %v6477_v34  ;;  %v1413_v16 = vadd.f32 %v5340_v53, %v6478_v45  ;;  %v1295_v58 = vadd.f32 %v6479_v62, %v1063_v13  ;;  %v1471_v42 = vmax.f32 %v1399_v20, 0.0  ;;  %v6482_v34 = vld [vmem:[#allocation104_spill] sm:$0xff]  ;;  %v6484_v45 = vld [vmem:[#allocation14_spill] sm:$0xff] }
 0x116   : > { %v1057_v19 = vadd.f32 %v993_v12, %v6480_v6  ;;  %v1065_v24 = vadd.f32 %v6481_v0, %v833_v33  ;;  %v1484_v43 = vmax.f32 %v1412_v63, 0.0  ;;  %v1486_v4 = vmax.f32 %v1414_v36, 0.0 }
 0x117   : > { %v1483_v18 = vmax.f32 %v1411_v31, 0.0  ;;  %v1485_v7 = vmax.f32 %v1413_v16, 0.0  ;;  %v1407_v8 = vadd.f32 %v6451_v55, %v1295_v58  ;;  %v784_v49 = vmul.f32 %v6484_v45, %v6483_v52 }
 0x118   : > { %v1289_v39 = vadd.f32 %v1225_v47, %v1057_v19  ;;  %v1297_v35 = vadd.f32 %v6482_v34, %v1065_v24  ;;  %v6485_v13 = vmax.f32 %v5237_v1, 0.0  ;;  %v6486_v12 = vmax.f32 %v5240_v3, 0.0 }
 0x119   : > { %v6487_v63 = vmax.f32 %v5243_v22, 0.0  ;;  %v6488_v31 = vmax.f32 %v5257_v23, 0.0  ;;  %v1428_v62 = vadd.f32 %v5361_v50, %v1316_v21  ;;  %v1430_v47 = vadd.f32 %v5361_v50, %v1318_v40  ;;  %v6489_v22 = vld [vmem:[#allocation37_spill] sm:$0xff] }
 0x11a   : > { %v1532_v20 = vpack.c.bf16 %v6485_v13, %v1484_v43  ;;  %v1534_v33 = vpack.c.bf16 %v6486_v12, %v1486_v4  ;;  %v1427_v58 = vadd.f32 %v5361_v50, %v1315_v11  ;;  %v1429_v6 = vadd.f32 %v5361_v50, %v1317_v51  ;;  %v5382_v43 = vpop.permute.xlu1 %1376  ;;  %v6491_v12 = vld [vmem:[#allocation19_spill] sm:$0xff] }
 0x11b   : > { %v1531_v36 = vpack.c.bf16 %v6487_v63, %v1483_v18  ;;  %v1533_v16 = vpack.c.bf16 %v6488_v31, %v1485_v7  ;;  %v1479_v1 = vmax.f32 %v1407_v8, 0.0  ;;  %v1401_v3 = vadd.f32 %v5234_v38, %v1289_v39 }
 0x11c   : > { %1632 = vmatprep.subr.bf16.mxu0 %v1532_v20  ;;  %1705 = vmatprep.subr.bf16.mxu1 %v1534_v33  ;;  %v1409_v4 = vadd.f32 %v6451_v55, %v1297_v35  ;;  %v840_v18 = vadd.f32 %v6489_v22, %v608_v5  ;;  %v1500_v23 = vmax.f32 %v1428_v62, 0.0  ;;  %v1502_v21 = vmax.f32 %v1430_v47, 0.0  ;;  %v6490_v20 = vld [vmem:[#allocation52_spill] sm:$0xff]  ;;  %v5403_v47 = vld [vmem:[%s6172_s3] sm:$0xff]  }
 0x11d   : > { %1633 = vmatpush1.bf16.msra.mxu0 %v1531_v36  ;;  %1706 = vmatpush1.bf16.msra.mxu1 %v1533_v16  ;;  %v1499_v40 = vmax.f32 %v1427_v58, 0.0  ;;  %v1501_v19 = vmax.f32 %v1429_v6, 0.0  ;;  %v1436_v11 = vadd.f32 %v5382_v43, %v1324_v44  ;;  %v1438_v51 = vadd.f32 %v5382_v43, %v1326_v60  ;;  %v6492_v44 = vld [vmem:[#allocation68_spill] sm:$0xff]  ;;  %v6493_v16 = vld [vmem:[#allocation105_spill] sm:$0xff] }
 0x11e   : > { %v1435_v0 = vadd.f32 %v5382_v43, %v1323_v41  ;;  %v1437_v38 = vadd.f32 %v5382_v43, %v1325_v29  ;;  %v5388_v39 = vpack.c.bf16 %v1479_v1, %v1471_v42  ;;  %v1473_v55 = vmax.f32 %v1401_v3, 0.0  ;;  %v6494_v58 = vld [vmem:[#allocation16_spill] sm:$0xff]  ;;  %v6495_v1 = vld [vmem:[#allocation21_spill] sm:$0xff] }
 0x11f   : > { %v1481_v35 = vmax.f32 %v1409_v4, 0.0  ;;  %v848_v5 = vadd.f32 %v784_v49, %v616_v14  ;;  %v1508_v24 = vmax.f32 %v1436_v11, 0.0  ;;  %v1510_v7 = vmax.f32 %v1438_v51, 0.0 }
 0x120   : > { %v1507_v8 = vmax.f32 %v1435_v0, 0.0  ;;  %v1509_v34 = vmax.f32 %v1437_v38, 0.0  ;;  %v1016_v33 = vmul.f32 %v6491_v12, %v6490_v20  ;;  %v1072_v63 = vadd.f32 %v6492_v44, %v840_v18  ;;  %v6497_v38 = vld [vmem:[#allocation69_spill] sm:$0xff] }
 0x121   : > { %v1529_v13 = vpack.c.bf16 %v1481_v35, %v1473_v55  ;;  %v1248_v60 = vmul.f32 %v4425_v54, %v5204_v56  ;;  %v1540_v41 = vpack.c.bf16 %v1508_v24, %v1500_v23  ;;  %v1542_v29 = vpack.c.bf16 %v1510_v7, %v1502_v21  ;;  %v6496_v23 = vld [vmem:[#allocation38_spill] sm:$0xff]  ;;  %v6498_v35 = vld [vmem:[#allocation17_spill] sm:$0xff]  ;;  %v6500_v7 = vld [vmem:[#allocation23_spill] sm:$0xff] }
 0x122   : > { %v1539_v42 = vpack.c.bf16 %v1507_v8, %v1499_v40  ;;  %v1541_v36 = vpack.c.bf16 %v1509_v34, %v1501_v19  ;;  %v1080_v31 = vadd.f32 %v1016_v33, %v848_v5  ;;  %v1304_v49 = vadd.f32 %v6493_v16, %v1072_v63  ;;  %v6501_v33 = vld [vmem:[#allocation106_spill] sm:$0xff] }
 0x123   : > { %v610_v14 = vmul.f32 %v6408_v59, %v6473_v17  ;;  %v618_v62 = vmul.f32 %v6408_v59, %v6474_v9  ;;  %1634 = vmatprep.subr.bf16.mxu0 %v1540_v41  ;;  %1707 = vmatprep.subr.bf16.mxu1 %v1542_v29  ;;  %v786_v6 = vmul.f32 %v6494_v58, %v6483_v52  ;;  %v6502_v29 = vld [vmem:[#allocation70_spill] sm:$0xff] }
 0x124   : > { %v1018_v3 = vmul.f32 %v6495_v1, %v6490_v20  ;;  %v1250_v4 = vmul.f32 %v6456_v46, %v5204_v56  ;;  %1635 = vmatpush1.bf16.msra.mxu0 %v1539_v42  ;;  %1708 = vmatpush1.bf16.msra.mxu1 %v1541_v36  ;;  %v1312_v22 = vadd.f32 %v1248_v60, %v1080_v31  ;;  %v6503_v31 = vmov 0  }
 0x125   : > { %v1416_v18 = vadd.f32 %v5340_v53, %v1304_v49  ;;  %v842_v21 = vadd.f32 %v6496_v23, %v610_v14  ;;  %1774 = vmatprep.subr.bf16.mxu0 %v5172_v26  ;;  %1847 = vmatprep.subr.bf16.mxu1 %v5184_v10  ;;  %v850_v40 = vadd.f32 %v786_v6, %v618_v62  ;;  %v6499_v10 = vld [vmem:[#allocation39_spill] sm:$0xff]  ;;  %v6505_v62 = vld [vmem:[#allocation18_spill] sm:$0xff] }
 0x126   : > { %v607_v19 = vmul.f32 %v6462_v61, %v6473_v17  ;;  %v615_v11 = vmul.f32 %v6462_v61, %v6474_v9  ;;  %v1424_v51 = vadd.f32 %v5229_v28, %v1312_v22  ;;  %v783_v5 = vmul.f32 %v6498_v35, %v6483_v52  ;;  %v6506_v22 = vld [vmem:[#allocation40_spill] sm:$0xff] }
 0x127   : > { %v1488_v0 = vmax.f32 %v1416_v18, 0.0  ;;  %v1074_v55 = vadd.f32 %v6497_v38, %v842_v21  ;;  %3781 = vmatmul.mubr.msk.bf16.vlgmr.msra.gmra.mrb[0].mxu0 %vm1615_vm0, %v5403_v47  ;;  %3785 = vmatmul.mubr.msk.bf16.vlgmr.msra.gmra.mrb[0].mxu1 %vm1615_vm0, %v5403_v47  ;;  %v1082_v26 = vadd.f32 %v1018_v3, %v850_v40  ;;  %v1015_v8 = vmul.f32 %v6500_v7, %v6490_v20 }
 0x128   : > { %v839_v24 = vadd.f32 %v6499_v10, %v607_v19  ;;  %1775 = vmatpush1.bf16.msra.mxu0 %v5220_v57  ;;  %1848 = vmatpush1.bf16.msra.mxu1 %v5259_v27  ;;  %v1496_v34 = vmax.f32 %v1424_v51, 0.0  ;;  %v847_v63 = vadd.f32 %v783_v5, %v615_v11  ;;  %v1247_v60 = vmul.f32 %v6466_v32, %v5204_v56  ;;  %v6507_v11 = vld [vmem:[#allocation71_spill] sm:$0xff] }
 0x129   : > { %v1306_v44 = vadd.f32 %v6501_v33, %v1074_v55  ;;  %1776 = vmatprep.subr.bf16.mxu0 %v5310_v48  ;;  %1849 = vmatprep.subr.bf16.mxu1 %v5335_v30  ;;  %v1314_v41 = vadd.f32 %v1250_v4, %v1082_v26  ;;  %v609_v36 = vmul.f32 %v6419_v37, %v6473_v17  ;;  %v5447_v48 = vld [vmem:[%s6172_s3 + $0x8] sm:$0xff]   ;;  %v6504_v30 = vld [vmem:[#allocation107_spill] sm:$0xff] }
 0x12a   : > { %v1071_v42 = vadd.f32 %v6502_v29, %v839_v24  ;;  %v1536_v57 = vpack.c.bf16 %v1496_v34, %v1488_v0  ;;  %1670 = vmatprep.mubr.bf16.mxu0 %v6503_v31  ;;  %1743 = vmatprep.mubr.bf16.mxu1 %v6503_v31  ;;  %v1079_v16 = vadd.f32 %v1015_v8, %v847_v63  ;;  %v6509_v0 = vld [vmem:[#allocation49_spill] sm:$0xff]  ;;  %v6511_v24 = vld [vmem:[#allocation108_spill] sm:$0xff]  ;;  %v6512_v34 = vld [vmem:[#allocation55_spill] sm:$0xff] }
 0x12b   : > { %v1418_v27 = vadd.f32 %v5340_v53, %v1306_v44  ;;  %v1426_v49 = vadd.f32 %v5229_v28, %v1314_v41  ;;  %v617_v17 = vmul.f32 %v6419_v37, %v6474_v9  ;;  %v785_v6 = vmul.f32 %v6505_v62, %v6483_v52  ;;  %v6513_v44 = vld [vmem:[#allocation7_spill] sm:$0xff]  ;;  %v6514_v41 = vld [vmem:[#allocation29_spill] sm:$0xff] }
 0x12c   : > { %v1303_v14 = vadd.f32 %v6504_v30, %v1071_v42  ;;  %1777 = vmatpush1.bf16.msra.mxu0 %v5388_v39  ;;  %1850 = vmatpush1.bf16.msra.mxu1 %v1529_v13  ;;  %v1311_v4 = vadd.f32 %v1247_v60, %v1079_v16  ;;  %v841_v18 = vadd.f32 %v6506_v22, %v609_v36  ;;  %v6508_v13 = vld [vmem:[#allocation53_spill] sm:$0xff]  ;;  %v6515_v42 = vld [vmem:[#allocation79_spill] sm:$0xff] }
 0x12d   : > { %v1490_v3 = vmax.f32 %v1418_v27, 0.0  ;;  %v1017_v23 = vmul.f32 %v6471_v25, %v6490_v20  ;;  %1778 = vmatprep.subr.bf16.mxu0 %v1536_v57  ;;  %v1498_v21 = vmax.f32 %v1426_v49, 0.0  ;;  %v849_v19 = vadd.f32 %v785_v6, %v617_v17 }
 0x12e   : > { %v1415_v40 = vadd.f32 %v5340_v53, %v1303_v14  ;;  %v1249_v9 = vmul.f32 %v6472_v15, %v5204_v56  ;;  %v1423_v52 = vadd.f32 %v5229_v28, %v1311_v4  ;;  %v1073_v39 = vadd.f32 %v6507_v11, %v841_v18  ;;  %v6510_v56 = vld [vmem:[#allocation54_spill] sm:$0xff] }
 0x12f   : > { %v624_v51 = vmul.f32 %v6407_v2, %v6508_v13  ;;  %v632_v38 = vmul.f32 %v6407_v2, %v6509_v0  ;;  %v1538_v55 = vpack.c.bf16 %v1498_v21, %v1490_v3  ;;  %3782 = vmatmul.mubr.msk.bf16.gmra.mrb[4].mxu0 %vm1615_vm0, %v5447_v48  ;;  %3786 = vmatmul.mubr.msk.bf16.gmra.mrb[4].mxu1 %vm1615_vm0, %v5447_v48  ;;  %v6516_v4 = vld [vmem:[#allocation110_spill] sm:$0xff] }
 0x130   : > { %v1487_v20 = vmax.f32 %v1415_v40, 0.0  ;;  %v1081_v5 = vadd.f32 %v1017_v23, %v849_v19  ;;  %v792_v26 = vmul.f32 %v6484_v45, %v6510_v56  ;;  %v1495_v10 = vmax.f32 %v1423_v52, 0.0  ;;  %1680 = vmatprep.mubr.bf16.mxu0 %v6503_v31  ;;  %1753 = vmatprep.mubr.bf16.mxu1 %v6503_v31  ;;  %v6517_v40 = vld [vmem:[#allocation94_spill] sm:$0xff] }
 0x131   : > { %v1305_v8 = vadd.f32 %v6511_v24, %v1073_v39  ;;  %v800_v33 = vmul.f32 %v6484_v45, %v6512_v34  ;;  %v1024_v2 = vmul.f32 %v6491_v12, %v6513_v44  ;;  %1851 = vmatprep.subr.bf16.mxu1 %v1538_v55  ;;  %v1032_v29 = vmul.f32 %v6491_v12, %v6514_v41 }
 0x132   : > { %v1313_v63 = vadd.f32 %v1249_v9, %v1081_v5  ;;  %v856_v60 = vadd.f32 %v792_v26, %v624_v51  ;;  %v1264_v36 = vmul.f32 %v4425_v54, %v6515_v42  ;;  %v1535_v57 = vpack.c.bf16 %v1495_v10, %v1487_v20  ;;  %v5495_v54 = vld [vmem:[%s6172_s3 + $0x10] sm:$0xff]  }
 0x133   : > { %v1417_v27 = vadd.f32 %v5340_v53, %v1305_v8  ;;  %v864_v45 = vadd.f32 %v800_v33, %v632_v38  ;;  %v626_v16 = vmul.f32 %v6408_v59, %v6508_v13  ;;  %v634_v14 = vmul.f32 %v6408_v59, %v6509_v0 }
 0x134   : > { %v1425_v49 = vadd.f32 %v5229_v28, %v1313_v63  ;;  %v1088_v30 = vadd.f32 %v1024_v2, %v856_v60  ;;  %v794_v17 = vmul.f32 %v6494_v58, %v6510_v56  ;;  %1779 = vmatpush1.bf16.msra.mxu0 %v1535_v57  ;;  %v802_v6 = vmul.f32 %v6494_v58, %v6512_v34  ;;  %v3955_v60 = vld [vmem:[%s6172_s3 + $0x18] sm:$0xff]  }
 0x135   : > { %v1489_v53 = vmax.f32 %v1417_v27, 0.0  ;;  %v1096_v12 = vadd.f32 %v1032_v29, %v864_v45  ;;  %v1026_v28 = vmul.f32 %v6495_v1, %v6513_v44  ;;  %v1034_v18 = vmul.f32 %v6495_v1, %v6514_v41 }
 0x136   : > { %v1497_v3 = vmax.f32 %v1425_v49, 0.0  ;;  %v1320_v59 = vadd.f32 %v6516_v4, %v1088_v30  ;;  %v858_v22 = vadd.f32 %v794_v17, %v626_v16  ;;  %v866_v21 = vadd.f32 %v802_v6, %v634_v14 }
 0x137   : > { %v1328_v23 = vadd.f32 %v1264_v36, %v1096_v12  ;;  %v1258_v19 = vmul.f32 %v6456_v46, %v6517_v40  ;;  %v1266_v9 = vmul.f32 %v6456_v46, %v6515_v42  ;;  %v623_v39 = vmul.f32 %v6462_v61, %v6508_v13  ;;  %3783 = vmatmul.mubr.msk.bf16.gmra.mrb[8].mxu0 %vm1615_vm0, %v5495_v54 }
 0x138   : > { %v1537_v52 = vpack.c.bf16 %v1497_v3, %v1489_v53  ;;  %v1432_v58 = vadd.f32 %v5361_v50, %v1320_v59  ;;  %v1090_v11 = vadd.f32 %v1026_v28, %v858_v22  ;;  %v1098_v51 = vadd.f32 %v1034_v18, %v866_v21  ;;  %3787 = vmatmul.mubr.msk.bf16.gmra.mrb[8].mxu1 %vm1615_vm0, %v5495_v54 }
 0x139   : > { %v1440_v1 = vadd.f32 %v5382_v43, %v1328_v23  ;;  %v631_v38 = vmul.f32 %v6462_v61, %v6509_v0  ;;  %v791_v55 = vmul.f32 %v6498_v35, %v6510_v56  ;;  %v799_v5 = vmul.f32 %v6498_v35, %v6512_v34  ;;  %1690 = vmatprep.mubr.bf16.mxu0 %v6503_v31 }
 0x13a   : > { %1852 = vmatpush1.bf16.msra.mxu1 %v1537_v52  ;;  %v1504_v46 = vmax.f32 %v1432_v58, 0.0  ;;  %v1322_v20 = vadd.f32 %v1258_v19, %v1090_v11  ;;  %v1023_v26 = vmul.f32 %v6500_v7, %v6513_v44  ;;  %v1330_v24 = vadd.f32 %v1266_v9, %v1098_v51  ;;  %1763 = vmatprep.mubr.bf16.mxu1 %v6503_v31 }
 0x13b   : > { %v1512_v10 = vmax.f32 %v1440_v1, 0.0  ;;  %v855_v61 = vadd.f32 %v791_v55, %v623_v39  ;;  %v1031_v8 = vmul.f32 %v6500_v7, %v6514_v41  ;;  %v863_v2 = vadd.f32 %v799_v5, %v631_v38 }
 0x13c   : > { %v1434_v33 = vadd.f32 %v5361_v50, %v1322_v20  ;;  %v1255_v63 = vmul.f32 %v6466_v32, %v6517_v40  ;;  %v1263_v35 = vmul.f32 %v6466_v32, %v6515_v42  ;;  %v1442_v36 = vadd.f32 %v5382_v43, %v1330_v24 }
 0x13d   : > { %v1544_v29 = vpack.c.bf16 %v1512_v10, %v1504_v46  ;;  %v1087_v57 = vadd.f32 %v1023_v26, %v855_v61  ;;  %v625_v7 = vmul.f32 %v6419_v37, %v6508_v13  ;;  %v1095_v45 = vadd.f32 %v1031_v8, %v863_v2 }
 0x13e   : > { %v1506_v27 = vmax.f32 %v1434_v33, 0.0  ;;  %v633_v16 = vmul.f32 %v6419_v37, %v6509_v0  ;;  %v793_v49 = vmul.f32 %v6505_v62, %v6510_v56  ;;  %v1514_v32 = vmax.f32 %v1442_v36, 0.0 }
 0x13f   : > { %1780 = vmatprep.subr.bf16.mxu0 %v1544_v29  ;;  %v1319_v30 = vadd.f32 %v1255_v63, %v1087_v57  ;;  %v801_v14 = vmul.f32 %v6505_v62, %v6512_v34  ;;  %v1025_v17 = vmul.f32 %v6471_v25, %v6513_v44  ;;  %v1327_v53 = vadd.f32 %v1263_v35, %v1095_v45 }
 0x140   : > { %v857_v12 = vadd.f32 %v793_v49, %v625_v7  ;;  %v1033_v13 = vmul.f32 %v6471_v25, %v6514_v41  ;;  %3784 = vmatmul.mubr.msk.bf16.gmra.mrb[12].mxu0 %vm1615_vm0, %v3955_v60  ;;  %v1546_v37 = vpack.c.bf16 %v1514_v32, %v1506_v27  ;;  %v1265_v6 = vmul.f32 %v6472_v15, %v6515_v42 }
 0x141   : > { %v1431_v0 = vadd.f32 %v5361_v50, %v1319_v30  ;;  %v865_v56 = vadd.f32 %v801_v14, %v633_v16  ;;  %3788 = vmatmul.mubr.msk.bf16.gmra.mrb[12].mxu1 %vm1615_vm0, %v3955_v60  ;;  %v1439_v62 = vadd.f32 %v5382_v43, %v1327_v53  ;;  %v1257_v44 = vmul.f32 %v6472_v15, %v6517_v40  ;;  %v5585_v15 = vpop.permute.xlu1 %1562 }
 0x142   : > { %v1089_v34 = vadd.f32 %v1025_v17, %v857_v12  ;;  %1806 = vmatprep.mubr.bf16.mxu0 %v6503_v31  ;;  %1879 = vmatprep.mubr.bf16.mxu1 %v6503_v31 }
 0x143   : > { %1853 = vmatprep.subr.bf16.mxu1 %v1546_v37  ;;  %v1097_v25 = vadd.f32 %v1033_v13, %v865_v56  ;;  %v1503_v41 = vmax.f32 %v1431_v0, 0.0  ;;  %v1511_v28 = vmax.f32 %v1439_v62, 0.0 }
 0x144   : > { %v1321_v3 = vadd.f32 %v1257_v44, %v1089_v34 }
 0x145   : > { %v1329_v4 = vadd.f32 %v1265_v6, %v1097_v25  ;;  %v1543_v59 = vpack.c.bf16 %v1511_v28, %v1503_v41  ;;  %v5597_v63 = vpop.permute.xlu1 %1572 }
 0x146   : > { %v1433_v42 = vadd.f32 %v5361_v50, %v1321_v3  ;;  %v5583_v50 = vpop.permute.xlu0 %1557 }
 0x147   : > { %v1441_v22 = vadd.f32 %v5382_v43, %v1329_v4  ;;  %1781 = vmatpush1.bf16.msra.mxu0 %v1543_v59 }
 0x148   : > { %v1505_v18 = vmax.f32 %v1433_v42, 0.0 }
 0x149   : > { %v1513_v23 = vmax.f32 %v1441_v22, 0.0  ;;  %v5609_v22 = vpop.permute.xlu1 %1582 }
 0x14a   : > { %3789 = vmatmul.mubr.msk.bf16.vlgmr.msra.gmra.mrb[16].mxu0 %vm1615_vm0, %v5403_v47  ;;  %v5595_v2 = vpop.permute.xlu0 %1567 }
 0x14b   : > { %v1545_v21 = vpack.c.bf16 %v1513_v23, %v1505_v18  ;;  %1816 = vmatprep.mubr.bf16.mxu0 %v6503_v31 }
 0x14d   : > { %1854 = vmatpush1.bf16.msra.mxu1 %v1545_v21 }
 0x14e   : > { %v5607_v4 = vpop.permute.xlu0 %1577 }
 0x150   : > { %3793 = vmatmul.mubr.msk.bf16.vlgmr.msra.gmra.mrb[16].mxu1 %vm1615_vm0, %v5403_v47 }
 0x151   : > { %1889 = vmatprep.mubr.bf16.mxu1 %v6503_v31 }
 0x152   : > { %3790 = vmatmul.mubr.msk.bf16.gmra.mrb[20].mxu0 %vm1615_vm0, %v5447_v48 }
 0x153   : > { %1826 = vmatprep.mubr.bf16.mxu0 %v6503_v31 }
 0x158   : > { %3794 = vmatmul.mubr.msk.bf16.gmra.mrb[20].mxu1 %vm1615_vm0, %v5447_v48 }
 0x159   : > { %1899 = vmatprep.mubr.bf16.mxu1 %v6503_v31 }
 0x15a   : > { %3791 = vmatmul.mubr.msk.bf16.gmra.mrb[24].mxu0 %vm1615_vm0, %v5495_v54 }
 0x15b   : > { %1836 = vmatprep.mubr.bf16.mxu0 %v6503_v31 }
 0x160   : > { %3795 = vmatmul.mubr.msk.bf16.gmra.mrb[24].mxu1 %vm1615_vm0, %v5495_v54 }
 0x161   : > { %1909 = vmatprep.mubr.bf16.mxu1 %v6503_v31 }
 0x162   : > { %3792 = vmatmul.mubr.msk.bf16.gmra.mrb[28].mxu0 %vm1615_vm0, %v3955_v60 }
 0x163   : > { %2136 = vmatprep.mubr.bf16.mxu0 %v6503_v31 }
 0x168   : > { %3796 = vmatmul.mubr.msk.bf16.gmra.mrb[28].mxu1 %vm1615_vm0, %v3955_v60 }
 0x169   : > { %2209 = vmatprep.mubr.bf16.mxu1 %v6503_v31 }
 0x1fa   : > { %v1662_v43 = vpop.f32.mrb[0].mxu0  ;;  %v1735_v47 = vpop.f32.mrb[0].mxu1 }
 0x1fb   : > { %v1663_v48 = vadd.f32 %v1662_v43, %v5583_v50  ;;  %v1736_v54 = vadd.f32 %v1735_v47, %v5583_v50  ;;  %v1664_v40 = vpop.f32.mrb[1].mxu0  ;;  %v1737_v19 = vpop.f32.mrb[1].mxu1 }
 0x1fc   : > { %v1665_v9 = vadd.f32 %v1664_v40, %v5583_v50  ;;  %v1738_v52 = vadd.f32 %v1737_v19, %v5583_v50  ;;  %v1666_v58 = vpop.f32.mrb[2].mxu0  ;;  %v1739_v11 = vpop.f32.mrb[2].mxu1 }
 0x1fd   : > { %v1667_v39 = vadd.f32 %v1666_v58, %v5585_v15  ;;  %v1740_v1 = vadd.f32 %v1739_v11, %v5585_v15  ;;  %v1668_v51 = vpop.f32.mrb[3].mxu0  ;;  %v1741_v38 = vpop.f32.mrb[3].mxu1  ;;  %v1928_v20 = vmax.f32 %v1663_v48, 0.0  ;;  %v1930_v5 = vmax.f32 %v1736_v54, 0.0 }
 0x1fe   : > { %v1669_v55 = vadd.f32 %v1668_v51, %v5585_v15  ;;  %v1742_v46 = vadd.f32 %v1741_v38, %v5585_v15  ;;  %v1929_v24 = vmax.f32 %v1665_v9, 0.0  ;;  %v1931_v61 = vmax.f32 %v1738_v52, 0.0 }
 0x1ff   : > { %v1936_v26 = vmax.f32 %v1667_v39, 0.0  ;;  %v1938_v10 = vmax.f32 %v1740_v1, 0.0 }
 0x200   : > { %v1937_v8 = vmax.f32 %v1669_v55, 0.0  ;;  %v1939_v33 = vmax.f32 %v1742_v46, 0.0 }
 0x201   : > { %v1992_v35 = vpack.c.bf16 %v1936_v26, %v1928_v20  ;;  %v1994_v60 = vpack.c.bf16 %v1938_v10, %v1930_v5 }
 0x202   : > { %v1993_v29 = vpack.c.bf16 %v1937_v8, %v1929_v24  ;;  %v1995_v36 = vpack.c.bf16 %v1939_v33, %v1931_v61  ;;  %v1672_v57 = vpop.f32.mrb[4].mxu0  ;;  %v1745_v7 = vpop.f32.mrb[4].mxu1 }
 0x203   : > { %v1673_v27 = vadd.f32 %v1672_v57, %v5595_v2  ;;  %v1746_v45 = vadd.f32 %v1745_v7, %v5595_v2  ;;  %v1674_v16 = vpop.f32.mrb[5].mxu0  ;;  %v1747_v49 = vpop.f32.mrb[5].mxu1 }
 0x204   : > { %v1675_v32 = vadd.f32 %v1674_v16, %v5595_v2  ;;  %v1748_v30 = vadd.f32 %v1747_v49, %v5595_v2  ;;  %v1676_v14 = vpop.f32.mrb[6].mxu0  ;;  %v1749_v17 = vpop.f32.mrb[6].mxu1  ;;  %2104 = vmatprep.subr.bf16.mxu0 %v1993_v29  ;;  %2177 = vmatprep.subr.bf16.mxu1 %v1995_v36 }
 0x205   : > { %v1677_v53 = vadd.f32 %v1676_v14, %v5597_v63  ;;  %v1750_v12 = vadd.f32 %v1749_v17, %v5597_v63  ;;  %v1678_v13 = vpop.f32.mrb[7].mxu0  ;;  %v1751_v37 = vpop.f32.mrb[7].mxu1  ;;  %2105 = vmatpush1.bf16.msra.mxu0 %v1992_v35  ;;  %2178 = vmatpush1.bf16.msra.mxu1 %v1994_v60  ;;  %v1944_v6 = vmax.f32 %v1673_v27, 0.0  ;;  %v1946_v62 = vmax.f32 %v1746_v45, 0.0 }
 0x206   : > { %v1679_v0 = vadd.f32 %v1678_v13, %v5597_v63  ;;  %v1752_v56 = vadd.f32 %v1751_v37, %v5597_v63  ;;  %v1945_v25 = vmax.f32 %v1675_v32, 0.0  ;;  %v1947_v41 = vmax.f32 %v1748_v30, 0.0  ;;  %v5619_v61 = vpop.permute.xlu0 %1587  ;;  %v5621_v60 = vpop.permute.xlu1 %1592 }
 0x207   : > { %v1952_v34 = vmax.f32 %v1677_v53, 0.0  ;;  %v1954_v44 = vmax.f32 %v1750_v12, 0.0 }
 0x208   : > { %v1953_v28 = vmax.f32 %v1679_v0, 0.0  ;;  %v1955_v3 = vmax.f32 %v1752_v56, 0.0 }
 0x209   : > { %v2000_v59 = vpack.c.bf16 %v1952_v34, %v1944_v6  ;;  %v2002_v42 = vpack.c.bf16 %v1954_v44, %v1946_v62 }
 0x20a   : > { %v2001_v18 = vpack.c.bf16 %v1953_v28, %v1945_v25  ;;  %v2003_v23 = vpack.c.bf16 %v1955_v3, %v1947_v41  ;;  %v1682_v21 = vpop.f32.mrb[8].mxu0 }
 0x20b   : > { %v1683_v43 = vadd.f32 %v1682_v21, %v5607_v4  ;;  %v1755_v47 = vpop.f32.mrb[8].mxu1  ;;  %v1684_v48 = vpop.f32.mrb[9].mxu0 }
 0x20c   : > { %v1756_v54 = vadd.f32 %v1755_v47, %v5607_v4  ;;  %v1685_v40 = vadd.f32 %v1684_v48, %v5607_v4  ;;  %v1757_v19 = vpop.f32.mrb[9].mxu1  ;;  %v1686_v9 = vpop.f32.mrb[10].mxu0  ;;  %2106 = vmatprep.subr.bf16.mxu0 %v2001_v18  ;;  %2179 = vmatprep.subr.bf16.mxu1 %v2003_v23 }
 0x20d   : > { %v1758_v52 = vadd.f32 %v1757_v19, %v5607_v4  ;;  %v1687_v58 = vadd.f32 %v1686_v9, %v5609_v22  ;;  %v1759_v11 = vpop.f32.mrb[10].mxu1  ;;  %v1688_v39 = vpop.f32.mrb[11].mxu0  ;;  %2107 = vmatpush1.bf16.msra.mxu0 %v2000_v59  ;;  %2180 = vmatpush1.bf16.msra.mxu1 %v2002_v42  ;;  %v1960_v55 = vmax.f32 %v1683_v43, 0.0  ;;  %v5634_v43 = vld [vmem:[%s6174_s5] sm:$0xff]  }
 0x20e   : > { %v1760_v1 = vadd.f32 %v1759_v11, %v5609_v22  ;;  %v1689_v51 = vadd.f32 %v1688_v39, %v5609_v22  ;;  %v1761_v38 = vpop.f32.mrb[11].mxu1  ;;  %v1962_v5 = vmax.f32 %v1756_v54, 0.0  ;;  %v1961_v26 = vmax.f32 %v1685_v40, 0.0 }
 0x20f   : > { %v1968_v46 = vmax.f32 %v1687_v58, 0.0  ;;  %v1762_v20 = vadd.f32 %v1761_v38, %v5609_v22  ;;  %v1963_v8 = vmax.f32 %v1758_v52, 0.0 }
 0x210   : > { %v1970_v10 = vmax.f32 %v1760_v1, 0.0  ;;  %v1969_v24 = vmax.f32 %v1689_v51, 0.0 }
 0x211   : > { %v2008_v33 = vpack.c.bf16 %v1968_v46, %v1960_v55  ;;  %v1971_v35 = vmax.f32 %v1762_v20, 0.0 }
 0x212   : > { %v2010_v29 = vpack.c.bf16 %v1970_v10, %v1962_v5  ;;  %v2009_v36 = vpack.c.bf16 %v1969_v24, %v1961_v26 }
 0x213   : > { %v1692_v57 = vpop.f32.mrb[12].mxu0  ;;  %v2011_v7 = vpack.c.bf16 %v1971_v35, %v1963_v8  ;;  %v5652_v35 = vld [vmem:[%s6174_s5 + $0x8] sm:$0xff]  }
 0x214   : > { %v1693_v27 = vadd.f32 %v1692_v57, %v5619_v61  ;;  %v1765_v45 = vpop.f32.mrb[12].mxu1  ;;  %v1694_v16 = vpop.f32.mrb[13].mxu0  ;;  %2108 = vmatprep.subr.bf16.mxu0 %v2009_v36 }
 0x215   : > { %v1766_v49 = vadd.f32 %v1765_v45, %v5619_v61  ;;  %v1695_v32 = vadd.f32 %v1694_v16, %v5619_v61  ;;  %v1767_v30 = vpop.f32.mrb[13].mxu1  ;;  %v1696_v14 = vpop.f32.mrb[14].mxu0  ;;  %2181 = vmatprep.subr.bf16.mxu1 %v2011_v7  ;;  %2109 = vmatpush1.bf16.msra.mxu0 %v2008_v33 }
 0x216   : > { %v1768_v17 = vadd.f32 %v1767_v30, %v5619_v61  ;;  %v1697_v53 = vadd.f32 %v1696_v14, %v5621_v60  ;;  %v1769_v12 = vpop.f32.mrb[14].mxu1  ;;  %v1698_v13 = vpop.f32.mrb[15].mxu0  ;;  %2182 = vmatpush1.bf16.msra.mxu1 %v2010_v29  ;;  %v1976_v6 = vmax.f32 %v1693_v27, 0.0 }
 0x217   : > { %v1770_v37 = vadd.f32 %v1769_v12, %v5621_v60  ;;  %v1699_v0 = vadd.f32 %v1698_v13, %v5621_v60  ;;  %v1771_v56 = vpop.f32.mrb[15].mxu1  ;;  %v1978_v44 = vmax.f32 %v1766_v49, 0.0  ;;  %v1977_v25 = vmax.f32 %v1695_v32, 0.0 }
 0x218   : > { %v1984_v62 = vmax.f32 %v1697_v53, 0.0  ;;  %v1772_v34 = vadd.f32 %v1771_v56, %v5621_v60  ;;  %v1979_v3 = vmax.f32 %v1768_v17, 0.0 }
 0x219   : > { %v1986_v41 = vmax.f32 %v1770_v37, 0.0  ;;  %v1985_v28 = vmax.f32 %v1699_v0, 0.0 }
 0x21a   : > { %v2016_v59 = vpack.c.bf16 %v1984_v62, %v1976_v6  ;;  %v1987_v42 = vmax.f32 %v1772_v34, 0.0 }
 0x21b   : > { %v2018_v18 = vpack.c.bf16 %v1986_v41, %v1978_v44  ;;  %v2017_v23 = vpack.c.bf16 %v1985_v28, %v1977_v25 }
 0x21c   : > { %v2019_v21 = vpack.c.bf16 %v1987_v42, %v1979_v3 }
 0x21d   : > { %2110 = vmatprep.subr.bf16.mxu0 %v2017_v23  ;;  %v1808_v47 = vpop.f32.mrb[16].mxu0 }
 0x21e   : > { %2183 = vmatprep.subr.bf16.mxu1 %v2019_v21  ;;  %2111 = vmatpush1.bf16.msra.mxu0 %v2016_v59  ;;  %v1809_v48 = vadd.f32 %v1808_v47, %v5583_v50  ;;  %v1810_v54 = vpop.f32.mrb[17].mxu0  ;;  %v5671_v59 = vld [vmem:[%s6174_s5 + $0x10] sm:$0xff]  }
 0x21f   : > { %2184 = vmatpush1.bf16.msra.mxu1 %v2018_v18  ;;  %v1811_v40 = vadd.f32 %v1810_v54, %v5583_v50  ;;  %v1812_v19 = vpop.f32.mrb[18].mxu0 }
 0x220   : > { %v1813_v9 = vadd.f32 %v1812_v19, %v5585_v15  ;;  %v1814_v52 = vpop.f32.mrb[19].mxu0  ;;  %v1932_v11 = vmax.f32 %v1809_v48, 0.0 }
 0x221   : > { %3801 = vmatmul.mubr.msk.bf16.vlgmr.msra.gmra.mrb[32].mxu0 %vm1615_vm0, %v5634_v43  ;;  %v1815_v58 = vadd.f32 %v1814_v52, %v5585_v15  ;;  %v1933_v38 = vmax.f32 %v1811_v40, 0.0 }
 0x222   : > { %3805 = vmatmul.mubr.msk.bf16.vlgmr.msra.gmra.mrb[32].mxu1 %vm1615_vm0, %v5634_v43  ;;  %2146 = vmatprep.mubr.bf16.mxu0 %v6503_v31  ;;  %v1940_v1 = vmax.f32 %v1813_v9, 0.0 }
 0x223   : > { %v1881_v39 = vpop.f32.mrb[16].mxu1  ;;  %2219 = vmatprep.mubr.bf16.mxu1 %v6503_v31  ;;  %v1941_v46 = vmax.f32 %v1815_v58, 0.0 }
 0x224   : > { %v1882_v51 = vadd.f32 %v1881_v39, %v5583_v50  ;;  %v1883_v55 = vpop.f32.mrb[17].mxu1  ;;  %v1996_v5 = vpack.c.bf16 %v1940_v1, %v1932_v11 }
 0x225   : > { %v1884_v20 = vadd.f32 %v1883_v55, %v5583_v50  ;;  %v1885_v26 = vpop.f32.mrb[18].mxu1  ;;  %v1997_v24 = vpack.c.bf16 %v1941_v46, %v1933_v38  ;;  %v1818_v33 = vpop.f32.mrb[20].mxu0 }
 0x226   : > { %v1886_v10 = vadd.f32 %v1885_v26, %v5585_v15  ;;  %v1887_v8 = vpop.f32.mrb[19].mxu1  ;;  %v1819_v36 = vadd.f32 %v1818_v33, %v5595_v2  ;;  %v1820_v57 = vpop.f32.mrb[21].mxu0  ;;  %v1934_v7 = vmax.f32 %v1882_v51, 0.0 }
 0x227   : > { %v1888_v29 = vadd.f32 %v1887_v8, %v5585_v15  ;;  %v1821_v50 = vadd.f32 %v1820_v57, %v5595_v2  ;;  %v1822_v45 = vpop.f32.mrb[22].mxu0  ;;  %2250 = vmatprep.subr.bf16.mxu0 %v1997_v24  ;;  %v1935_v16 = vmax.f32 %v1884_v20, 0.0 }
 0x228   : > { %v1942_v27 = vmax.f32 %v1886_v10, 0.0  ;;  %v1823_v32 = vadd.f32 %v1822_v45, %v5597_v63  ;;  %v1824_v30 = vpop.f32.mrb[23].mxu0  ;;  %2251 = vmatpush1.bf16.msra.mxu0 %v1996_v5  ;;  %v1948_v53 = vmax.f32 %v1819_v36, 0.0 }
 0x229   : > { %v1943_v49 = vmax.f32 %v1888_v29, 0.0  ;;  %v1825_v17 = vadd.f32 %v1824_v30, %v5597_v63  ;;  %3802 = vmatmul.mubr.msk.bf16.gmra.mrb[36].mxu0 %vm1615_vm0, %v5652_v35  ;;  %v1949_v0 = vmax.f32 %v1821_v50, 0.0  ;;  %v3959_v29 = vld [vmem:[%s6174_s5 + $0x18] sm:$0xff]  }
 0x22a   : > { %v1998_v14 = vpack.c.bf16 %v1942_v27, %v1934_v7  ;;  %3806 = vmatmul.mubr.msk.bf16.gmra.mrb[36].mxu1 %vm1615_vm0, %v5652_v35  ;;  %v1956_v13 = vmax.f32 %v1823_v32, 0.0  ;;  %2156 = vmatprep.mubr.bf16.mxu0 %v6503_v31 }
 0x22b   : > { %v1999_v15 = vpack.c.bf16 %v1943_v49, %v1935_v16  ;;  %v1891_v12 = vpop.f32.mrb[20].mxu1  ;;  %2229 = vmatprep.mubr.bf16.mxu1 %v6503_v31  ;;  %v1957_v6 = vmax.f32 %v1825_v17, 0.0 }
 0x22c   : > { %v1892_v37 = vadd.f32 %v1891_v12, %v5595_v2  ;;  %v1893_v56 = vpop.f32.mrb[21].mxu1  ;;  %v2004_v34 = vpack.c.bf16 %v1956_v13, %v1948_v53 }
 0x22d   : > { %v1894_v62 = vadd.f32 %v1893_v56, %v5595_v2  ;;  %v1895_v44 = vpop.f32.mrb[22].mxu1  ;;  %2323 = vmatprep.subr.bf16.mxu1 %v1999_v15  ;;  %v2005_v41 = vpack.c.bf16 %v1957_v6, %v1949_v0  ;;  %v1828_v3 = vpop.f32.mrb[24].mxu0 }
 0x22e   : > { %v1896_v25 = vadd.f32 %v1895_v44, %v5597_v63  ;;  %v1897_v28 = vpop.f32.mrb[23].mxu1  ;;  %2324 = vmatpush1.bf16.msra.mxu1 %v1998_v14  ;;  %v1829_v18 = vadd.f32 %v1828_v3, %v5607_v4  ;;  %v1830_v23 = vpop.f32.mrb[25].mxu0  ;;  %v1950_v2 = vmax.f32 %v1892_v37, 0.0 }
 0x22f   : > { %v1898_v42 = vadd.f32 %v1897_v28, %v5597_v63  ;;  %v1831_v47 = vadd.f32 %v1830_v23, %v5607_v4  ;;  %v1832_v48 = vpop.f32.mrb[26].mxu0  ;;  %2252 = vmatprep.subr.bf16.mxu0 %v2005_v41  ;;  %v1951_v54 = vmax.f32 %v1894_v62, 0.0 }
 0x230   : > { %v1958_v21 = vmax.f32 %v1896_v25, 0.0  ;;  %v1833_v19 = vadd.f32 %v1832_v48, %v5609_v22  ;;  %v1834_v9 = vpop.f32.mrb[27].mxu0  ;;  %2253 = vmatpush1.bf16.msra.mxu0 %v2004_v34  ;;  %v1964_v11 = vmax.f32 %v1829_v18, 0.0 }
 0x231   : > { %v1959_v40 = vmax.f32 %v1898_v42, 0.0  ;;  %v1835_v58 = vadd.f32 %v1834_v9, %v5609_v22  ;;  %3803 = vmatmul.mubr.msk.bf16.gmra.mrb[40].mxu0 %vm1615_vm0, %v5671_v59  ;;  %v1965_v38 = vmax.f32 %v1831_v47, 0.0 }
 0x232   : > { %v2006_v52 = vpack.c.bf16 %v1958_v21, %v1950_v2  ;;  %3807 = vmatmul.mubr.msk.bf16.gmra.mrb[40].mxu1 %vm1615_vm0, %v5671_v59  ;;  %v1972_v1 = vmax.f32 %v1833_v19, 0.0  ;;  %2166 = vmatprep.mubr.bf16.mxu0 %v6503_v31 }
 0x233   : > { %v2007_v63 = vpack.c.bf16 %v1959_v40, %v1951_v54  ;;  %v1901_v39 = vpop.f32.mrb[24].mxu1  ;;  %2239 = vmatprep.mubr.bf16.mxu1 %v6503_v31  ;;  %v1973_v46 = vmax.f32 %v1835_v58, 0.0 }
 0x234   : > { %v1902_v51 = vadd.f32 %v1901_v39, %v5607_v4  ;;  %v1903_v55 = vpop.f32.mrb[25].mxu1  ;;  %v2012_v5 = vpack.c.bf16 %v1972_v1, %v1964_v11 }
 0x235   : > { %v1904_v20 = vadd.f32 %v1903_v55, %v5607_v4  ;;  %v1905_v26 = vpop.f32.mrb[26].mxu1  ;;  %2325 = vmatprep.subr.bf16.mxu1 %v2007_v63  ;;  %v2013_v24 = vpack.c.bf16 %v1973_v46, %v1965_v38  ;;  %v1838_v33 = vpop.f32.mrb[28].mxu0 }
 0x236   : > { %v1906_v10 = vadd.f32 %v1905_v26, %v5609_v22  ;;  %v1907_v8 = vpop.f32.mrb[27].mxu1  ;;  %2326 = vmatpush1.bf16.msra.mxu1 %v2006_v52  ;;  %v1839_v57 = vadd.f32 %v1838_v33, %v5619_v61  ;;  %v1840_v7 = vpop.f32.mrb[29].mxu0  ;;  %v1966_v27 = vmax.f32 %v1902_v51, 0.0 }
 0x237   : > { %v1908_v36 = vadd.f32 %v1907_v8, %v5609_v22  ;;  %v1841_v50 = vadd.f32 %v1840_v7, %v5619_v61  ;;  %v1842_v45 = vpop.f32.mrb[30].mxu0  ;;  %2254 = vmatprep.subr.bf16.mxu0 %v2013_v24  ;;  %v1967_v16 = vmax.f32 %v1904_v20, 0.0 }
 0x238   : > { %v1974_v4 = vmax.f32 %v1906_v10, 0.0  ;;  %v1843_v32 = vadd.f32 %v1842_v45, %v5621_v60  ;;  %v1844_v30 = vpop.f32.mrb[31].mxu0  ;;  %2255 = vmatpush1.bf16.msra.mxu0 %v2012_v5  ;;  %v1980_v15 = vmax.f32 %v1839_v57, 0.0 }
 0x239   : > { %v1975_v49 = vmax.f32 %v1908_v36, 0.0  ;;  %v1845_v17 = vadd.f32 %v1844_v30, %v5621_v60  ;;  %3804 = vmatmul.mubr.msk.bf16.gmra.mrb[44].mxu0 %vm1615_vm0, %v3959_v29  ;;  %v1981_v37 = vmax.f32 %v1841_v50, 0.0 }
 0x23a   : > { %v2014_v14 = vpack.c.bf16 %v1974_v4, %v1966_v27  ;;  %3808 = vmatmul.mubr.msk.bf16.gmra.mrb[44].mxu1 %vm1615_vm0, %v3959_v29  ;;  %v1988_v12 = vmax.f32 %v1843_v32, 0.0  ;;  %2282 = vmatprep.mubr.bf16.mxu0 %v6503_v31 }
 0x23b   : > { %v2015_v22 = vpack.c.bf16 %v1975_v49, %v1967_v16  ;;  %v1911_v53 = vpop.f32.mrb[28].mxu1  ;;  %2355 = vmatprep.mubr.bf16.mxu1 %v6503_v31  ;;  %v1989_v56 = vmax.f32 %v1845_v17, 0.0 }
 0x23c   : > { %v1912_v13 = vadd.f32 %v1911_v53, %v5619_v61  ;;  %v1913_v0 = vpop.f32.mrb[29].mxu1  ;;  %v2020_v62 = vpack.c.bf16 %v1988_v12, %v1980_v15 }
 0x23d   : > { %v1914_v6 = vadd.f32 %v1913_v0, %v5619_v61  ;;  %v1915_v34 = vpop.f32.mrb[30].mxu1  ;;  %2327 = vmatprep.subr.bf16.mxu1 %v2015_v22  ;;  %v2021_v25 = vpack.c.bf16 %v1989_v56, %v1981_v37  ;;  %v5725_v61 = vpop.permute.xlu0 %2034 }
 0x23e   : > { %v1916_v44 = vadd.f32 %v1915_v34, %v5621_v60  ;;  %v1917_v41 = vpop.f32.mrb[31].mxu1  ;;  %2328 = vmatpush1.bf16.msra.mxu1 %v2014_v14  ;;  %v1982_v3 = vmax.f32 %v1912_v13, 0.0 }
 0x23f   : > { %v1918_v28 = vadd.f32 %v1917_v41, %v5621_v60  ;;  %2256 = vmatprep.subr.bf16.mxu0 %v2021_v25  ;;  %v1983_v18 = vmax.f32 %v1914_v6, 0.0  ;;  %v5727_v60 = vpop.permute.xlu1 %2039 }
 0x240   : > { %v1990_v42 = vmax.f32 %v1916_v44, 0.0  ;;  %2257 = vmatpush1.bf16.msra.mxu0 %v2020_v62 }
 0x241   : > { %v1991_v23 = vmax.f32 %v1918_v28, 0.0  ;;  %v5737_v33 = vpop.permute.xlu0 %2044 }
 0x242   : > { %v2022_v2 = vpack.c.bf16 %v1990_v42, %v1982_v3 }
 0x243   : > { %v2023_v21 = vpack.c.bf16 %v1991_v23, %v1983_v18  ;;  %3809 = vmatmul.mubr.msk.bf16.vlgmr.msra.gmra.mrb[48].mxu0 %vm1615_vm0, %v5634_v43 }
 0x244   : > { %2292 = vmatprep.mubr.bf16.mxu0 %v6503_v31 }
 0x245   : > { %2329 = vmatprep.subr.bf16.mxu1 %v2023_v21  ;;  %v5749_v28 = vpop.permute.xlu0 %2054 }
 0x246   : > { %2330 = vmatpush1.bf16.msra.mxu1 %v2022_v2 }
 0x249   : > { %3813 = vmatmul.mubr.msk.bf16.vlgmr.msra.gmra.mrb[48].mxu1 %vm1615_vm0, %v5634_v43 }
 0x24a   : > { %2365 = vmatprep.mubr.bf16.mxu1 %v6503_v31 }
 0x24b   : > { %3810 = vmatmul.mubr.msk.bf16.gmra.mrb[52].mxu0 %vm1615_vm0, %v5652_v35 }
 0x24c   : > { %2302 = vmatprep.mubr.bf16.mxu0 %v6503_v31 }
 0x251   : > { %3814 = vmatmul.mubr.msk.bf16.gmra.mrb[52].mxu1 %vm1615_vm0, %v5652_v35 }
 0x252   : > { %2375 = vmatprep.mubr.bf16.mxu1 %v6503_v31 }
 0x253   : > { %3811 = vmatmul.mubr.msk.bf16.gmra.mrb[56].mxu0 %vm1615_vm0, %v5671_v59 }
 0x254   : > { %2312 = vmatprep.mubr.bf16.mxu0 %v6503_v31 }
 0x259   : > { %3815 = vmatmul.mubr.msk.bf16.gmra.mrb[56].mxu1 %vm1615_vm0, %v5671_v59 }
 0x25a   : > { %2385 = vmatprep.mubr.bf16.mxu1 %v6503_v31 }
 0x25b   : > { %3812 = vmatmul.mubr.msk.bf16.gmra.mrb[60].mxu0 %vm1615_vm0, %v3959_v29 }
 0x25c   : > { %2612 = vmatprep.mubr.bf16.mxu0 %v6503_v31 }
 0x261   : > { %3816 = vmatmul.mubr.msk.bf16.gmra.mrb[60].mxu1 %vm1615_vm0, %v3959_v29  ;;  %v5739_v29 = vpop.permute.xlu1 %2049 }
 0x262   : > { %2685 = vmatprep.mubr.bf16.mxu1 %v6503_v31 }
 0x265   : > { %v5751_v3 = vpop.permute.xlu1 %2059 }
 0x2f4   : > { %v2138_v43 = vpop.f32.mrb[32].mxu0 }
 0x2f5   : > { %v2139_v35 = vadd.f32 %v2138_v43, %v5725_v61  ;;  %v2211_v47 = vpop.f32.mrb[32].mxu1  ;;  %v2140_v48 = vpop.f32.mrb[33].mxu0 }
 0x2f6   : > { %v2212_v59 = vadd.f32 %v2211_v47, %v5725_v61  ;;  %v2141_v54 = vadd.f32 %v2140_v48, %v5725_v61  ;;  %v2213_v40 = vpop.f32.mrb[33].mxu1  ;;  %v2142_v19 = vpop.f32.mrb[34].mxu0 }
 0x2f7   : > { %v2214_v9 = vadd.f32 %v2213_v40, %v5725_v61  ;;  %v2143_v52 = vadd.f32 %v2142_v19, %v5727_v60  ;;  %v2215_v58 = vpop.f32.mrb[34].mxu1  ;;  %v2144_v63 = vpop.f32.mrb[35].mxu0  ;;  %v2404_v51 = vmax.f32 %v2139_v35, 0.0 }
 0x2f8   : > { %v2216_v11 = vadd.f32 %v2215_v58, %v5727_v60  ;;  %v2145_v39 = vadd.f32 %v2144_v63, %v5727_v60  ;;  %v2217_v1 = vpop.f32.mrb[35].mxu1  ;;  %v2406_v46 = vmax.f32 %v2212_v59, 0.0  ;;  %v2405_v20 = vmax.f32 %v2141_v54, 0.0 }
 0x2f9   : > { %v2412_v38 = vmax.f32 %v2143_v52, 0.0  ;;  %v2218_v55 = vadd.f32 %v2217_v1, %v5727_v60  ;;  %v2407_v10 = vmax.f32 %v2214_v9, 0.0 }
 0x2fa   : > { %v2414_v5 = vmax.f32 %v2216_v11, 0.0  ;;  %v2413_v26 = vmax.f32 %v2145_v39, 0.0 }
 0x2fb   : > { %v2468_v24 = vpack.c.bf16 %v2412_v38, %v2404_v51  ;;  %v2415_v8 = vmax.f32 %v2218_v55, 0.0 }
 0x2fc   : > { %v2470_v36 = vpack.c.bf16 %v2414_v5, %v2406_v46  ;;  %v2469_v57 = vpack.c.bf16 %v2413_v26, %v2405_v20  ;;  %v2148_v27 = vpop.f32.mrb[36].mxu0 }
 0x2fd   : > { %v2471_v7 = vpack.c.bf16 %v2415_v8, %v2407_v10  ;;  %v2221_v4 = vpop.f32.mrb[36].mxu1  ;;  %v2149_v50 = vadd.f32 %v2148_v27, %v5737_v33  ;;  %v2150_v16 = vpop.f32.mrb[37].mxu0 }
 0x2fe   : > { %v2222_v45 = vadd.f32 %v2221_v4, %v5737_v33  ;;  %v2223_v49 = vpop.f32.mrb[37].mxu1  ;;  %2580 = vmatprep.subr.bf16.mxu0 %v2469_v57  ;;  %v2151_v32 = vadd.f32 %v2150_v16, %v5737_v33  ;;  %v2152_v14 = vpop.f32.mrb[38].mxu0 }
 0x2ff   : > { %v2224_v30 = vadd.f32 %v2223_v49, %v5737_v33  ;;  %v2225_v17 = vpop.f32.mrb[38].mxu1  ;;  %2653 = vmatprep.subr.bf16.mxu1 %v2471_v7  ;;  %2581 = vmatpush1.bf16.msra.mxu0 %v2468_v24  ;;  %v2153_v22 = vadd.f32 %v2152_v14, %v5739_v29  ;;  %v2154_v53 = vpop.f32.mrb[39].mxu0  ;;  %v2420_v0 = vmax.f32 %v2149_v50, 0.0 }
 0x300   : > { %v2226_v15 = vadd.f32 %v2225_v17, %v5739_v29  ;;  %v2227_v12 = vpop.f32.mrb[39].mxu1  ;;  %2654 = vmatpush1.bf16.msra.mxu1 %v2470_v36  ;;  %v2155_v13 = vadd.f32 %v2154_v53, %v5739_v29  ;;  %v2422_v56 = vmax.f32 %v2222_v45, 0.0  ;;  %v2421_v34 = vmax.f32 %v2151_v32, 0.0  ;;  %v5761_v24 = vpop.permute.xlu0 %2064 }
 0x301   : > { %v2228_v37 = vadd.f32 %v2227_v12, %v5739_v29  ;;  %v2428_v6 = vmax.f32 %v2153_v22, 0.0  ;;  %v2423_v44 = vmax.f32 %v2224_v30, 0.0  ;;  %v5763_v8 = vpop.permute.xlu1 %2069 }
 0x302   : > { %v2430_v62 = vmax.f32 %v2226_v15, 0.0  ;;  %v2429_v25 = vmax.f32 %v2155_v13, 0.0 }
 0x303   : > { %v2431_v41 = vmax.f32 %v2228_v37, 0.0  ;;  %v2476_v42 = vpack.c.bf16 %v2428_v6, %v2420_v0 }
 0x304   : > { %v2478_v18 = vpack.c.bf16 %v2430_v62, %v2422_v56  ;;  %v2477_v23 = vpack.c.bf16 %v2429_v25, %v2421_v34  ;;  %v2158_v21 = vpop.f32.mrb[40].mxu0 }
 0x305   : > { %v2479_v2 = vpack.c.bf16 %v2431_v41, %v2423_v44  ;;  %v2231_v43 = vpop.f32.mrb[40].mxu1  ;;  %v2159_v35 = vadd.f32 %v2158_v21, %v5749_v28  ;;  %v2160_v48 = vpop.f32.mrb[41].mxu0 }
 0x306   : > { %v2232_v47 = vadd.f32 %v2231_v43, %v5749_v28  ;;  %v2233_v59 = vpop.f32.mrb[41].mxu1  ;;  %v2161_v54 = vadd.f32 %v2160_v48, %v5749_v28  ;;  %v2162_v19 = vpop.f32.mrb[42].mxu0  ;;  %2582 = vmatprep.subr.bf16.mxu0 %v2477_v23 }
 0x307   : > { %v2234_v40 = vadd.f32 %v2233_v59, %v5749_v28  ;;  %v2235_v9 = vpop.f32.mrb[42].mxu1  ;;  %2655 = vmatprep.subr.bf16.mxu1 %v2479_v2  ;;  %v2163_v52 = vadd.f32 %v2162_v19, %v5751_v3  ;;  %v2164_v63 = vpop.f32.mrb[43].mxu0  ;;  %2583 = vmatpush1.bf16.msra.mxu0 %v2476_v42  ;;  %v2436_v51 = vmax.f32 %v2159_v35, 0.0  ;;  %v5776_v35 = vld [vmem:[%s6176_s7] sm:$0xff]  }
 0x308   : > { %v2236_v58 = vadd.f32 %v2235_v9, %v5751_v3  ;;  %v2237_v11 = vpop.f32.mrb[43].mxu1  ;;  %2656 = vmatpush1.bf16.msra.mxu1 %v2478_v18  ;;  %v2165_v39 = vadd.f32 %v2164_v63, %v5751_v3  ;;  %v2438_v38 = vmax.f32 %v2232_v47, 0.0  ;;  %v2437_v20 = vmax.f32 %v2161_v54, 0.0 }
 0x309   : > { %v2238_v1 = vadd.f32 %v2237_v11, %v5751_v3  ;;  %v2444_v55 = vmax.f32 %v2163_v52, 0.0  ;;  %v2439_v5 = vmax.f32 %v2234_v40, 0.0 }
 0x30a   : > { %v2446_v46 = vmax.f32 %v2236_v58, 0.0  ;;  %v2445_v26 = vmax.f32 %v2165_v39, 0.0 }
 0x30b   : > { %v2447_v10 = vmax.f32 %v2238_v1, 0.0  ;;  %v2484_v36 = vpack.c.bf16 %v2444_v55, %v2436_v51 }
 0x30c   : > { %v2486_v57 = vpack.c.bf16 %v2446_v46, %v2438_v38  ;;  %v2485_v7 = vpack.c.bf16 %v2445_v26, %v2437_v20  ;;  %v2168_v4 = vpop.f32.mrb[44].mxu0 }
 0x30d   : > { %v2487_v27 = vpack.c.bf16 %v2447_v10, %v2439_v5  ;;  %v2241_v50 = vpop.f32.mrb[44].mxu1  ;;  %v2169_v45 = vadd.f32 %v2168_v4, %v5761_v24  ;;  %v2170_v49 = vpop.f32.mrb[45].mxu0 }
 0x30e   : > { %v2242_v16 = vadd.f32 %v2241_v50, %v5761_v24  ;;  %v2243_v32 = vpop.f32.mrb[45].mxu1  ;;  %v2171_v30 = vadd.f32 %v2170_v49, %v5761_v24  ;;  %v2172_v17 = vpop.f32.mrb[46].mxu0  ;;  %2584 = vmatprep.subr.bf16.mxu0 %v2485_v7 }
 0x30f   : > { %v2244_v14 = vadd.f32 %v2243_v32, %v5761_v24  ;;  %v2245_v22 = vpop.f32.mrb[46].mxu1  ;;  %2657 = vmatprep.subr.bf16.mxu1 %v2487_v27  ;;  %v2173_v15 = vadd.f32 %v2172_v17, %v5763_v8  ;;  %v2174_v12 = vpop.f32.mrb[47].mxu0  ;;  %2585 = vmatpush1.bf16.msra.mxu0 %v2484_v36  ;;  %v2452_v56 = vmax.f32 %v2169_v45, 0.0  ;;  %v5794_v36 = vld [vmem:[%s6176_s7 + $0x8] sm:$0xff]  }
 0x310   : > { %v2246_v53 = vadd.f32 %v2245_v22, %v5763_v8  ;;  %v2247_v13 = vpop.f32.mrb[47].mxu1  ;;  %2658 = vmatpush1.bf16.msra.mxu1 %v2486_v57  ;;  %v2175_v37 = vadd.f32 %v2174_v12, %v5763_v8  ;;  %v2454_v6 = vmax.f32 %v2242_v16, 0.0  ;;  %v2453_v44 = vmax.f32 %v2171_v30, 0.0 }
 0x311   : > { %v2248_v0 = vadd.f32 %v2247_v13, %v5763_v8  ;;  %v2460_v62 = vmax.f32 %v2173_v15, 0.0  ;;  %v2455_v25 = vmax.f32 %v2244_v14, 0.0 }
 0x312   : > { %v2462_v34 = vmax.f32 %v2246_v53, 0.0  ;;  %v2461_v41 = vmax.f32 %v2175_v37, 0.0 }
 0x313   : > { %v2463_v42 = vmax.f32 %v2248_v0, 0.0  ;;  %v2492_v18 = vpack.c.bf16 %v2460_v62, %v2452_v56 }
 0x314   : > { %v2494_v23 = vpack.c.bf16 %v2462_v34, %v2454_v6  ;;  %v2493_v2 = vpack.c.bf16 %v2461_v41, %v2453_v44 }
 0x315   : > { %v2495_v21 = vpack.c.bf16 %v2463_v42, %v2455_v25  ;;  %v5813_v42 = vld [vmem:[%s6176_s7 + $0x10] sm:$0xff]  }
 0x316   : > { %v2284_v43 = vpop.f32.mrb[48].mxu0  ;;  %2586 = vmatprep.subr.bf16.mxu0 %v2493_v2 }
 0x317   : > { %2659 = vmatprep.subr.bf16.mxu1 %v2495_v21  ;;  %v2285_v47 = vadd.f32 %v2284_v43, %v5725_v61  ;;  %v2286_v48 = vpop.f32.mrb[49].mxu0  ;;  %2587 = vmatpush1.bf16.msra.mxu0 %v2492_v18 }
 0x318   : > { %2660 = vmatpush1.bf16.msra.mxu1 %v2494_v23  ;;  %v2287_v59 = vadd.f32 %v2286_v48, %v5725_v61  ;;  %v2288_v54 = vpop.f32.mrb[50].mxu0 }
 0x319   : > { %v2289_v40 = vadd.f32 %v2288_v54, %v5727_v60  ;;  %v2290_v19 = vpop.f32.mrb[51].mxu0  ;;  %v2408_v52 = vmax.f32 %v2285_v47, 0.0 }
 0x31a   : > { %v2291_v9 = vadd.f32 %v2290_v19, %v5727_v60  ;;  %3821 = vmatmul.mubr.msk.bf16.vlgmr.msra.gmra.mrb[64].mxu0 %vm1615_vm0, %v5776_v35  ;;  %v2409_v39 = vmax.f32 %v2287_v59, 0.0 }
 0x31b   : > { %3825 = vmatmul.mubr.msk.bf16.vlgmr.msra.gmra.mrb[64].mxu1 %vm1615_vm0, %v5776_v35  ;;  %v2416_v63 = vmax.f32 %v2289_v40, 0.0  ;;  %2622 = vmatprep.mubr.bf16.mxu0 %v6503_v31 }
 0x31c   : > { %v2357_v58 = vpop.f32.mrb[48].mxu1  ;;  %2695 = vmatprep.mubr.bf16.mxu1 %v6503_v31  ;;  %v2417_v51 = vmax.f32 %v2291_v9, 0.0 }
 0x31d   : > { %v2358_v11 = vadd.f32 %v2357_v58, %v5725_v61  ;;  %v2359_v1 = vpop.f32.mrb[49].mxu1  ;;  %v2472_v55 = vpack.c.bf16 %v2416_v63, %v2408_v52 }
 0x31e   : > { %v2360_v38 = vadd.f32 %v2359_v1, %v5725_v61  ;;  %v2361_v46 = vpop.f32.mrb[50].mxu1  ;;  %v2473_v5 = vpack.c.bf16 %v2417_v51, %v2409_v39  ;;  %v2294_v10 = vpop.f32.mrb[52].mxu0 }
 0x31f   : > { %v2362_v20 = vadd.f32 %v2361_v46, %v5727_v60  ;;  %v2363_v26 = vpop.f32.mrb[51].mxu1  ;;  %v2295_v7 = vadd.f32 %v2294_v10, %v5737_v33  ;;  %v2296_v27 = vpop.f32.mrb[53].mxu0  ;;  %v2410_v4 = vmax.f32 %v2358_v11, 0.0 }
 0x320   : > { %v2364_v57 = vadd.f32 %v2363_v26, %v5727_v60  ;;  %v2297_v61 = vadd.f32 %v2296_v27, %v5737_v33  ;;  %v2298_v45 = vpop.f32.mrb[54].mxu0  ;;  %2726 = vmatprep.subr.bf16.mxu0 %v2473_v5  ;;  %v2411_v16 = vmax.f32 %v2360_v38, 0.0 }
 0x321   : > { %v2418_v50 = vmax.f32 %v2362_v20, 0.0  ;;  %v2299_v32 = vadd.f32 %v2298_v45, %v5739_v29  ;;  %v2300_v30 = vpop.f32.mrb[55].mxu0  ;;  %2727 = vmatpush1.bf16.msra.mxu0 %v2472_v55  ;;  %v2424_v22 = vmax.f32 %v2295_v7, 0.0 }
 0x322   : > { %v2419_v49 = vmax.f32 %v2364_v57, 0.0  ;;  %v2301_v17 = vadd.f32 %v2300_v30, %v5739_v29  ;;  %3822 = vmatmul.mubr.msk.bf16.gmra.mrb[68].mxu0 %vm1615_vm0, %v5794_v36  ;;  %v2425_v13 = vmax.f32 %v2297_v61, 0.0  ;;  %v3963_v57 = vld [vmem:[%s6176_s7 + $0x18] sm:$0xff]  }
 0x323   : > { %v2474_v14 = vpack.c.bf16 %v2418_v50, %v2410_v4  ;;  %3826 = vmatmul.mubr.msk.bf16.gmra.mrb[68].mxu1 %vm1615_vm0, %v5794_v36  ;;  %v2432_v53 = vmax.f32 %v2299_v32, 0.0  ;;  %2632 = vmatprep.mubr.bf16.mxu0 %v6503_v31 }
 0x324   : > { %v2475_v60 = vpack.c.bf16 %v2419_v49, %v2411_v16  ;;  %v2367_v15 = vpop.f32.mrb[52].mxu1  ;;  %2705 = vmatprep.mubr.bf16.mxu1 %v6503_v31  ;;  %v2433_v0 = vmax.f32 %v2301_v17, 0.0 }
 0x325   : > { %v2368_v12 = vadd.f32 %v2367_v15, %v5737_v33  ;;  %v2369_v37 = vpop.f32.mrb[53].mxu1  ;;  %v2480_v6 = vpack.c.bf16 %v2432_v53, %v2424_v22 }
 0x326   : > { %v2370_v56 = vadd.f32 %v2369_v37, %v5737_v33  ;;  %v2371_v62 = vpop.f32.mrb[54].mxu1  ;;  %2799 = vmatprep.subr.bf16.mxu1 %v2475_v60  ;;  %v2481_v44 = vpack.c.bf16 %v2433_v0, %v2425_v13  ;;  %v2304_v41 = vpop.f32.mrb[56].mxu0 }
 0x327   : > { %v2372_v34 = vadd.f32 %v2371_v62, %v5739_v29  ;;  %v2373_v25 = vpop.f32.mrb[55].mxu1  ;;  %2800 = vmatpush1.bf16.msra.mxu1 %v2474_v14  ;;  %v2305_v23 = vadd.f32 %v2304_v41, %v5749_v28  ;;  %v2306_v2 = vpop.f32.mrb[57].mxu0  ;;  %v2426_v33 = vmax.f32 %v2368_v12, 0.0 }
 0x328   : > { %v2374_v18 = vadd.f32 %v2373_v25, %v5739_v29  ;;  %v2307_v43 = vadd.f32 %v2306_v2, %v5749_v28  ;;  %v2308_v47 = vpop.f32.mrb[58].mxu0  ;;  %2728 = vmatprep.subr.bf16.mxu0 %v2481_v44  ;;  %v2427_v48 = vmax.f32 %v2370_v56, 0.0 }
 0x329   : > { %v2434_v21 = vmax.f32 %v2372_v34, 0.0  ;;  %v2309_v54 = vadd.f32 %v2308_v47, %v5751_v3  ;;  %v2310_v40 = vpop.f32.mrb[59].mxu0  ;;  %2729 = vmatpush1.bf16.msra.mxu0 %v2480_v6  ;;  %v2440_v52 = vmax.f32 %v2305_v23, 0.0 }
 0x32a   : > { %v2435_v59 = vmax.f32 %v2374_v18, 0.0  ;;  %v2311_v9 = vadd.f32 %v2310_v40, %v5751_v3  ;;  %3823 = vmatmul.mubr.msk.bf16.gmra.mrb[72].mxu0 %vm1615_vm0, %v5813_v42  ;;  %v2441_v39 = vmax.f32 %v2307_v43, 0.0 }
 0x32b   : > { %v2482_v19 = vpack.c.bf16 %v2434_v21, %v2426_v33  ;;  %3827 = vmatmul.mubr.msk.bf16.gmra.mrb[72].mxu1 %vm1615_vm0, %v5813_v42  ;;  %v2448_v63 = vmax.f32 %v2309_v54, 0.0  ;;  %2642 = vmatprep.mubr.bf16.mxu0 %v6503_v31 }
 0x32c   : > { %v2483_v29 = vpack.c.bf16 %v2435_v59, %v2427_v48  ;;  %v2377_v58 = vpop.f32.mrb[56].mxu1  ;;  %2715 = vmatprep.mubr.bf16.mxu1 %v6503_v31  ;;  %v2449_v51 = vmax.f32 %v2311_v9, 0.0 }
 0x32d   : > { %v2378_v11 = vadd.f32 %v2377_v58, %v5749_v28  ;;  %v2379_v1 = vpop.f32.mrb[57].mxu1  ;;  %v2488_v55 = vpack.c.bf16 %v2448_v63, %v2440_v52 }
 0x32e   : > { %v2380_v38 = vadd.f32 %v2379_v1, %v5749_v28  ;;  %v2381_v46 = vpop.f32.mrb[58].mxu1  ;;  %2801 = vmatprep.subr.bf16.mxu1 %v2483_v29  ;;  %v2489_v5 = vpack.c.bf16 %v2449_v51, %v2441_v39  ;;  %v2314_v10 = vpop.f32.mrb[60].mxu0 }
 0x32f   : > { %v2382_v20 = vadd.f32 %v2381_v46, %v5751_v3  ;;  %v2383_v26 = vpop.f32.mrb[59].mxu1  ;;  %2802 = vmatpush1.bf16.msra.mxu1 %v2482_v19  ;;  %v2315_v27 = vadd.f32 %v2314_v10, %v5761_v24  ;;  %v2316_v4 = vpop.f32.mrb[61].mxu0  ;;  %v2442_v50 = vmax.f32 %v2378_v11, 0.0 }
 0x330   : > { %v2384_v7 = vadd.f32 %v2383_v26, %v5751_v3  ;;  %v2317_v61 = vadd.f32 %v2316_v4, %v5761_v24  ;;  %v2318_v45 = vpop.f32.mrb[62].mxu0  ;;  %2730 = vmatprep.subr.bf16.mxu0 %v2489_v5  ;;  %v2443_v16 = vmax.f32 %v2380_v38, 0.0 }
 0x331   : > { %v2450_v28 = vmax.f32 %v2382_v20, 0.0  ;;  %v2319_v32 = vadd.f32 %v2318_v45, %v5763_v8  ;;  %v2320_v30 = vpop.f32.mrb[63].mxu0  ;;  %2731 = vmatpush1.bf16.msra.mxu0 %v2488_v55  ;;  %v2456_v60 = vmax.f32 %v2315_v27, 0.0 }
 0x332   : > { %v2451_v49 = vmax.f32 %v2384_v7, 0.0  ;;  %v2321_v17 = vadd.f32 %v2320_v30, %v5763_v8  ;;  %3824 = vmatmul.mubr.msk.bf16.gmra.mrb[76].mxu0 %vm1615_vm0, %v3963_v57  ;;  %v2457_v12 = vmax.f32 %v2317_v61, 0.0 }
 0x333   : > { %v2490_v14 = vpack.c.bf16 %v2450_v28, %v2442_v50  ;;  %3828 = vmatmul.mubr.msk.bf16.gmra.mrb[76].mxu1 %vm1615_vm0, %v3963_v57  ;;  %v2464_v15 = vmax.f32 %v2319_v32, 0.0  ;;  %2758 = vmatprep.mubr.bf16.mxu0 %v6503_v31 }
 0x334   : > { %v2491_v3 = vpack.c.bf16 %v2451_v49, %v2443_v16  ;;  %v2387_v22 = vpop.f32.mrb[60].mxu1  ;;  %2831 = vmatprep.mubr.bf16.mxu1 %v6503_v31  ;;  %v2465_v37 = vmax.f32 %v2321_v17, 0.0 }
 0x335   : > { %v2388_v53 = vadd.f32 %v2387_v22, %v5761_v24  ;;  %v2389_v13 = vpop.f32.mrb[61].mxu1  ;;  %v2496_v56 = vpack.c.bf16 %v2464_v15, %v2456_v60 }
 0x336   : > { %v2390_v0 = vadd.f32 %v2389_v13, %v5761_v24  ;;  %v2391_v6 = vpop.f32.mrb[62].mxu1  ;;  %2803 = vmatprep.subr.bf16.mxu1 %v2491_v3  ;;  %v2497_v34 = vpack.c.bf16 %v2465_v37, %v2457_v12  ;;  %v5867_v24 = vpop.permute.xlu0 %2510 }
 0x337   : > { %v2392_v62 = vadd.f32 %v2391_v6, %v5763_v8  ;;  %v2393_v44 = vpop.f32.mrb[63].mxu1  ;;  %2804 = vmatpush1.bf16.msra.mxu1 %v2490_v14  ;;  %v2458_v41 = vmax.f32 %v2388_v53, 0.0 }
 0x338   : > { %v2394_v25 = vadd.f32 %v2393_v44, %v5763_v8  ;;  %2732 = vmatprep.subr.bf16.mxu0 %v2497_v34  ;;  %v2459_v23 = vmax.f32 %v2390_v0, 0.0  ;;  %v5869_v8 = vpop.permute.xlu1 %2515 }
 0x339   : > { %v2466_v18 = vmax.f32 %v2392_v62, 0.0  ;;  %2733 = vmatpush1.bf16.msra.mxu0 %v2496_v56 }
 0x33a   : > { %v2467_v2 = vmax.f32 %v2394_v25, 0.0  ;;  %v5879_v26 = vpop.permute.xlu0 %2520 }
 0x33b   : > { %v2498_v33 = vpack.c.bf16 %v2466_v18, %v2458_v41 }
 0x33c   : > { %v2499_v21 = vpack.c.bf16 %v2467_v2, %v2459_v23  ;;  %3829 = vmatmul.mubr.msk.bf16.vlgmr.msra.gmra.mrb[80].mxu0 %vm1615_vm0, %v5776_v35  ;;  %v5881_v10 = vpop.permute.xlu1 %2525 }
 0x33d   : > { %2768 = vmatprep.mubr.bf16.mxu0 %v6503_v31 }
 0x33e   : > { %2805 = vmatprep.subr.bf16.mxu1 %v2499_v21  ;;  %v5891_v25 = vpop.permute.xlu0 %2530 }
 0x33f   : > { %2806 = vmatpush1.bf16.msra.mxu1 %v2498_v33 }
 0x340   : > { %v5893_v41 = vpop.permute.xlu1 %2535 }
 0x342   : > { %3833 = vmatmul.mubr.msk.bf16.vlgmr.msra.gmra.mrb[80].mxu1 %vm1615_vm0, %v5776_v35 }
 0x343   : > { %2841 = vmatprep.mubr.bf16.mxu1 %v6503_v31 }
 0x344   : > { %3830 = vmatmul.mubr.msk.bf16.gmra.mrb[84].mxu0 %vm1615_vm0, %v5794_v36 }
 0x345   : > { %2778 = vmatprep.mubr.bf16.mxu0 %v6503_v31 }
 0x34a   : > { %3834 = vmatmul.mubr.msk.bf16.gmra.mrb[84].mxu1 %vm1615_vm0, %v5794_v36 }
 0x34b   : > { %2851 = vmatprep.mubr.bf16.mxu1 %v6503_v31 }
 0x34c   : > { %3831 = vmatmul.mubr.msk.bf16.gmra.mrb[88].mxu0 %vm1615_vm0, %v5813_v42 }
 0x34d   : > { %2788 = vmatprep.mubr.bf16.mxu0 %v6503_v31 }
 0x352   : > { %3835 = vmatmul.mubr.msk.bf16.gmra.mrb[88].mxu1 %vm1615_vm0, %v5813_v42 }
 0x353   : > { %2861 = vmatprep.mubr.bf16.mxu1 %v6503_v31 }
 0x354   : > { %3832 = vmatmul.mubr.msk.bf16.gmra.mrb[92].mxu0 %vm1615_vm0, %v3963_v57 }
 0x355   : > { %3088 = vmatprep.mubr.bf16.mxu0 %v6503_v31 }
 0x35a   : > { %3836 = vmatmul.mubr.msk.bf16.gmra.mrb[92].mxu1 %vm1615_vm0, %v3963_v57 }
 0x35b   : > { %3161 = vmatprep.mubr.bf16.mxu1 %v6503_v31 }
 0x3ed   : > { %v2614_v35 = vpop.f32.mrb[64].mxu0 }
 0x3ee   : > { %v2687_v36 = vpop.f32.mrb[64].mxu1  ;;  %v2615_v43 = vadd.f32 %v2614_v35, %v5867_v24  ;;  %v2616_v47 = vpop.f32.mrb[65].mxu0 }
 0x3ef   : > { %v2688_v42 = vadd.f32 %v2687_v36, %v5867_v24  ;;  %v2689_v48 = vpop.f32.mrb[65].mxu1  ;;  %v2617_v59 = vadd.f32 %v2616_v47, %v5867_v24  ;;  %v2618_v40 = vpop.f32.mrb[66].mxu0 }
 0x3f0   : > { %v2690_v54 = vadd.f32 %v2689_v48, %v5867_v24  ;;  %v2691_v19 = vpop.f32.mrb[66].mxu1  ;;  %v2619_v9 = vadd.f32 %v2618_v40, %v5869_v8  ;;  %v2620_v52 = vpop.f32.mrb[67].mxu0  ;;  %v2880_v39 = vmax.f32 %v2615_v43, 0.0 }
 0x3f1   : > { %v2692_v29 = vadd.f32 %v2691_v19, %v5869_v8  ;;  %v2693_v58 = vpop.f32.mrb[67].mxu1  ;;  %v2621_v63 = vadd.f32 %v2620_v52, %v5869_v8  ;;  %v2882_v1 = vmax.f32 %v2688_v42, 0.0  ;;  %v2881_v55 = vmax.f32 %v2617_v59, 0.0 }
 0x3f2   : > { %v2694_v11 = vadd.f32 %v2693_v58, %v5869_v8  ;;  %v2888_v51 = vmax.f32 %v2619_v9, 0.0  ;;  %v2883_v46 = vmax.f32 %v2690_v54, 0.0 }
 0x3f3   : > { %v2890_v38 = vmax.f32 %v2692_v29, 0.0  ;;  %v2889_v20 = vmax.f32 %v2621_v63, 0.0 }
 0x3f4   : > { %v2891_v5 = vmax.f32 %v2694_v11, 0.0  ;;  %v2944_v57 = vpack.c.bf16 %v2888_v51, %v2880_v39 }
 0x3f5   : > { %v2946_v7 = vpack.c.bf16 %v2890_v38, %v2882_v1  ;;  %v2945_v27 = vpack.c.bf16 %v2889_v20, %v2881_v55  ;;  %v2624_v50 = vpop.f32.mrb[68].mxu0 }
 0x3f6   : > { %v2947_v4 = vpack.c.bf16 %v2891_v5, %v2883_v46  ;;  %v2697_v28 = vpop.f32.mrb[68].mxu1  ;;  %v2625_v61 = vadd.f32 %v2624_v50, %v5879_v26  ;;  %v2626_v16 = vpop.f32.mrb[69].mxu0 }
 0x3f7   : > { %v2698_v45 = vadd.f32 %v2697_v28, %v5879_v26  ;;  %v2699_v49 = vpop.f32.mrb[69].mxu1  ;;  %v2627_v32 = vadd.f32 %v2626_v16, %v5879_v26  ;;  %v2628_v14 = vpop.f32.mrb[70].mxu0  ;;  %3056 = vmatprep.subr.bf16.mxu0 %v2945_v27 }
 0x3f8   : > { %v2700_v30 = vadd.f32 %v2699_v49, %v5879_v26  ;;  %v2701_v17 = vpop.f32.mrb[70].mxu1  ;;  %3129 = vmatprep.subr.bf16.mxu1 %v2947_v4  ;;  %v2629_v3 = vadd.f32 %v2628_v14, %v5881_v10  ;;  %v2630_v22 = vpop.f32.mrb[71].mxu0  ;;  %3057 = vmatpush1.bf16.msra.mxu0 %v2944_v57  ;;  %v2896_v13 = vmax.f32 %v2625_v61, 0.0 }
 0x3f9   : > { %v2702_v60 = vadd.f32 %v2701_v17, %v5881_v10  ;;  %v2703_v15 = vpop.f32.mrb[71].mxu1  ;;  %3130 = vmatpush1.bf16.msra.mxu1 %v2946_v7  ;;  %v2631_v53 = vadd.f32 %v2630_v22, %v5881_v10  ;;  %v2898_v37 = vmax.f32 %v2698_v45, 0.0  ;;  %v2897_v6 = vmax.f32 %v2627_v32, 0.0  ;;  %v5903_v5 = vpop.permute.xlu0 %2540 }
 0x3fa   : > { %v2704_v12 = vadd.f32 %v2703_v15, %v5881_v10  ;;  %v2904_v0 = vmax.f32 %v2629_v3, 0.0  ;;  %v2899_v62 = vmax.f32 %v2700_v30, 0.0  ;;  %v5905_v57 = vpop.permute.xlu1 %2545 }
 0x3fb   : > { %v2906_v56 = vmax.f32 %v2702_v60, 0.0  ;;  %v2905_v34 = vmax.f32 %v2631_v53, 0.0 }
 0x3fc   : > { %v2907_v44 = vmax.f32 %v2704_v12, 0.0  ;;  %v2952_v18 = vpack.c.bf16 %v2904_v0, %v2896_v13 }
 0x3fd   : > { %v2954_v23 = vpack.c.bf16 %v2906_v56, %v2898_v37  ;;  %v2953_v2 = vpack.c.bf16 %v2905_v34, %v2897_v6  ;;  %v2634_v21 = vpop.f32.mrb[72].mxu0 }
 0x3fe   : > { %v2955_v33 = vpack.c.bf16 %v2907_v44, %v2899_v62  ;;  %v2707_v35 = vpop.f32.mrb[72].mxu1  ;;  %v2635_v36 = vadd.f32 %v2634_v21, %v5891_v25  ;;  %v2636_v42 = vpop.f32.mrb[73].mxu0 }
 0x3ff   : > { %v2708_v43 = vadd.f32 %v2707_v35, %v5891_v25  ;;  %v2709_v47 = vpop.f32.mrb[73].mxu1  ;;  %v2637_v48 = vadd.f32 %v2636_v42, %v5891_v25  ;;  %v2638_v54 = vpop.f32.mrb[74].mxu0  ;;  %3058 = vmatprep.subr.bf16.mxu0 %v2953_v2 }
 0x400   : > { %v2710_v59 = vadd.f32 %v2709_v47, %v5891_v25  ;;  %v2711_v40 = vpop.f32.mrb[74].mxu1  ;;  %3131 = vmatprep.subr.bf16.mxu1 %v2955_v33  ;;  %v2639_v19 = vadd.f32 %v2638_v54, %v5893_v41  ;;  %v2640_v29 = vpop.f32.mrb[75].mxu0  ;;  %3059 = vmatpush1.bf16.msra.mxu0 %v2952_v18  ;;  %v2912_v11 = vmax.f32 %v2635_v36, 0.0  ;;  %v5918_v36 = vld [vmem:[%s6178_s9] sm:$0xff]  }
 0x401   : > { %v2712_v9 = vadd.f32 %v2711_v40, %v5893_v41  ;;  %v2713_v52 = vpop.f32.mrb[75].mxu1  ;;  %3132 = vmatpush1.bf16.msra.mxu1 %v2954_v23  ;;  %v2641_v58 = vadd.f32 %v2640_v29, %v5893_v41  ;;  %v2914_v39 = vmax.f32 %v2708_v43, 0.0  ;;  %v2913_v38 = vmax.f32 %v2637_v48, 0.0 }
 0x402   : > { %v2714_v63 = vadd.f32 %v2713_v52, %v5893_v41  ;;  %v2920_v1 = vmax.f32 %v2639_v19, 0.0  ;;  %v2915_v55 = vmax.f32 %v2710_v59, 0.0 }
 0x403   : > { %v2922_v51 = vmax.f32 %v2712_v9, 0.0  ;;  %v2921_v46 = vmax.f32 %v2641_v58, 0.0 }
 0x404   : > { %v2923_v20 = vmax.f32 %v2714_v63, 0.0  ;;  %v2960_v7 = vpack.c.bf16 %v2920_v1, %v2912_v11 }
 0x405   : > { %v2962_v27 = vpack.c.bf16 %v2922_v51, %v2914_v39  ;;  %v2961_v4 = vpack.c.bf16 %v2921_v46, %v2913_v38  ;;  %v2644_v28 = vpop.f32.mrb[76].mxu0 }
 0x406   : > { %v2963_v50 = vpack.c.bf16 %v2923_v20, %v2915_v55  ;;  %v2717_v61 = vpop.f32.mrb[76].mxu1  ;;  %v2645_v45 = vadd.f32 %v2644_v28, %v5903_v5  ;;  %v2646_v49 = vpop.f32.mrb[77].mxu0 }
 0x407   : > { %v2718_v16 = vadd.f32 %v2717_v61, %v5903_v5  ;;  %v2719_v32 = vpop.f32.mrb[77].mxu1  ;;  %v2647_v30 = vadd.f32 %v2646_v49, %v5903_v5  ;;  %v2648_v17 = vpop.f32.mrb[78].mxu0  ;;  %3060 = vmatprep.subr.bf16.mxu0 %v2961_v4 }
 0x408   : > { %v2720_v14 = vadd.f32 %v2719_v32, %v5903_v5  ;;  %v2721_v3 = vpop.f32.mrb[78].mxu1  ;;  %3133 = vmatprep.subr.bf16.mxu1 %v2963_v50  ;;  %v2649_v60 = vadd.f32 %v2648_v17, %v5905_v57  ;;  %v2650_v15 = vpop.f32.mrb[79].mxu0  ;;  %3061 = vmatpush1.bf16.msra.mxu0 %v2960_v7  ;;  %v2928_v37 = vmax.f32 %v2645_v45, 0.0  ;;  %v5936_v7 = vld [vmem:[%s6178_s9 + $0x8] sm:$0xff]  }
 0x409   : > { %v2722_v22 = vadd.f32 %v2721_v3, %v5905_v57  ;;  %v2723_v53 = vpop.f32.mrb[79].mxu1  ;;  %3134 = vmatpush1.bf16.msra.mxu1 %v2962_v27  ;;  %v2651_v12 = vadd.f32 %v2650_v15, %v5905_v57  ;;  %v2930_v0 = vmax.f32 %v2718_v16, 0.0  ;;  %v2929_v62 = vmax.f32 %v2647_v30, 0.0 }
 0x40a   : > { %v2724_v13 = vadd.f32 %v2723_v53, %v5905_v57  ;;  %v2936_v56 = vmax.f32 %v2649_v60, 0.0  ;;  %v2931_v34 = vmax.f32 %v2720_v14, 0.0 }
 0x40b   : > { %v2938_v6 = vmax.f32 %v2722_v22, 0.0  ;;  %v2937_v44 = vmax.f32 %v2651_v12, 0.0 }
 0x40c   : > { %v2939_v18 = vmax.f32 %v2724_v13, 0.0  ;;  %v2968_v23 = vpack.c.bf16 %v2936_v56, %v2928_v37 }
 0x40d   : > { %v2970_v2 = vpack.c.bf16 %v2938_v6, %v2930_v0  ;;  %v2969_v33 = vpack.c.bf16 %v2937_v44, %v2929_v62 }
 0x40e   : > { %v2971_v21 = vpack.c.bf16 %v2939_v18, %v2931_v34  ;;  %v5955_v18 = vld [vmem:[%s6178_s9 + $0x10] sm:$0xff]  }
 0x40f   : > { %v2760_v35 = vpop.f32.mrb[80].mxu0  ;;  %3062 = vmatprep.subr.bf16.mxu0 %v2969_v33 }
 0x410   : > { %3135 = vmatprep.subr.bf16.mxu1 %v2971_v21  ;;  %v2761_v43 = vadd.f32 %v2760_v35, %v5867_v24  ;;  %v2762_v42 = vpop.f32.mrb[81].mxu0  ;;  %3063 = vmatpush1.bf16.msra.mxu0 %v2968_v23 }
 0x411   : > { %3136 = vmatpush1.bf16.msra.mxu1 %v2970_v2  ;;  %v2763_v47 = vadd.f32 %v2762_v42, %v5867_v24  ;;  %v2764_v48 = vpop.f32.mrb[82].mxu0 }
 0x412   : > { %v2765_v59 = vadd.f32 %v2764_v48, %v5869_v8  ;;  %v2766_v54 = vpop.f32.mrb[83].mxu0  ;;  %v2884_v19 = vmax.f32 %v2761_v43, 0.0 }
 0x413   : > { %v2767_v40 = vadd.f32 %v2766_v54, %v5869_v8  ;;  %3841 = vmatmul.mubr.msk.bf16.vlgmr.msra.gmra.mrb[96].mxu0 %vm1615_vm0, %v5918_v36  ;;  %v2885_v58 = vmax.f32 %v2763_v47, 0.0 }
 0x414   : > { %3845 = vmatmul.mubr.msk.bf16.vlgmr.msra.gmra.mrb[96].mxu1 %vm1615_vm0, %v5918_v36  ;;  %v2892_v29 = vmax.f32 %v2765_v59, 0.0  ;;  %3098 = vmatprep.mubr.bf16.mxu0 %v6503_v31 }
 0x415   : > { %v2833_v9 = vpop.f32.mrb[80].mxu1  ;;  %3171 = vmatprep.mubr.bf16.mxu1 %v6503_v31  ;;  %v2893_v11 = vmax.f32 %v2767_v40, 0.0 }
 0x416   : > { %v2834_v52 = vadd.f32 %v2833_v9, %v5867_v24  ;;  %v2835_v63 = vpop.f32.mrb[81].mxu1  ;;  %v2948_v1 = vpack.c.bf16 %v2892_v29, %v2884_v19 }
 0x417   : > { %v2836_v39 = vadd.f32 %v2835_v63, %v5867_v24  ;;  %v2837_v51 = vpop.f32.mrb[82].mxu1  ;;  %v2949_v55 = vpack.c.bf16 %v2893_v11, %v2885_v58  ;;  %v2770_v20 = vpop.f32.mrb[84].mxu0 }
 0x418   : > { %v2838_v38 = vadd.f32 %v2837_v51, %v5869_v8  ;;  %v2839_v46 = vpop.f32.mrb[83].mxu1  ;;  %v2771_v4 = vadd.f32 %v2770_v20, %v5879_v26  ;;  %v2772_v50 = vpop.f32.mrb[85].mxu0  ;;  %v2886_v28 = vmax.f32 %v2834_v52, 0.0 }
 0x419   : > { %v2840_v27 = vadd.f32 %v2839_v46, %v5869_v8  ;;  %v2773_v24 = vadd.f32 %v2772_v50, %v5879_v26  ;;  %v2774_v45 = vpop.f32.mrb[86].mxu0  ;;  %3202 = vmatprep.subr.bf16.mxu0 %v2949_v55  ;;  %v2887_v16 = vmax.f32 %v2836_v39, 0.0 }
 0x41a   : > { %v2894_v61 = vmax.f32 %v2838_v38, 0.0  ;;  %v2775_v32 = vadd.f32 %v2774_v45, %v5881_v10  ;;  %v2776_v30 = vpop.f32.mrb[87].mxu0  ;;  %3203 = vmatpush1.bf16.msra.mxu0 %v2948_v1  ;;  %v2900_v3 = vmax.f32 %v2771_v4, 0.0 }
 0x41b   : > { %v2895_v49 = vmax.f32 %v2840_v27, 0.0  ;;  %v2777_v17 = vadd.f32 %v2776_v30, %v5881_v10  ;;  %3842 = vmatmul.mubr.msk.bf16.gmra.mrb[100].mxu0 %vm1615_vm0, %v5936_v7  ;;  %v2901_v53 = vmax.f32 %v2773_v24, 0.0  ;;  %v3967_v27 = vld [vmem:[%s6178_s9 + $0x18] sm:$0xff]  }
 0x41c   : > { %v2950_v14 = vpack.c.bf16 %v2894_v61, %v2886_v28  ;;  %3846 = vmatmul.mubr.msk.bf16.gmra.mrb[100].mxu1 %vm1615_vm0, %v5936_v7  ;;  %v2908_v22 = vmax.f32 %v2775_v32, 0.0  ;;  %3108 = vmatprep.mubr.bf16.mxu0 %v6503_v31 }
 0x41d   : > { %v2951_v8 = vpack.c.bf16 %v2895_v49, %v2887_v16  ;;  %v2843_v60 = vpop.f32.mrb[84].mxu1  ;;  %3181 = vmatprep.mubr.bf16.mxu1 %v6503_v31  ;;  %v2909_v13 = vmax.f32 %v2777_v17, 0.0 }
 0x41e   : > { %v2844_v15 = vadd.f32 %v2843_v60, %v5879_v26  ;;  %v2845_v12 = vpop.f32.mrb[85].mxu1  ;;  %v2956_v0 = vpack.c.bf16 %v2908_v22, %v2900_v3 }
 0x41f   : > { %v2846_v37 = vadd.f32 %v2845_v12, %v5879_v26  ;;  %v2847_v56 = vpop.f32.mrb[86].mxu1  ;;  %3275 = vmatprep.subr.bf16.mxu1 %v2951_v8  ;;  %v2957_v62 = vpack.c.bf16 %v2909_v13, %v2901_v53  ;;  %v2780_v44 = vpop.f32.mrb[88].mxu0 }
 0x420   : > { %v2848_v6 = vadd.f32 %v2847_v56, %v5881_v10  ;;  %v2849_v34 = vpop.f32.mrb[87].mxu1  ;;  %3276 = vmatpush1.bf16.msra.mxu1 %v2950_v14  ;;  %v2781_v2 = vadd.f32 %v2780_v44, %v5891_v25  ;;  %v2782_v33 = vpop.f32.mrb[89].mxu0  ;;  %v2902_v26 = vmax.f32 %v2844_v15, 0.0 }
 0x421   : > { %v2850_v23 = vadd.f32 %v2849_v34, %v5881_v10  ;;  %v2783_v35 = vadd.f32 %v2782_v33, %v5891_v25  ;;  %v2784_v43 = vpop.f32.mrb[90].mxu0  ;;  %3204 = vmatprep.subr.bf16.mxu0 %v2957_v62  ;;  %v2903_v42 = vmax.f32 %v2846_v37, 0.0 }
 0x422   : > { %v2910_v21 = vmax.f32 %v2848_v6, 0.0  ;;  %v2785_v48 = vadd.f32 %v2784_v43, %v5893_v41  ;;  %v2786_v59 = vpop.f32.mrb[91].mxu0  ;;  %3205 = vmatpush1.bf16.msra.mxu0 %v2956_v0  ;;  %v2916_v19 = vmax.f32 %v2781_v2, 0.0 }
 0x423   : > { %v2911_v47 = vmax.f32 %v2850_v23, 0.0  ;;  %v2787_v40 = vadd.f32 %v2786_v59, %v5893_v41  ;;  %3843 = vmatmul.mubr.msk.bf16.gmra.mrb[104].mxu0 %vm1615_vm0, %v5955_v18  ;;  %v2917_v58 = vmax.f32 %v2783_v35, 0.0 }
 0x424   : > { %v2958_v54 = vpack.c.bf16 %v2910_v21, %v2902_v26  ;;  %3847 = vmatmul.mubr.msk.bf16.gmra.mrb[104].mxu1 %vm1615_vm0, %v5955_v18  ;;  %v2924_v29 = vmax.f32 %v2785_v48, 0.0  ;;  %3118 = vmatprep.mubr.bf16.mxu0 %v6503_v31 }
 0x425   : > { %v2959_v10 = vpack.c.bf16 %v2911_v47, %v2903_v42  ;;  %v2853_v9 = vpop.f32.mrb[88].mxu1  ;;  %3191 = vmatprep.mubr.bf16.mxu1 %v6503_v31  ;;  %v2925_v11 = vmax.f32 %v2787_v40, 0.0 }
 0x426   : > { %v2854_v52 = vadd.f32 %v2853_v9, %v5891_v25  ;;  %v2855_v63 = vpop.f32.mrb[89].mxu1  ;;  %v2964_v1 = vpack.c.bf16 %v2924_v29, %v2916_v19 }
 0x427   : > { %v2856_v39 = vadd.f32 %v2855_v63, %v5891_v25  ;;  %v2857_v51 = vpop.f32.mrb[90].mxu1  ;;  %3277 = vmatprep.subr.bf16.mxu1 %v2959_v10  ;;  %v2965_v55 = vpack.c.bf16 %v2925_v11, %v2917_v58  ;;  %v2790_v20 = vpop.f32.mrb[92].mxu0 }
 0x428   : > { %v2858_v38 = vadd.f32 %v2857_v51, %v5893_v41  ;;  %v2859_v46 = vpop.f32.mrb[91].mxu1  ;;  %3278 = vmatpush1.bf16.msra.mxu1 %v2958_v54  ;;  %v2791_v50 = vadd.f32 %v2790_v20, %v5903_v5  ;;  %v2792_v28 = vpop.f32.mrb[93].mxu0  ;;  %v2918_v61 = vmax.f32 %v2854_v52, 0.0 }
 0x429   : > { %v2860_v4 = vadd.f32 %v2859_v46, %v5893_v41  ;;  %v2793_v24 = vadd.f32 %v2792_v28, %v5903_v5  ;;  %v2794_v45 = vpop.f32.mrb[94].mxu0  ;;  %3206 = vmatprep.subr.bf16.mxu0 %v2965_v55  ;;  %v2919_v16 = vmax.f32 %v2856_v39, 0.0 }
 0x42a   : > { %v2926_v25 = vmax.f32 %v2858_v38, 0.0  ;;  %v2795_v32 = vadd.f32 %v2794_v45, %v5905_v57  ;;  %v2796_v30 = vpop.f32.mrb[95].mxu0  ;;  %3207 = vmatpush1.bf16.msra.mxu0 %v2964_v1  ;;  %v2932_v8 = vmax.f32 %v2791_v50, 0.0 }
 0x42b   : > { %v2927_v49 = vmax.f32 %v2860_v4, 0.0  ;;  %v2797_v17 = vadd.f32 %v2796_v30, %v5905_v57  ;;  %3844 = vmatmul.mubr.msk.bf16.gmra.mrb[108].mxu0 %vm1615_vm0, %v3967_v27  ;;  %v2933_v15 = vmax.f32 %v2793_v24, 0.0 }
 0x42c   : > { %v2966_v14 = vpack.c.bf16 %v2926_v25, %v2918_v61  ;;  %3848 = vmatmul.mubr.msk.bf16.gmra.mrb[108].mxu1 %vm1615_vm0, %v3967_v27  ;;  %v2940_v60 = vmax.f32 %v2795_v32, 0.0  ;;  %3234 = vmatprep.mubr.bf16.mxu0 %v6503_v31 }
 0x42d   : > { %v2967_v41 = vpack.c.bf16 %v2927_v49, %v2919_v16  ;;  %v2863_v3 = vpop.f32.mrb[92].mxu1  ;;  %3307 = vmatprep.mubr.bf16.mxu1 %v6503_v31  ;;  %v2941_v12 = vmax.f32 %v2797_v17, 0.0 }
 0x42e   : > { %v2864_v22 = vadd.f32 %v2863_v3, %v5903_v5  ;;  %v2865_v53 = vpop.f32.mrb[93].mxu1  ;;  %v2972_v37 = vpack.c.bf16 %v2940_v60, %v2932_v8 }
 0x42f   : > { %v2866_v13 = vadd.f32 %v2865_v53, %v5903_v5  ;;  %v2867_v0 = vpop.f32.mrb[94].mxu1  ;;  %3279 = vmatprep.subr.bf16.mxu1 %v2967_v41  ;;  %v2973_v6 = vpack.c.bf16 %v2941_v12, %v2933_v15  ;;  %v6009_v5 = vpop.permute.xlu0 %2986 }
 0x430   : > { %v2868_v56 = vadd.f32 %v2867_v0, %v5905_v57  ;;  %v2869_v62 = vpop.f32.mrb[95].mxu1  ;;  %3280 = vmatpush1.bf16.msra.mxu1 %v2966_v14  ;;  %v2934_v44 = vmax.f32 %v2864_v22, 0.0 }
 0x431   : > { %v2870_v34 = vadd.f32 %v2869_v62, %v5905_v57  ;;  %3208 = vmatprep.subr.bf16.mxu0 %v2973_v6  ;;  %v2935_v2 = vmax.f32 %v2866_v13, 0.0  ;;  %v6011_v57 = vpop.permute.xlu1 %2991 }
 0x432   : > { %v2942_v23 = vmax.f32 %v2868_v56, 0.0  ;;  %3209 = vmatpush1.bf16.msra.mxu0 %v2972_v37 }
 0x433   : > { %v2943_v33 = vmax.f32 %v2870_v34, 0.0  ;;  %v6021_v46 = vpop.permute.xlu0 %2996 }
 0x434   : > { %v2974_v26 = vpack.c.bf16 %v2942_v23, %v2934_v44 }
 0x435   : > { %v2975_v21 = vpack.c.bf16 %v2943_v33, %v2935_v2  ;;  %3849 = vmatmul.mubr.msk.bf16.vlgmr.msra.gmra.mrb[112].mxu0 %vm1615_vm0, %v5918_v36  ;;  %v6023_v20 = vpop.permute.xlu1 %3001 }
 0x436   : > { %3244 = vmatprep.mubr.bf16.mxu0 %v6503_v31 }
 0x437   : > { %3281 = vmatprep.subr.bf16.mxu1 %v2975_v21  ;;  %v6033_v34 = vpop.permute.xlu0 %3006 }
 0x438   : > { %3282 = vmatpush1.bf16.msra.mxu1 %v2974_v26 }
 0x439   : > { %v6035_v44 = vpop.permute.xlu1 %3011 }
 0x43b   : > { %3853 = vmatmul.mubr.msk.bf16.vlgmr.msra.gmra.mrb[112].mxu1 %vm1615_vm0, %v5918_v36 }
 0x43c   : > { %3317 = vmatprep.mubr.bf16.mxu1 %v6503_v31 }
 0x43d   : > { %3850 = vmatmul.mubr.msk.bf16.gmra.mrb[116].mxu0 %vm1615_vm0, %v5936_v7 }
 0x43e   : > { %3254 = vmatprep.mubr.bf16.mxu0 %v6503_v31 }
 0x443   : > { %3854 = vmatmul.mubr.msk.bf16.gmra.mrb[116].mxu1 %vm1615_vm0, %v5936_v7 }
 0x444   : > { %3327 = vmatprep.mubr.bf16.mxu1 %v6503_v31 }
 0x445   : > { %3851 = vmatmul.mubr.msk.bf16.gmra.mrb[120].mxu0 %vm1615_vm0, %v5955_v18 }
 0x446   : > { %3264 = vmatprep.mubr.bf16.mxu0 %v6503_v31 }
 0x44b   : > { %3855 = vmatmul.mubr.msk.bf16.gmra.mrb[120].mxu1 %vm1615_vm0, %v5955_v18 }
 0x44c   : > { %3337 = vmatprep.mubr.bf16.mxu1 %v6503_v31 }
 0x44d   : > { %3852 = vmatmul.mubr.msk.bf16.gmra.mrb[124].mxu0 %vm1615_vm0, %v3967_v27 }
 0x44e   : > { %3498 = vmatprep.mubr.bf16.mxu0 %v6503_v31 }
 0x453   : > { %3856 = vmatmul.mubr.msk.bf16.gmra.mrb[124].mxu1 %vm1615_vm0, %v3967_v27 }
 0x454   : > { %3541 = vmatprep.mubr.bf16.mxu1 %v6503_v31 }
 0x4e6   : > { %v3090_v36 = vpop.f32.mrb[96].mxu0 }
 0x4e7   : > { %v3163_v7 = vpop.f32.mrb[96].mxu1  ;;  %v3091_v35 = vadd.f32 %v3090_v36, %v6009_v5  ;;  %v3092_v43 = vpop.f32.mrb[97].mxu0 }
 0x4e8   : > { %v3164_v18 = vadd.f32 %v3163_v7, %v6009_v5  ;;  %v3165_v42 = vpop.f32.mrb[97].mxu1  ;;  %v3093_v47 = vadd.f32 %v3092_v43, %v6009_v5  ;;  %v3094_v59 = vpop.f32.mrb[98].mxu0 }
 0x4e9   : > { %v3166_v48 = vadd.f32 %v3165_v42, %v6009_v5  ;;  %v3167_v54 = vpop.f32.mrb[98].mxu1  ;;  %v3095_v40 = vadd.f32 %v3094_v59, %v6011_v57  ;;  %v3096_v19 = vpop.f32.mrb[99].mxu0  ;;  %v3350_v58 = vmax.f32 %v3091_v35, 0.0 }
 0x4ea   : > { %v3168_v10 = vadd.f32 %v3167_v54, %v6011_v57  ;;  %v3169_v9 = vpop.f32.mrb[99].mxu1  ;;  %v3097_v29 = vadd.f32 %v3096_v19, %v6011_v57  ;;  %v3352_v63 = vmax.f32 %v3164_v18, 0.0  ;;  %v3351_v1 = vmax.f32 %v3093_v47, 0.0 }
 0x4eb   : > { %v3170_v52 = vadd.f32 %v3169_v9, %v6011_v57  ;;  %v3358_v11 = vmax.f32 %v3095_v40, 0.0  ;;  %v3353_v51 = vmax.f32 %v3166_v48, 0.0 }
 0x4ec   : > { %v3360_v39 = vmax.f32 %v3168_v10, 0.0  ;;  %v3359_v38 = vmax.f32 %v3097_v29, 0.0 }
 0x4ed   : > { %v3361_v55 = vmax.f32 %v3170_v52, 0.0  ;;  %v3414_v27 = vpack.c.bf16 %v3358_v11, %v3350_v58 }
 0x4ee   : > { %v3416_v4 = vpack.c.bf16 %v3360_v39, %v3352_v63  ;;  %v3415_v50 = vpack.c.bf16 %v3359_v38, %v3351_v1  ;;  %v3100_v61 = vpop.f32.mrb[100].mxu0 }
 0x4ef   : > { %v3417_v28 = vpack.c.bf16 %v3361_v55, %v3353_v51  ;;  %v3173_v25 = vpop.f32.mrb[100].mxu1  ;;  %v3101_v24 = vadd.f32 %v3100_v61, %v6021_v46  ;;  %v3102_v16 = vpop.f32.mrb[101].mxu0 }
 0x4f0   : > { %v3174_v45 = vadd.f32 %v3173_v25, %v6021_v46  ;;  %v3175_v49 = vpop.f32.mrb[101].mxu1  ;;  %v3103_v32 = vadd.f32 %v3102_v16, %v6021_v46  ;;  %v3104_v14 = vpop.f32.mrb[102].mxu0  ;;  %3466 = vmatprep.subr.bf16.mxu0 %v3415_v50 }
 0x4f1   : > { %v3176_v30 = vadd.f32 %v3175_v49, %v6021_v46  ;;  %v3177_v17 = vpop.f32.mrb[102].mxu1  ;;  %3509 = vmatprep.subr.bf16.mxu1 %v3417_v28  ;;  %v3105_v41 = vadd.f32 %v3104_v14, %v6023_v20  ;;  %v3106_v3 = vpop.f32.mrb[103].mxu0  ;;  %3467 = vmatpush1.bf16.msra.mxu0 %v3414_v27  ;;  %v3366_v53 = vmax.f32 %v3101_v24, 0.0 }
 0x4f2   : > { %v3178_v8 = vadd.f32 %v3177_v17, %v6023_v20  ;;  %v3179_v60 = vpop.f32.mrb[103].mxu1  ;;  %3510 = vmatpush1.bf16.msra.mxu1 %v3416_v4  ;;  %v3107_v22 = vadd.f32 %v3106_v3, %v6023_v20  ;;  %v3368_v12 = vmax.f32 %v3174_v45, 0.0  ;;  %v3367_v0 = vmax.f32 %v3103_v32, 0.0  ;;  %v6045_v55 = vpop.permute.xlu0 %3016 }
 0x4f3   : > { %v3180_v15 = vadd.f32 %v3179_v60, %v6023_v20  ;;  %v3374_v13 = vmax.f32 %v3105_v41, 0.0  ;;  %v3369_v56 = vmax.f32 %v3176_v30, 0.0  ;;  %v6047_v27 = vpop.permute.xlu1 %3021 }
 0x4f4   : > { %v3376_v37 = vmax.f32 %v3178_v8, 0.0  ;;  %v3375_v6 = vmax.f32 %v3107_v22, 0.0 }
 0x4f5   : > { %v3377_v62 = vmax.f32 %v3180_v15, 0.0  ;;  %v3422_v23 = vpack.c.bf16 %v3374_v13, %v3366_v53 }
 0x4f6   : > { %v3424_v2 = vpack.c.bf16 %v3376_v37, %v3368_v12  ;;  %v3423_v33 = vpack.c.bf16 %v3375_v6, %v3367_v0  ;;  %v3110_v21 = vpop.f32.mrb[104].mxu0 }
 0x4f7   : > { %v3425_v26 = vpack.c.bf16 %v3377_v62, %v3369_v56  ;;  %v3183_v36 = vpop.f32.mrb[104].mxu1  ;;  %v3111_v7 = vadd.f32 %v3110_v21, %v6033_v34  ;;  %v3112_v18 = vpop.f32.mrb[105].mxu0 }
 0x4f8   : > { %v3184_v35 = vadd.f32 %v3183_v36, %v6033_v34  ;;  %v3185_v43 = vpop.f32.mrb[105].mxu1  ;;  %v3113_v42 = vadd.f32 %v3112_v18, %v6033_v34  ;;  %v3114_v48 = vpop.f32.mrb[106].mxu0  ;;  %3468 = vmatprep.subr.bf16.mxu0 %v3423_v33 }
 0x4f9   : > { %v3186_v47 = vadd.f32 %v3185_v43, %v6033_v34  ;;  %v3187_v59 = vpop.f32.mrb[106].mxu1  ;;  %3511 = vmatprep.subr.bf16.mxu1 %v3425_v26  ;;  %v3115_v54 = vadd.f32 %v3114_v48, %v6035_v44  ;;  %v3116_v10 = vpop.f32.mrb[107].mxu0  ;;  %3469 = vmatpush1.bf16.msra.mxu0 %v3422_v23  ;;  %v3382_v52 = vmax.f32 %v3111_v7, 0.0  ;;  %v6060_v7 = vld [vmem:[%s6180_s11] sm:$0xff]  }
 0x4fa   : > { %v3188_v40 = vadd.f32 %v3187_v59, %v6035_v44  ;;  %v3189_v19 = vpop.f32.mrb[107].mxu1  ;;  %3512 = vmatpush1.bf16.msra.mxu1 %v3424_v2  ;;  %v3117_v9 = vadd.f32 %v3116_v10, %v6035_v44  ;;  %v3384_v58 = vmax.f32 %v3184_v35, 0.0  ;;  %v3383_v39 = vmax.f32 %v3113_v42, 0.0 }
 0x4fb   : > { %v3190_v29 = vadd.f32 %v3189_v19, %v6035_v44  ;;  %v3390_v63 = vmax.f32 %v3115_v54, 0.0  ;;  %v3385_v1 = vmax.f32 %v3186_v47, 0.0 }
 0x4fc   : > { %v3392_v11 = vmax.f32 %v3188_v40, 0.0  ;;  %v3391_v51 = vmax.f32 %v3117_v9, 0.0 }
 0x4fd   : > { %v3393_v38 = vmax.f32 %v3190_v29, 0.0  ;;  %v3430_v4 = vpack.c.bf16 %v3390_v63, %v3382_v52 }
 0x4fe   : > { %v3432_v50 = vpack.c.bf16 %v3392_v11, %v3384_v58  ;;  %v3431_v28 = vpack.c.bf16 %v3391_v51, %v3383_v39  ;;  %v3120_v25 = vpop.f32.mrb[108].mxu0 }
 0x4ff   : > { %v3433_v61 = vpack.c.bf16 %v3393_v38, %v3385_v1  ;;  %v3193_v24 = vpop.f32.mrb[108].mxu1  ;;  %v3121_v45 = vadd.f32 %v3120_v25, %v6045_v55  ;;  %v3122_v49 = vpop.f32.mrb[109].mxu0 }
 0x500   : > { %v3194_v16 = vadd.f32 %v3193_v24, %v6045_v55  ;;  %v3195_v32 = vpop.f32.mrb[109].mxu1  ;;  %v3123_v30 = vadd.f32 %v3122_v49, %v6045_v55  ;;  %v3124_v17 = vpop.f32.mrb[110].mxu0  ;;  %3470 = vmatprep.subr.bf16.mxu0 %v3431_v28 }
 0x501   : > { %v3196_v14 = vadd.f32 %v3195_v32, %v6045_v55  ;;  %v3197_v41 = vpop.f32.mrb[110].mxu1  ;;  %3513 = vmatprep.subr.bf16.mxu1 %v3433_v61  ;;  %v3125_v8 = vadd.f32 %v3124_v17, %v6047_v27  ;;  %v3126_v60 = vpop.f32.mrb[111].mxu0  ;;  %3471 = vmatpush1.bf16.msra.mxu0 %v3430_v4  ;;  %v3398_v12 = vmax.f32 %v3121_v45, 0.0 }
 0x502   : > { %v3198_v3 = vadd.f32 %v3197_v41, %v6047_v27  ;;  %v3199_v22 = vpop.f32.mrb[111].mxu1  ;;  %3514 = vmatpush1.bf16.msra.mxu1 %v3432_v50  ;;  %v3127_v15 = vadd.f32 %v3126_v60, %v6047_v27  ;;  %v3400_v13 = vmax.f32 %v3194_v16, 0.0  ;;  %v3399_v56 = vmax.f32 %v3123_v30, 0.0 }
 0x503   : > { %v3200_v53 = vadd.f32 %v3199_v22, %v6047_v27  ;;  %v3406_v37 = vmax.f32 %v3125_v8, 0.0  ;;  %v3401_v6 = vmax.f32 %v3196_v14, 0.0 }
 0x504   : > { %v3408_v0 = vmax.f32 %v3198_v3, 0.0  ;;  %v3407_v62 = vmax.f32 %v3127_v15, 0.0 }
 0x505   : > { %v3409_v23 = vmax.f32 %v3200_v53, 0.0  ;;  %v3438_v2 = vpack.c.bf16 %v3406_v37, %v3398_v12 }
 0x506   : > { %v3440_v33 = vpack.c.bf16 %v3408_v0, %v3400_v13  ;;  %v3439_v26 = vpack.c.bf16 %v3407_v62, %v3399_v56 }
 0x507   : > { %v3441_v21 = vpack.c.bf16 %v3409_v23, %v3401_v6 }
 0x508   : > { %v3236_v36 = vpop.f32.mrb[112].mxu0  ;;  %3472 = vmatprep.subr.bf16.mxu0 %v3439_v26 }
 0x509   : > { %3515 = vmatprep.subr.bf16.mxu1 %v3441_v21  ;;  %v3237_v35 = vadd.f32 %v3236_v36, %v6009_v5  ;;  %v3238_v18 = vpop.f32.mrb[113].mxu0  ;;  %3473 = vmatpush1.bf16.msra.mxu0 %v3438_v2 }
 0x50a   : > { %3516 = vmatpush1.bf16.msra.mxu1 %v3440_v33  ;;  %v3239_v43 = vadd.f32 %v3238_v18, %v6009_v5  ;;  %v3240_v42 = vpop.f32.mrb[114].mxu0 }
 0x50b   : > { %v3241_v47 = vadd.f32 %v3240_v42, %v6011_v57  ;;  %v3242_v48 = vpop.f32.mrb[115].mxu0  ;;  %v3354_v54 = vmax.f32 %v3237_v35, 0.0 }
 0x50c   : > { %v3243_v59 = vadd.f32 %v3242_v48, %v6011_v57  ;;  %3858 = vmatmul.mubr.msk.bf16.vlgmr.msra.gmra.mrb[128].mxu0 %vm1615_vm0, %v6060_v7  ;;  %v3355_v9 = vmax.f32 %v3239_v43, 0.0 }
 0x50d   : > { %3859 = vmatmul.mubr.msk.bf16.vlgmr.msra.gmra.mrb[128].mxu1 %vm1615_vm0, %v6060_v7  ;;  %v3362_v10 = vmax.f32 %v3241_v47, 0.0  ;;  %3584 = vmatprep.mubr.bf16.mxu0 %v6503_v31 }
 0x50e   : > { %v3309_v40 = vpop.f32.mrb[112].mxu1  ;;  %3627 = vmatprep.mubr.bf16.mxu1 %v6503_v31  ;;  %v3363_v52 = vmax.f32 %v3243_v59, 0.0 }
 0x50f   : > { %v3310_v19 = vadd.f32 %v3309_v40, %v6009_v5  ;;  %v3311_v29 = vpop.f32.mrb[113].mxu1  ;;  %v3418_v63 = vpack.c.bf16 %v3362_v10, %v3354_v54 }
 0x510   : > { %v3312_v58 = vadd.f32 %v3311_v29, %v6009_v5  ;;  %v3313_v11 = vpop.f32.mrb[114].mxu1  ;;  %v3419_v1 = vpack.c.bf16 %v3363_v52, %v3355_v9  ;;  %v3246_v38 = vpop.f32.mrb[116].mxu0 }
 0x511   : > { %v3314_v39 = vadd.f32 %v3313_v11, %v6011_v57  ;;  %v3315_v51 = vpop.f32.mrb[115].mxu1  ;;  %v3247_v50 = vadd.f32 %v3246_v38, %v6021_v46  ;;  %v3248_v28 = vpop.f32.mrb[117].mxu0  ;;  %v3356_v31 = vmax.f32 %v3310_v19, 0.0 }
 0x512   : > { %v3316_v4 = vadd.f32 %v3315_v51, %v6011_v57  ;;  %v3249_v25 = vadd.f32 %v3248_v28, %v6021_v46  ;;  %v3250_v24 = vpop.f32.mrb[118].mxu0  ;;  %3552 = vmatprep.subr.bf16.mxu0 %v3419_v1  ;;  %v3357_v45 = vmax.f32 %v3312_v58, 0.0 }
 0x513   : > { %v3364_v61 = vmax.f32 %v3314_v39, 0.0  ;;  %v3251_v16 = vadd.f32 %v3250_v24, %v6023_v20  ;;  %v3252_v49 = vpop.f32.mrb[119].mxu0  ;;  %3553 = vmatpush1.bf16.msra.mxu0 %v3418_v63  ;;  %v3370_v57 = vmax.f32 %v3247_v50, 0.0 }
 0x514   : > { %v3365_v5 = vmax.f32 %v3316_v4, 0.0  ;;  %v3253_v30 = vadd.f32 %v3252_v49, %v6023_v20  ;;  %v3371_v3 = vmax.f32 %v3249_v25, 0.0 }
 0x515   : > { %v3420_v32 = vpack.c.bf16 %v3364_v61, %v3356_v31  ;;  %v3378_v41 = vmax.f32 %v3251_v16, 0.0 }
 0x516   : > { %v3421_v14 = vpack.c.bf16 %v3365_v5, %v3357_v45  ;;  %v3319_v17 = vpop.f32.mrb[116].mxu1  ;;  %v3379_v22 = vmax.f32 %v3253_v30, 0.0 }
 0x517   : > { %v3320_v8 = vadd.f32 %v3319_v17, %v6021_v46  ;;  %v3321_v60 = vpop.f32.mrb[117].mxu1  ;;  %v3426_v53 = vpack.c.bf16 %v3378_v41, %v3370_v57 }
 0x518   : > { %v3322_v15 = vadd.f32 %v3321_v60, %v6021_v46  ;;  %v3323_v12 = vpop.f32.mrb[118].mxu1  ;;  %3595 = vmatprep.subr.bf16.mxu1 %v3421_v14  ;;  %v3427_v37 = vpack.c.bf16 %v3379_v22, %v3371_v3  ;;  %v3256_v56 = vpop.f32.mrb[120].mxu0 }
 0x519   : > { %v3324_v13 = vadd.f32 %v3323_v12, %v6023_v20  ;;  %v3325_v0 = vpop.f32.mrb[119].mxu1  ;;  %3596 = vmatpush1.bf16.msra.mxu1 %v3420_v32  ;;  %v3257_v62 = vadd.f32 %v3256_v56, %v6033_v34  ;;  %v3258_v23 = vpop.f32.mrb[121].mxu0  ;;  %v3372_v2 = vmax.f32 %v3320_v8, 0.0 }
 0x51a   : > { %v3326_v6 = vadd.f32 %v3325_v0, %v6023_v20  ;;  %v3259_v26 = vadd.f32 %v3258_v23, %v6033_v34  ;;  %v3260_v21 = vpop.f32.mrb[122].mxu0  ;;  %3554 = vmatprep.subr.bf16.mxu0 %v3427_v37  ;;  %v3373_v46 = vmax.f32 %v3322_v15, 0.0 }
 0x51b   : > { %v3380_v33 = vmax.f32 %v3324_v13, 0.0  ;;  %v3261_v35 = vadd.f32 %v3260_v21, %v6035_v44  ;;  %v3262_v18 = vpop.f32.mrb[123].mxu0  ;;  %3555 = vmatpush1.bf16.msra.mxu0 %v3426_v53  ;;  %v3386_v20 = vmax.f32 %v3257_v62, 0.0 }
 0x51c   : > { %v3381_v36 = vmax.f32 %v3326_v6, 0.0  ;;  %v3263_v42 = vadd.f32 %v3262_v18, %v6035_v44  ;;  %v3387_v40 = vmax.f32 %v3259_v26, 0.0  ;;  %v3451_v6 = vpop.permute.xlu0 %3450 }
 0x51d   : > { %v3428_v43 = vpack.c.bf16 %v3380_v33, %v3372_v2  ;;  %v3394_v59 = vmax.f32 %v3261_v35, 0.0 }
 0x51e   : > { %v3429_v47 = vpack.c.bf16 %v3381_v36, %v3373_v46  ;;  %v3329_v48 = vpop.f32.mrb[120].mxu1  ;;  %v3395_v19 = vmax.f32 %v3263_v42, 0.0 }
 0x51f   : > { %v3330_v54 = vadd.f32 %v3329_v48, %v6033_v34  ;;  %v3331_v10 = vpop.f32.mrb[121].mxu1  ;;  %v3434_v29 = vpack.c.bf16 %v3394_v59, %v3386_v20 }
 0x520   : > { %v3332_v9 = vadd.f32 %v3331_v10, %v6033_v34  ;;  %v3333_v52 = vpop.f32.mrb[122].mxu1  ;;  %3597 = vmatprep.subr.bf16.mxu1 %v3429_v47  ;;  %v3435_v63 = vpack.c.bf16 %v3395_v19, %v3387_v40  ;;  %v3266_v39 = vpop.f32.mrb[124].mxu0 }
 0x521   : > { %v3334_v58 = vadd.f32 %v3333_v52, %v6035_v44  ;;  %v3335_v11 = vpop.f32.mrb[123].mxu1  ;;  %3598 = vmatpush1.bf16.msra.mxu1 %v3428_v43  ;;  %v3267_v51 = vadd.f32 %v3266_v39, %v6045_v55  ;;  %v3268_v38 = vpop.f32.mrb[125].mxu0  ;;  %v3388_v4 = vmax.f32 %v3330_v54, 0.0 }
 0x522   : > { %v3336_v1 = vadd.f32 %v3335_v11, %v6035_v44  ;;  %v3269_v28 = vadd.f32 %v3268_v38, %v6045_v55  ;;  %v3270_v31 = vpop.f32.mrb[126].mxu0  ;;  %3556 = vmatprep.subr.bf16.mxu0 %v3435_v63  ;;  %v3389_v34 = vmax.f32 %v3332_v9, 0.0 }
 0x523   : > { %v3396_v50 = vmax.f32 %v3334_v58, 0.0  ;;  %v3271_v25 = vadd.f32 %v3270_v31, %v6047_v27  ;;  %v3272_v24 = vpop.f32.mrb[127].mxu0  ;;  %3557 = vmatpush1.bf16.msra.mxu0 %v3434_v29  ;;  %v3402_v44 = vmax.f32 %v3267_v51, 0.0 }
 0x524   : > { %v3397_v61 = vmax.f32 %v3336_v1, 0.0  ;;  %v3273_v5 = vadd.f32 %v3272_v24, %v6047_v27  ;;  %v3403_v14 = vmax.f32 %v3269_v28, 0.0 }
 0x525   : > { %v3436_v45 = vpack.c.bf16 %v3396_v50, %v3388_v4  ;;  %v3410_v32 = vmax.f32 %v3271_v25, 0.0 }
 0x526   : > { %v3437_v16 = vpack.c.bf16 %v3397_v61, %v3389_v34  ;;  %v3339_v49 = vpop.f32.mrb[124].mxu1  ;;  %v3411_v17 = vmax.f32 %v3273_v5, 0.0 }
 0x527   : > { %v3340_v30 = vadd.f32 %v3339_v49, %v6045_v55  ;;  %v3341_v57 = vpop.f32.mrb[125].mxu1  ;;  %v3442_v8 = vpack.c.bf16 %v3410_v32, %v3402_v44 }
 0x528   : > { %v3342_v41 = vadd.f32 %v3341_v57, %v6045_v55  ;;  %v3343_v3 = vpop.f32.mrb[126].mxu1  ;;  %3599 = vmatprep.subr.bf16.mxu1 %v3437_v16  ;;  %v3443_v22 = vpack.c.bf16 %v3411_v17, %v3403_v14 }
 0x529   : > { %v3344_v60 = vadd.f32 %v3343_v3, %v6047_v27  ;;  %v3345_v15 = vpop.f32.mrb[127].mxu1  ;;  %3600 = vmatpush1.bf16.msra.mxu1 %v3436_v45  ;;  %v3404_v12 = vmax.f32 %v3340_v30, 0.0 }
 0x52a   : > { %v3346_v53 = vadd.f32 %v3345_v15, %v6047_v27  ;;  %3558 = vmatprep.subr.bf16.mxu0 %v3443_v22  ;;  %v3405_v37 = vmax.f32 %v3342_v41, 0.0  ;;  %v3456_v27 = vpop.permute.xlu1 %3455 }
 0x52b   : > { %v3412_v13 = vmax.f32 %v3344_v60, 0.0  ;;  %3559 = vmatpush1.bf16.msra.mxu0 %v3442_v8 }
 0x52c   : > { %v3413_v0 = vmax.f32 %v3346_v53, 0.0 }
 0x52d   : > { %v3444_v56 = vpack.c.bf16 %v3412_v13, %v3404_v12 }
 0x52e   : > { %v3445_v55 = vpack.c.bf16 %v3413_v0, %v3405_v37  ;;  %3860 = vmatmul.mubr.msk.bf16.vlgmr.msra.gmra.mrb[132].mxu0 %vm1615_vm0, %v6060_v7 }
 0x530   : > { %3601 = vmatprep.subr.bf16.mxu1 %v3445_v55 }
 0x531   : > { %3602 = vmatpush1.bf16.msra.mxu1 %v3444_v56 }
 0x534   : > { %3861 = vmatmul.mubr.msk.bf16.vlgmr.msra.gmra.mrb[132].mxu1 %vm1615_vm0, %v6060_v7 }
 0x5df   : > { %v3500_v62 = vpop.f32.mrb[128].mxu0 }
 0x5e0   : > { %v3543_v23 = vpop.f32.mrb[128].mxu1  ;;  %v3501_v2 = vadd.f32 %v3500_v62, %v3451_v6  ;;  %v3502_v26 = vpop.f32.mrb[129].mxu0 }
 0x5e1   : > { %v3544_v33 = vadd.f32 %v3543_v23, %v3451_v6  ;;  %v3545_v21 = vpop.f32.mrb[129].mxu1  ;;  %v3503_v46 = vadd.f32 %v3502_v26, %v3451_v6  ;;  %v3504_v35 = vpop.f32.mrb[130].mxu0 }
 0x5e2   : > { %v3546_v36 = vadd.f32 %v3545_v21, %v3451_v6  ;;  %v3547_v18 = vpop.f32.mrb[130].mxu1  ;;  %v3505_v43 = vadd.f32 %v3504_v35, %v3456_v27  ;;  %v3506_v47 = vpop.f32.mrb[131].mxu0 }
 0x5e3   : > { %v3548_v42 = vadd.f32 %v3547_v18, %v3456_v27  ;;  %v3549_v20 = vpop.f32.mrb[131].mxu1  ;;  %v3875_v7 = vpack.c.bf16 %v3503_v46, %v3501_v2  ;;  %v3507_v59 = vadd.f32 %v3506_v47, %v3456_v27 }
 0x5e4   : > { %v3876_v48 = vpack.c.bf16 %v3546_v36, %v3544_v33  ;;  %v3550_v54 = vadd.f32 %v3549_v20, %v3456_v27 }
 0x5e5   : > { %3686 = vst [vmem:[%s6107_s27] sm:$0xff] %v3875_v7  ;;  %v3879_v40 = vpack.c.bf16 %v3507_v59, %v3505_v43 }
 0x5e6   : > { %3687 = vst [vmem:[%s6107_s27 + $0x8] sm:$0xff] %v3876_v48  ;;  %v3880_v10 = vpack.c.bf16 %v3550_v54, %v3548_v42 }
 0x5e7   : > { %3690 = vst [vmem:[%s6107_s27 + $0x20] sm:$0xff] %v3879_v40 }
 0x5e8   : > { %3691 = vst [vmem:[%s6107_s27 + $0x28] sm:$0xff] %v3880_v10 }
 0x601   : > { %v3586_v19 = vpop.f32.mrb[132].mxu0 }
 0x602   : > { %v3587_v9 = vadd.f32 %v3586_v19, %v3451_v6  ;;  %v3588_v29 = vpop.f32.mrb[133].mxu0 }
 0x603   : > { %v3589_v52 = vadd.f32 %v3588_v29, %v3451_v6  ;;  %v3590_v58 = vpop.f32.mrb[134].mxu0 }
 0x604   : > { %v3591_v63 = vadd.f32 %v3590_v58, %v3456_v27  ;;  %v3592_v11 = vpop.f32.mrb[135].mxu0 }
 0x605   : > { %v3877_v39 = vpack.c.bf16 %v3589_v52, %v3587_v9  ;;  %v3593_v1 = vadd.f32 %v3592_v11, %v3456_v27 }
 0x607   : > { %v3629_v51 = vpop.f32.mrb[132].mxu1  ;;  %3688 = vst [vmem:[%s6107_s27 + $0x10] sm:$0xff] %v3877_v39  ;;  %v3881_v50 = vpack.c.bf16 %v3593_v1, %v3591_v63 }
 0x608   : > { %v3630_v38 = vadd.f32 %v3629_v51, %v3451_v6  ;;  %v3631_v4 = vpop.f32.mrb[133].mxu1 }
 0x609   : > { %v3632_v28 = vadd.f32 %v3631_v4, %v3451_v6  ;;  %v3633_v31 = vpop.f32.mrb[134].mxu1  ;;  %3692 = vst [vmem:[%s6107_s27 + $0x30] sm:$0xff] %v3881_v50 }
 0x60a   : > { %v3634_v34 = vadd.f32 %v3633_v31, %v3456_v27  ;;  %v3635_v61 = vpop.f32.mrb[135].mxu1 }
 0x60b   : > { %v3878_v25 = vpack.c.bf16 %v3632_v28, %v3630_v38  ;;  %v3636_v24 = vadd.f32 %v3635_v61, %v3456_v27 }
 0x60d   : > { %3689 = vst [vmem:[%s6107_s27 + $0x18] sm:$0xff] %v3878_v25  ;;  %v3882_v45 = vpack.c.bf16 %v3636_v24, %v3634_v34 }
 0x60f   : > { %3693 = vst [vmem:[%s6107_s27 + $0x38] sm:$0xff] %v3882_v45 }
 0x610   : > { %3982 = shalt.err (!%p3979_p3)
}
 0x611   : > { %s3983_s20 = scalar_lea.hbm %s6122_s15, 1024  ;;  %s3987_s24 = scalar_lea.hbm %s6182_s13, 2048 }
 0x612   : > { %p3984_p4 = scmp.ne.s32.totalorder %s6122_s15, %s3983_s20  ;;  %p3988_p9 = scmp.lt.u32.totalorder %s6122_s15, %s6182_s13 }
 0x613   : > { %p3989_p10 = scmp.lt.u32.totalorder %s3987_s24, %s3983_s20  ;;  %p3991_p12 = scmp.lt.u32.totalorder %s3983_s20, %s6122_s15 }
 0x614   : > { %p3985_p7 = pnand %p3984_p4, %p4149_p5 }
 0x615   : > { %p3990_p11 = por %p3989_p10, %p3988_p9 }
 0x616   : > { %p3986_p8 = pneg %p3985_p7 }
 0x617   : > { %p3992_p13 = por %p3991_p12, %p3990_p11 }
 0x619   : > { %p3993_p0 = pnand %p3992_p13, %p3986_p8 }
 0x61b   : > { %3996 = shalt.err (!%p3993_p0)
}
 0x61c   : > { %s4038_s1 = smov 512   ;;  %s4039_s23 = smov 1024  }
 0x61d   : > { %s4040_s21 = smov 32  }
 0x61e   : > { %3884 = dma.vmem_to_hbm [thread:$0]  (%p4149_p5), %s6117_s17, 1024, %s6122_s15, %s6128_s29, %s4038_s1, %s4039_s23, %s4040_s21  }
 0x61f PF: > { %p3890_p1 = scmp.ge.s32.totalorder %s4031_s28, 2  ;;  %s3723_s27 = sand.u32 1, %s4019_s25  }
 0x620   : > { %s3724_s20 = scalar_lea.sflag [#allocation3], %s3723_s27 }
 0x621   : > { %p3887_p2 = pnand %p3890_p1, %p4153_p6 }
 0x623   : > { %4014 = dma.done.wait (!%p3887_p2), %s3724_s20, 1024  }
 0x624   : > { %4016 = vsyncadd (!%p3887_p2), %s3724_s20, 4294966272  ;;  %s6518_s22 = sld [smem:[#allocation5_spill]]  ;;  %s6519_s27 = sld [smem:[#allocation6_spill]] }
 0x625   : > { %p23_p3 = scmp.ge.s32.totalorder %s4136_s14, 4   ;;  %s6520_s25 = smov %s4023_s26 }
 0x626   : > { %s6522_s28 = smov %s4136_s14 }
 0x627   :  { %25 = sbr.rel (!%p23_p3) target bundleno = 5 (0x5), region = 107 }
 0x62a   : > { %s6521_s26 = smov %s6518_s22 }
 0x62e   :  { %3729 = vsyncpa [#allocation3], 1 }
 0x62f   :  { %3731 = vsyncpa [#allocation3 + $0x1], 1 }

</bundles_post_ra>
